<compile_context>
chip_gen: v5e
topology: v5e:2x2
jax: 0.10.0
libtpu: 0.0.40
codegen_flags: <defaults>
</compile_context>

<pallas_src>
import functools

import jax
import jax.numpy as jnp
from jax import lax
from jax.experimental import pallas as pl
from jax.experimental.pallas import tpu as pltpu

N_EMBD = 32
BLOCK_SIZE = 8
N_HEAD = 4
HEAD_SIZE = N_EMBD // N_HEAD  # 8


def _block_kernel(x_ref, wqkv_ref, wp_ref, bp_ref, w1_ref, b1_ref, w2_ref, b2_ref,
                  o_ref, *, bt, use_bf16):
    T = BLOCK_SIZE
    C = N_EMBD
    H = N_HEAD
    HS = HEAD_SIZE
    M = bt * T
    mm_dtype = jnp.bfloat16 if use_bf16 else jnp.float32

    def mm(a, b):  # MXU matmul, f32 accumulation
        return jnp.dot(a.astype(mm_dtype), b.astype(mm_dtype),
                       preferred_element_type=jnp.float32)

    # (C, M): features on sublanes, tokens (batch-major, t-minor) on lanes.
    xT = x_ref[...]

    # ---- fused Q/K/V projection, transposed: (3C, C) @ (C, M) -> (3C, M) ----
    qkvT = mm(wqkv_ref[...], xT)
    qT = qkvT[0 * C:1 * C, :]          # sublane slices at 8-aligned offsets (free)
    kT = qkvT[1 * C:2 * C, :]
    vT = qkvT[2 * C:3 * C, :]

    # Token position within its sequence, per lane (tokens are b-major, t-minor).
    tpos = lax.broadcasted_iota(jnp.int32, (1, M), 1) % T          # (1, M)

    # ---- merged-head causal attention, lane-dense, VPU/XLU only ----
    # Diagonal formulation: for offset r, the key of the token in lane m sits in
    # lane m - r (pltpu.roll).  Lanes that wrapped (tpos < r) are exactly the
    # causally-masked entries and receive a large finite negative additive bias.
    scale = HS ** -0.5
    neg = jnp.float32(-1e30)
    s_list = []
    for r in range(T):                                             # static, T == 8
        kr = kT if r == 0 else pltpu.roll(kT, r, axis=1)
        # contract over head_size (sublane reduce of 8 rows per head)
        s = jnp.sum((qT * kr).reshape(H, HS, M), axis=1) * scale   # (H, M)
        if r > 0:
            s = s + jnp.where(tpos >= r, 0.0, neg)                 # additive causal bias
        s_list.append(s)

    m = s_list[0]
    for s in s_list[1:]:
        m = jnp.maximum(m, s)
    p_list = [jnp.exp(s - m) for s in s_list]
    denom = p_list[0]
    for p in p_list[1:]:
        denom = denom + p
    inv = pl.reciprocal(denom, approx=True)                        # (H, M), EUP slot

    acc = p_list[0][:, None, :] * vT.reshape(H, HS, M)             # (H, HS, M)
    for r in range(1, T):
        vr = pltpu.roll(vT, r, axis=1).reshape(H, HS, M)
        acc = acc + p_list[r][:, None, :] * vr
    ohT = (acc * inv[:, None, :]).reshape(C, M)                    # heads stacked on features

    # ---- output projection (single K=C matmul) + residual 1 ----
    saT = mm(wp_ref[...], ohT) + bp_ref[...]                       # (C, M) + (C, 1)
    x1T = xT + saT

    # ---- FeedForward: ReLU(W1 x + b1) -> W2 (.) + b2, residual 2 ----
    h1T = jnp.maximum(mm(w1_ref[...], x1T) + b1_ref[...], 0.0)     # (4C, M)
    ffT = mm(w2_ref[...], h1T) + b2_ref[...]                       # (C, M)

    o_ref[...] = x1T + ffT                                         # lane-dense store


def _choose_bt(B, target):
    """Batch-chunk size: multiple of 16 (so bt*T is lane-aligned), preferring a
    divisor of B (no padding) and leaving >= 2 grid chunks (v7x has 2 TCs)."""
    if B < 32:                       # too small for two >=16 chunks: single chunk
        return B                     # block == full array, always a legal BlockSpec
    cap = min(max(target, 16), (B // 2) // 16 * 16)
    cap = max(cap, 16)
    for c in range(cap, 15, -16):
        if B % c == 0:
            return c
    return cap                       # no aligned divisor: pad the tail chunk


def block_forward(x, params, *, bt=256, use_bf16=None):
    """x: (B, T, C) float32. params: (wk, wq, wv, wp, bp, w1, b1, w2, b2), each W of
    shape (in, out) so that y = x @ W + b matches PyTorch nn.Linear."""
    B, T, C = x.shape
    assert T == BLOCK_SIZE and C == N_EMBD

    if use_bf16 is None:  # bf16 MXU inputs on v6e/v7x; keep f32 on v5e and older
        try:
            kind = jax.devices()[0].device_kind.lower()
            use_bf16 = not any(s in kind for s in ("v2", "v3", "v4", "v5"))
        except Exception:
            use_bf16 = False

    wk, wq, wv, wp, bp, w1, b1, w2, b2 = params
    wqkv_t = jnp.concatenate([wq, wk, wv], axis=1).T       # (3C, C): rows = [q | k | v]
    wp_t = wp.T                                            # (C, C)
    bp_t = jnp.reshape(bp, (C, 1))
    w1_t = w1.T                                            # (4C, C)
    b1_t = jnp.reshape(b1, (4 * C, 1))
    w2_t = w2.T                                            # (C, 4C)
    b2_t = jnp.reshape(b2, (C, 1))

    bt = _choose_bt(B, bt)
    n_chunks = pl.cdiv(B, bt)
    Bp = n_chunks * bt
    M = bt * T

    xT = x.reshape(B * T, C).T                             # (C, B*T) tokens on lanes
    if Bp != B:                                            # only for batches with no
        xT = jnp.pad(xT, ((0, 0), (0, (Bp - B) * T)))      # 16-aligned divisor

    def full(a):
        nd = a.ndim
        return pl.BlockSpec(a.shape, lambda i: (0,) * nd)  # resident weights

    kernel = functools.partial(_block_kernel, bt=bt, use_bf16=use_bf16)

    # VMEM note: at bt=256 the double-buffered I/O blocks + resident weights +
    # intermediates are a few MiB, far under the 32 MiB scoped default on every
    # generation (re-check / set vmem_limit_bytes only if bt is pushed >= ~1024).
    outT = pl.pallas_call(
        kernel,
        out_shape=jax.ShapeDtypeStruct((C, Bp * T), jnp.float32),
        grid_spec=pltpu.PrefetchScalarGridSpec(
            num_scalar_prefetch=0,
            grid=(n_chunks,),
            in_specs=[
                pl.BlockSpec((C, M), lambda i: (0, i)),    # x chunk, tokens on lanes
                full(wqkv_t), full(wp_t), full(bp_t),
                full(w1_t), full(b1_t), full(w2_t), full(b2_t),
            ],
            out_specs=pl.BlockSpec((C, M), lambda i: (0, i)),
        ),
        compiler_params=pltpu.CompilerParams(
            dimension_semantics=("parallel",),             # >=2 chunks -> both v7x TCs
        ),
    )(xT, wqkv_t, wp_t, bp_t, w1_t, b1_t, w2_t, b2_t)

    return outT[:, :B * T].T.reshape(B, T, C)


def reference_forward(x, params):
    """Plain-JAX reference mirroring the PyTorch Block semantics."""
    wk, wq, wv, wp, bp, w1, b1, w2, b2 = params
    B, T, C = x.shape
    k = x @ wk
    q = x @ wq
    v = x @ wv
    keep = jnp.tril(jnp.ones((T, T), dtype=bool))
    outs = []
    for h in range(N_HEAD):
        sl = slice(h * HEAD_SIZE, (h + 1) * HEAD_SIZE)
        wei = jnp.einsum('btd,bsd->bts', q[..., sl], k[..., sl]) * (HEAD_SIZE ** -0.5)
        wei = jnp.where(keep[None], wei, -jnp.inf)
        wei = jax.nn.softmax(wei, axis=-1)
        outs.append(jnp.einsum('bts,bsd->btd', wei, v[..., sl]))
    sa = jnp.concatenate(outs, axis=-1) @ wp + bp.reshape(1, 1, C)
    x1 = x + sa
    ff = jnp.maximum(x1 @ w1 + b1.reshape(1, 1, 4 * C), 0.0) @ w2 + b2.reshape(1, 1, C)
    return x1 + ff


def init_params(key):
    C = N_EMBD
    ks = jax.random.split(key, 9)
    scale = 0.08
    wk = scale * jax.random.normal(ks[0], (C, C), jnp.float32)
    wq = scale * jax.random.normal(ks[1], (C, C), jnp.float32)
    wv = scale * jax.random.normal(ks[2], (C, C), jnp.float32)
    wp = scale * jax.random.normal(ks[3], (C, C), jnp.float32)
    bp = scale * jax.random.normal(ks[4], (1, C), jnp.float32)
    w1 = scale * jax.random.normal(ks[5], (C, 4 * C), jnp.float32)
    b1 = scale * jax.random.normal(ks[6], (1, 4 * C), jnp.float32)
    w2 = scale * jax.random.normal(ks[7], (4 * C, C), jnp.float32)
    b2 = scale * jax.random.normal(ks[8], (1, C), jnp.float32)
    return (wk, wq, wv, wp, bp, w1, b1, w2, b2)


if __name__ == "__main__":
    key = jax.random.PRNGKey(0)
    kx, kp = jax.random.split(key)
    params = init_params(kp)

    # Main check: B=64 -> bt=32, 2 grid chunks; strict tolerance on the f32 MXU path
    # (portable across TPU generations; the approx reciprocal is ~2e-4 relative).
    B = 64
    x = jax.random.normal(kx, (B, BLOCK_SIZE, N_EMBD), jnp.float32)
    ref = reference_forward(x, params)
    out_f32 = jax.block_until_ready(block_forward(x, params, use_bf16=False))
    assert out_f32.shape == x.shape
    assert jnp.allclose(out_f32, ref, atol=5e-3, rtol=5e-3), "mismatch vs reference (f32 path)"

    # Default (auto bf16 on v6e/v7x) path + ragged batch: exercises the padded tail chunk.
    x_r = x[:50]
    ref_r = reference_forward(x_r, params)
    out_r = jax.block_until_ready(block_forward(x_r, params))
    assert out_r.shape == x_r.shape
    assert jnp.allclose(out_r, ref_r, atol=5e-2, rtol=5e-2), "mismatch vs reference (default path)"

    print("KERNEL_OK")
</pallas_src>

<mosaic_0001>
module attributes {stable_mosaic.version = 11 : i64} {
  func.func @_block_kernel(%arg0: i32, %arg1: memref<32x256xf32, #tpu.memory_space<vmem>>, %arg2: memref<96x32xf32, #tpu.memory_space<vmem>>, %arg3: memref<32x32xf32, #tpu.memory_space<vmem>>, %arg4: memref<32x1xf32, #tpu.memory_space<vmem>>, %arg5: memref<128x32xf32, #tpu.memory_space<vmem>>, %arg6: memref<128x1xf32, #tpu.memory_space<vmem>>, %arg7: memref<32x128xf32, #tpu.memory_space<vmem>>, %arg8: memref<32x1xf32, #tpu.memory_space<vmem>>, %arg9: memref<32x256xf32, #tpu.memory_space<vmem>>) attributes {dimension_semantics = [#tpu.dimension_semantics<parallel>], iteration_bounds = array<i64: 2>, scalar_prefetch = 0 : i64, scratch_operands = 0 : i64, tpu.core_type = #tpu.core_type<tc>, window_params = [{transform_indices = @transform_0, window_bounds = array<i64: 32, 256>}, {pipeline_mode = #tpu.pipeline_mode<synchronous>, transform_indices = @transform_1, window_bounds = array<i64: 96, 32>}, {pipeline_mode = #tpu.pipeline_mode<synchronous>, transform_indices = @transform_2, window_bounds = array<i64: 32, 32>}, {pipeline_mode = #tpu.pipeline_mode<synchronous>, transform_indices = @transform_3, window_bounds = array<i64: 32, 1>}, {pipeline_mode = #tpu.pipeline_mode<synchronous>, transform_indices = @transform_4, window_bounds = array<i64: 128, 32>}, {pipeline_mode = #tpu.pipeline_mode<synchronous>, transform_indices = @transform_5, window_bounds = array<i64: 128, 1>}, {pipeline_mode = #tpu.pipeline_mode<synchronous>, transform_indices = @transform_6, window_bounds = array<i64: 32, 128>}, {pipeline_mode = #tpu.pipeline_mode<synchronous>, transform_indices = @transform_7, window_bounds = array<i64: 32, 1>}, {transform_indices = @transform_8, window_bounds = array<i64: 32, 256>}]} {
    %c0 = arith.constant 0 : index
    %c0_0 = arith.constant 0 : index
    %0 = vector.load %arg1[%c0, %c0_0] : memref<32x256xf32, #tpu.memory_space<vmem>>, vector<32x256xf32>
    %c0_1 = arith.constant 0 : index
    %c0_2 = arith.constant 0 : index
    %1 = vector.load %arg2[%c0_1, %c0_2] : memref<96x32xf32, #tpu.memory_space<vmem>>, vector<96x32xf32>
    %cst = arith.constant dense<0.000000e+00> : vector<96x256xf32>
    %2 = tpu.matmul %1, %0, %cst {dimension_numbers = #tpu.dot_dimension_numbers<[1], [0], [0], [1], [0, 0, 1, 1], [], []>} : vector<96x32xf32>, vector<32x256xf32>, vector<96x256xf32> -> vector<96x256xf32>
    %3 = vector.extract_strided_slice %2 {offsets = [0, 0], sizes = [32, 256], strides = [1, 1]} : vector<96x256xf32> to vector<32x256xf32>
    %4 = vector.extract_strided_slice %2 {offsets = [32, 0], sizes = [32, 256], strides = [1, 1]} : vector<96x256xf32> to vector<32x256xf32>
    %5 = vector.extract_strided_slice %2 {offsets = [64, 0], sizes = [32, 256], strides = [1, 1]} : vector<96x256xf32> to vector<32x256xf32>
    %6 = tpu.iota {dimensions = array<i32: 1>} : vector<1x256xi32>
    %c8_i32 = arith.constant 8 : i32
    %c0_i32 = arith.constant 0 : i32
    %7 = arith.cmpi eq, %c8_i32, %c0_i32 : i32
    %c1_i32 = arith.constant 1 : i32
    %8 = arith.select %7, %c1_i32, %c8_i32 : i32
    %9 = vector.broadcast %8 : i32 to vector<1x256xi32>
    %10 = arith.remsi %6, %9 : vector<1x256xi32>
    %c0_i32_3 = arith.constant 0 : i32
    %11 = vector.broadcast %c0_i32_3 : i32 to vector<1x256xi32>
    %12 = arith.cmpi ne, %10, %11 : vector<1x256xi32>
    %c0_i32_4 = arith.constant 0 : i32
    %13 = vector.broadcast %c0_i32_4 : i32 to vector<1x256xi32>
    %14 = arith.cmpi slt, %10, %13 : vector<1x256xi32>
    %c0_i32_5 = arith.constant 0 : i32
    %15 = arith.cmpi slt, %8, %c0_i32_5 : i32
    %16 = vector.broadcast %15 : i1 to vector<1x256xi1>
    %17 = vector.broadcast %16 : vector<1x256xi1> to vector<1x256xi1>
    %18 = arith.xori %14, %17 : vector<1x256xi1>
    %19 = arith.andi %18, %12 : vector<1x256xi1>
    %20 = vector.broadcast %8 : i32 to vector<1x256xi32>
    %21 = arith.addi %10, %20 : vector<1x256xi32>
    %22 = arith.select %19, %21, %10 : vector<1x256xi1>, vector<1x256xi32>
    %23 = arith.mulf %3, %4 : vector<32x256xf32>
    %24 = vector.shape_cast %23 : vector<32x256xf32> to vector<4x8x256xf32>
    %cst_6 = arith.constant dense<0.000000e+00> : vector<4x256xf32>
    %25 = vector.multi_reduction <add>, %24, %cst_6 [1] : vector<4x8x256xf32> to vector<4x256xf32>
    %cst_7 = arith.constant 0.353553385 : f32
    %26 = vector.broadcast %cst_7 : f32 to vector<4x256xf32>
    %27 = arith.mulf %25, %26 : vector<4x256xf32>
    %c1_i32_8 = arith.constant 1 : i32
    %28 = tpu.dynamic_rotate %4 by %c1_i32_8 dim 1 : vector<32x256xf32>, i32 -> vector<32x256xf32>
    %29 = arith.mulf %3, %28 : vector<32x256xf32>
    %30 = vector.shape_cast %29 : vector<32x256xf32> to vector<4x8x256xf32>
    %cst_9 = arith.constant dense<0.000000e+00> : vector<4x256xf32>
    %31 = vector.multi_reduction <add>, %30, %cst_9 [1] : vector<4x8x256xf32> to vector<4x256xf32>
    %cst_10 = arith.constant 0.353553385 : f32
    %32 = vector.broadcast %cst_10 : f32 to vector<4x256xf32>
    %33 = arith.mulf %31, %32 : vector<4x256xf32>
    %c1_i32_11 = arith.constant 1 : i32
    %34 = vector.broadcast %c1_i32_11 : i32 to vector<1x256xi32>
    %35 = arith.cmpi sge, %22, %34 : vector<1x256xi32>
    %cst_12 = arith.constant 0.000000e+00 : f32
    %cst_13 = arith.constant -1.000000e+30 : f32
    %36 = vector.broadcast %cst_12 : f32 to vector<1x256xf32>
    %37 = vector.broadcast %cst_13 : f32 to vector<1x256xf32>
    %38 = arith.select %35, %36, %37 : vector<1x256xi1>, vector<1x256xf32>
    %39 = vector.broadcast %38 : vector<1x256xf32> to vector<4x256xf32>
    %40 = arith.addf %33, %39 : vector<4x256xf32>
    %c2_i32 = arith.constant 2 : i32
    %41 = tpu.dynamic_rotate %4 by %c2_i32 dim 1 : vector<32x256xf32>, i32 -> vector<32x256xf32>
    %42 = arith.mulf %3, %41 : vector<32x256xf32>
    %43 = vector.shape_cast %42 : vector<32x256xf32> to vector<4x8x256xf32>
    %cst_14 = arith.constant dense<0.000000e+00> : vector<4x256xf32>
    %44 = vector.multi_reduction <add>, %43, %cst_14 [1] : vector<4x8x256xf32> to vector<4x256xf32>
    %cst_15 = arith.constant 0.353553385 : f32
    %45 = vector.broadcast %cst_15 : f32 to vector<4x256xf32>
    %46 = arith.mulf %44, %45 : vector<4x256xf32>
    %c2_i32_16 = arith.constant 2 : i32
    %47 = vector.broadcast %c2_i32_16 : i32 to vector<1x256xi32>
    %48 = arith.cmpi sge, %22, %47 : vector<1x256xi32>
    %cst_17 = arith.constant 0.000000e+00 : f32
    %cst_18 = arith.constant -1.000000e+30 : f32
    %49 = vector.broadcast %cst_17 : f32 to vector<1x256xf32>
    %50 = vector.broadcast %cst_18 : f32 to vector<1x256xf32>
    %51 = arith.select %48, %49, %50 : vector<1x256xi1>, vector<1x256xf32>
    %52 = vector.broadcast %51 : vector<1x256xf32> to vector<4x256xf32>
    %53 = arith.addf %46, %52 : vector<4x256xf32>
    %c3_i32 = arith.constant 3 : i32
    %54 = tpu.dynamic_rotate %4 by %c3_i32 dim 1 : vector<32x256xf32>, i32 -> vector<32x256xf32>
    %55 = arith.mulf %3, %54 : vector<32x256xf32>
    %56 = vector.shape_cast %55 : vector<32x256xf32> to vector<4x8x256xf32>
    %cst_19 = arith.constant dense<0.000000e+00> : vector<4x256xf32>
    %57 = vector.multi_reduction <add>, %56, %cst_19 [1] : vector<4x8x256xf32> to vector<4x256xf32>
    %cst_20 = arith.constant 0.353553385 : f32
    %58 = vector.broadcast %cst_20 : f32 to vector<4x256xf32>
    %59 = arith.mulf %57, %58 : vector<4x256xf32>
    %c3_i32_21 = arith.constant 3 : i32
    %60 = vector.broadcast %c3_i32_21 : i32 to vector<1x256xi32>
    %61 = arith.cmpi sge, %22, %60 : vector<1x256xi32>
    %cst_22 = arith.constant 0.000000e+00 : f32
    %cst_23 = arith.constant -1.000000e+30 : f32
    %62 = vector.broadcast %cst_22 : f32 to vector<1x256xf32>
    %63 = vector.broadcast %cst_23 : f32 to vector<1x256xf32>
    %64 = arith.select %61, %62, %63 : vector<1x256xi1>, vector<1x256xf32>
    %65 = vector.broadcast %64 : vector<1x256xf32> to vector<4x256xf32>
    %66 = arith.addf %59, %65 : vector<4x256xf32>
    %c4_i32 = arith.constant 4 : i32
    %67 = tpu.dynamic_rotate %4 by %c4_i32 dim 1 : vector<32x256xf32>, i32 -> vector<32x256xf32>
    %68 = arith.mulf %3, %67 : vector<32x256xf32>
    %69 = vector.shape_cast %68 : vector<32x256xf32> to vector<4x8x256xf32>
    %cst_24 = arith.constant dense<0.000000e+00> : vector<4x256xf32>
    %70 = vector.multi_reduction <add>, %69, %cst_24 [1] : vector<4x8x256xf32> to vector<4x256xf32>
    %cst_25 = arith.constant 0.353553385 : f32
    %71 = vector.broadcast %cst_25 : f32 to vector<4x256xf32>
    %72 = arith.mulf %70, %71 : vector<4x256xf32>
    %c4_i32_26 = arith.constant 4 : i32
    %73 = vector.broadcast %c4_i32_26 : i32 to vector<1x256xi32>
    %74 = arith.cmpi sge, %22, %73 : vector<1x256xi32>
    %cst_27 = arith.constant 0.000000e+00 : f32
    %cst_28 = arith.constant -1.000000e+30 : f32
    %75 = vector.broadcast %cst_27 : f32 to vector<1x256xf32>
    %76 = vector.broadcast %cst_28 : f32 to vector<1x256xf32>
    %77 = arith.select %74, %75, %76 : vector<1x256xi1>, vector<1x256xf32>
    %78 = vector.broadcast %77 : vector<1x256xf32> to vector<4x256xf32>
    %79 = arith.addf %72, %78 : vector<4x256xf32>
    %c5_i32 = arith.constant 5 : i32
    %80 = tpu.dynamic_rotate %4 by %c5_i32 dim 1 : vector<32x256xf32>, i32 -> vector<32x256xf32>
    %81 = arith.mulf %3, %80 : vector<32x256xf32>
    %82 = vector.shape_cast %81 : vector<32x256xf32> to vector<4x8x256xf32>
    %cst_29 = arith.constant dense<0.000000e+00> : vector<4x256xf32>
    %83 = vector.multi_reduction <add>, %82, %cst_29 [1] : vector<4x8x256xf32> to vector<4x256xf32>
    %cst_30 = arith.constant 0.353553385 : f32
    %84 = vector.broadcast %cst_30 : f32 to vector<4x256xf32>
    %85 = arith.mulf %83, %84 : vector<4x256xf32>
    %c5_i32_31 = arith.constant 5 : i32
    %86 = vector.broadcast %c5_i32_31 : i32 to vector<1x256xi32>
    %87 = arith.cmpi sge, %22, %86 : vector<1x256xi32>
    %cst_32 = arith.constant 0.000000e+00 : f32
    %cst_33 = arith.constant -1.000000e+30 : f32
    %88 = vector.broadcast %cst_32 : f32 to vector<1x256xf32>
    %89 = vector.broadcast %cst_33 : f32 to vector<1x256xf32>
    %90 = arith.select %87, %88, %89 : vector<1x256xi1>, vector<1x256xf32>
    %91 = vector.broadcast %90 : vector<1x256xf32> to vector<4x256xf32>
    %92 = arith.addf %85, %91 : vector<4x256xf32>
    %c6_i32 = arith.constant 6 : i32
    %93 = tpu.dynamic_rotate %4 by %c6_i32 dim 1 : vector<32x256xf32>, i32 -> vector<32x256xf32>
    %94 = arith.mulf %3, %93 : vector<32x256xf32>
    %95 = vector.shape_cast %94 : vector<32x256xf32> to vector<4x8x256xf32>
    %cst_34 = arith.constant dense<0.000000e+00> : vector<4x256xf32>
    %96 = vector.multi_reduction <add>, %95, %cst_34 [1] : vector<4x8x256xf32> to vector<4x256xf32>
    %cst_35 = arith.constant 0.353553385 : f32
    %97 = vector.broadcast %cst_35 : f32 to vector<4x256xf32>
    %98 = arith.mulf %96, %97 : vector<4x256xf32>
    %c6_i32_36 = arith.constant 6 : i32
    %99 = vector.broadcast %c6_i32_36 : i32 to vector<1x256xi32>
    %100 = arith.cmpi sge, %22, %99 : vector<1x256xi32>
    %cst_37 = arith.constant 0.000000e+00 : f32
    %cst_38 = arith.constant -1.000000e+30 : f32
    %101 = vector.broadcast %cst_37 : f32 to vector<1x256xf32>
    %102 = vector.broadcast %cst_38 : f32 to vector<1x256xf32>
    %103 = arith.select %100, %101, %102 : vector<1x256xi1>, vector<1x256xf32>
    %104 = vector.broadcast %103 : vector<1x256xf32> to vector<4x256xf32>
    %105 = arith.addf %98, %104 : vector<4x256xf32>
    %c7_i32 = arith.constant 7 : i32
    %106 = tpu.dynamic_rotate %4 by %c7_i32 dim 1 : vector<32x256xf32>, i32 -> vector<32x256xf32>
    %107 = arith.mulf %3, %106 : vector<32x256xf32>
    %108 = vector.shape_cast %107 : vector<32x256xf32> to vector<4x8x256xf32>
    %cst_39 = arith.constant dense<0.000000e+00> : vector<4x256xf32>
    %109 = vector.multi_reduction <add>, %108, %cst_39 [1] : vector<4x8x256xf32> to vector<4x256xf32>
    %cst_40 = arith.constant 0.353553385 : f32
    %110 = vector.broadcast %cst_40 : f32 to vector<4x256xf32>
    %111 = arith.mulf %109, %110 : vector<4x256xf32>
    %c7_i32_41 = arith.constant 7 : i32
    %112 = vector.broadcast %c7_i32_41 : i32 to vector<1x256xi32>
    %113 = arith.cmpi sge, %22, %112 : vector<1x256xi32>
    %cst_42 = arith.constant 0.000000e+00 : f32
    %cst_43 = arith.constant -1.000000e+30 : f32
    %114 = vector.broadcast %cst_42 : f32 to vector<1x256xf32>
    %115 = vector.broadcast %cst_43 : f32 to vector<1x256xf32>
    %116 = arith.select %113, %114, %115 : vector<1x256xi1>, vector<1x256xf32>
    %117 = vector.broadcast %116 : vector<1x256xf32> to vector<4x256xf32>
    %118 = arith.addf %111, %117 : vector<4x256xf32>
    %119 = arith.maximumf %27, %40 : vector<4x256xf32>
    %120 = arith.maximumf %119, %53 : vector<4x256xf32>
    %121 = arith.maximumf %120, %66 : vector<4x256xf32>
    %122 = arith.maximumf %121, %79 : vector<4x256xf32>
    %123 = arith.maximumf %122, %92 : vector<4x256xf32>
    %124 = arith.maximumf %123, %105 : vector<4x256xf32>
    %125 = arith.maximumf %124, %118 : vector<4x256xf32>
    %126 = arith.subf %27, %125 : vector<4x256xf32>
    %127 = math.exp %126 : vector<4x256xf32>
    %128 = arith.subf %40, %125 : vector<4x256xf32>
    %129 = math.exp %128 : vector<4x256xf32>
    %130 = arith.subf %53, %125 : vector<4x256xf32>
    %131 = math.exp %130 : vector<4x256xf32>
    %132 = arith.subf %66, %125 : vector<4x256xf32>
    %133 = math.exp %132 : vector<4x256xf32>
    %134 = arith.subf %79, %125 : vector<4x256xf32>
    %135 = math.exp %134 : vector<4x256xf32>
    %136 = arith.subf %92, %125 : vector<4x256xf32>
    %137 = math.exp %136 : vector<4x256xf32>
    %138 = arith.subf %105, %125 : vector<4x256xf32>
    %139 = math.exp %138 : vector<4x256xf32>
    %140 = arith.subf %118, %125 : vector<4x256xf32>
    %141 = math.exp %140 : vector<4x256xf32>
    %142 = arith.addf %127, %129 : vector<4x256xf32>
    %143 = arith.addf %142, %131 : vector<4x256xf32>
    %144 = arith.addf %143, %133 : vector<4x256xf32>
    %145 = arith.addf %144, %135 : vector<4x256xf32>
    %146 = arith.addf %145, %137 : vector<4x256xf32>
    %147 = arith.addf %146, %139 : vector<4x256xf32>
    %148 = arith.addf %147, %141 : vector<4x256xf32>
    %149 = tpu.reciprocal %148 {approx = true} : vector<4x256xf32> -> vector<4x256xf32>
    %150 = vector.shape_cast %127 : vector<4x256xf32> to vector<4x1x256xf32>
    %151 = vector.shape_cast %5 : vector<32x256xf32> to vector<4x8x256xf32>
    %152 = vector.broadcast %150 : vector<4x1x256xf32> to vector<4x8x256xf32>
    %153 = arith.mulf %152, %151 : vector<4x8x256xf32>
    %c1_i32_44 = arith.constant 1 : i32
    %154 = tpu.dynamic_rotate %5 by %c1_i32_44 dim 1 : vector<32x256xf32>, i32 -> vector<32x256xf32>
    %155 = vector.shape_cast %154 : vector<32x256xf32> to vector<4x8x256xf32>
    %156 = vector.shape_cast %129 : vector<4x256xf32> to vector<4x1x256xf32>
    %157 = vector.broadcast %156 : vector<4x1x256xf32> to vector<4x8x256xf32>
    %158 = arith.mulf %157, %155 : vector<4x8x256xf32>
    %159 = arith.addf %153, %158 : vector<4x8x256xf32>
    %c2_i32_45 = arith.constant 2 : i32
    %160 = tpu.dynamic_rotate %5 by %c2_i32_45 dim 1 : vector<32x256xf32>, i32 -> vector<32x256xf32>
    %161 = vector.shape_cast %160 : vector<32x256xf32> to vector<4x8x256xf32>
    %162 = vector.shape_cast %131 : vector<4x256xf32> to vector<4x1x256xf32>
    %163 = vector.broadcast %162 : vector<4x1x256xf32> to vector<4x8x256xf32>
    %164 = arith.mulf %163, %161 : vector<4x8x256xf32>
    %165 = arith.addf %159, %164 : vector<4x8x256xf32>
    %c3_i32_46 = arith.constant 3 : i32
    %166 = tpu.dynamic_rotate %5 by %c3_i32_46 dim 1 : vector<32x256xf32>, i32 -> vector<32x256xf32>
    %167 = vector.shape_cast %166 : vector<32x256xf32> to vector<4x8x256xf32>
    %168 = vector.shape_cast %133 : vector<4x256xf32> to vector<4x1x256xf32>
    %169 = vector.broadcast %168 : vector<4x1x256xf32> to vector<4x8x256xf32>
    %170 = arith.mulf %169, %167 : vector<4x8x256xf32>
    %171 = arith.addf %165, %170 : vector<4x8x256xf32>
    %c4_i32_47 = arith.constant 4 : i32
    %172 = tpu.dynamic_rotate %5 by %c4_i32_47 dim 1 : vector<32x256xf32>, i32 -> vector<32x256xf32>
    %173 = vector.shape_cast %172 : vector<32x256xf32> to vector<4x8x256xf32>
    %174 = vector.shape_cast %135 : vector<4x256xf32> to vector<4x1x256xf32>
    %175 = vector.broadcast %174 : vector<4x1x256xf32> to vector<4x8x256xf32>
    %176 = arith.mulf %175, %173 : vector<4x8x256xf32>
    %177 = arith.addf %171, %176 : vector<4x8x256xf32>
    %c5_i32_48 = arith.constant 5 : i32
    %178 = tpu.dynamic_rotate %5 by %c5_i32_48 dim 1 : vector<32x256xf32>, i32 -> vector<32x256xf32>
    %179 = vector.shape_cast %178 : vector<32x256xf32> to vector<4x8x256xf32>
    %180 = vector.shape_cast %137 : vector<4x256xf32> to vector<4x1x256xf32>
    %181 = vector.broadcast %180 : vector<4x1x256xf32> to vector<4x8x256xf32>
    %182 = arith.mulf %181, %179 : vector<4x8x256xf32>
    %183 = arith.addf %177, %182 : vector<4x8x256xf32>
    %c6_i32_49 = arith.constant 6 : i32
    %184 = tpu.dynamic_rotate %5 by %c6_i32_49 dim 1 : vector<32x256xf32>, i32 -> vector<32x256xf32>
    %185 = vector.shape_cast %184 : vector<32x256xf32> to vector<4x8x256xf32>
    %186 = vector.shape_cast %139 : vector<4x256xf32> to vector<4x1x256xf32>
    %187 = vector.broadcast %186 : vector<4x1x256xf32> to vector<4x8x256xf32>
    %188 = arith.mulf %187, %185 : vector<4x8x256xf32>
    %189 = arith.addf %183, %188 : vector<4x8x256xf32>
    %c7_i32_50 = arith.constant 7 : i32
    %190 = tpu.dynamic_rotate %5 by %c7_i32_50 dim 1 : vector<32x256xf32>, i32 -> vector<32x256xf32>
    %191 = vector.shape_cast %190 : vector<32x256xf32> to vector<4x8x256xf32>
    %192 = vector.shape_cast %141 : vector<4x256xf32> to vector<4x1x256xf32>
    %193 = vector.broadcast %192 : vector<4x1x256xf32> to vector<4x8x256xf32>
    %194 = arith.mulf %193, %191 : vector<4x8x256xf32>
    %195 = arith.addf %189, %194 : vector<4x8x256xf32>
    %196 = vector.shape_cast %149 : vector<4x256xf32> to vector<4x1x256xf32>
    %197 = vector.broadcast %196 : vector<4x1x256xf32> to vector<4x8x256xf32>
    %198 = arith.mulf %195, %197 : vector<4x8x256xf32>
    %199 = vector.shape_cast %198 : vector<4x8x256xf32> to vector<32x256xf32>
    %c0_51 = arith.constant 0 : index
    %c0_52 = arith.constant 0 : index
    %200 = vector.load %arg3[%c0_51, %c0_52] : memref<32x32xf32, #tpu.memory_space<vmem>>, vector<32x32xf32>
    %cst_53 = arith.constant dense<0.000000e+00> : vector<32x256xf32>
    %201 = tpu.matmul %200, %199, %cst_53 {dimension_numbers = #tpu.dot_dimension_numbers<[1], [0], [0], [1], [0, 0, 1, 1], [], []>} : vector<32x32xf32>, vector<32x256xf32>, vector<32x256xf32> -> vector<32x256xf32>
    %c0_54 = arith.constant 0 : index
    %c0_55 = arith.constant 0 : index
    %202 = vector.load %arg4[%c0_54, %c0_55] : memref<32x1xf32, #tpu.memory_space<vmem>>, vector<32x1xf32>
    %203 = vector.broadcast %202 : vector<32x1xf32> to vector<32x256xf32>
    %204 = arith.addf %201, %203 : vector<32x256xf32>
    %205 = arith.addf %0, %204 : vector<32x256xf32>
    %c0_56 = arith.constant 0 : index
    %c0_57 = arith.constant 0 : index
    %206 = vector.load %arg5[%c0_56, %c0_57] : memref<128x32xf32, #tpu.memory_space<vmem>>, vector<128x32xf32>
    %cst_58 = arith.constant dense<0.000000e+00> : vector<128x256xf32>
    %207 = tpu.matmul %206, %205, %cst_58 {dimension_numbers = #tpu.dot_dimension_numbers<[1], [0], [0], [1], [0, 0, 1, 1], [], []>} : vector<128x32xf32>, vector<32x256xf32>, vector<128x256xf32> -> vector<128x256xf32>
    %c0_59 = arith.constant 0 : index
    %c0_60 = arith.constant 0 : index
    %208 = vector.load %arg6[%c0_59, %c0_60] : memref<128x1xf32, #tpu.memory_space<vmem>>, vector<128x1xf32>
    %209 = vector.broadcast %208 : vector<128x1xf32> to vector<128x256xf32>
    %210 = arith.addf %207, %209 : vector<128x256xf32>
    %cst_61 = arith.constant 0.000000e+00 : f32
    %211 = vector.broadcast %cst_61 : f32 to vector<128x256xf32>
    %212 = arith.maximumf %210, %211 : vector<128x256xf32>
    %c0_62 = arith.constant 0 : index
    %c0_63 = arith.constant 0 : index
    %213 = vector.load %arg7[%c0_62, %c0_63] : memref<32x128xf32, #tpu.memory_space<vmem>>, vector<32x128xf32>
    %cst_64 = arith.constant dense<0.000000e+00> : vector<32x256xf32>
    %214 = tpu.matmul %213, %212, %cst_64 {dimension_numbers = #tpu.dot_dimension_numbers<[1], [0], [0], [1], [0, 0, 1, 1], [], []>} : vector<32x128xf32>, vector<128x256xf32>, vector<32x256xf32> -> vector<32x256xf32>
    %c0_65 = arith.constant 0 : index
    %c0_66 = arith.constant 0 : index
    %215 = vector.load %arg8[%c0_65, %c0_66] : memref<32x1xf32, #tpu.memory_space<vmem>>, vector<32x1xf32>
    %216 = vector.broadcast %215 : vector<32x1xf32> to vector<32x256xf32>
    %217 = arith.addf %214, %216 : vector<32x256xf32>
    %218 = arith.addf %205, %217 : vector<32x256xf32>
    %c0_67 = arith.constant 0 : index
    %c0_68 = arith.constant 0 : index
    %219 = vector.load %arg9[%c0_67, %c0_68] : memref<32x256xf32, #tpu.memory_space<vmem>>, vector<32x256xf32>
    tpu.vector_store %arg9[%c0_67, %c0_68], %218 {strides = array<i32>} : memref<32x256xf32, #tpu.memory_space<vmem>>, vector<32x256xf32>,
    return
  }
  func.func @transform_0(%arg0: i32) -> (i32, i32) {
    %c0_i32 = arith.constant 0 : i32
    %c0_i32_0 = arith.constant 0 : i32
    return %c0_i32, %arg0 : i32, i32
  }
  func.func @transform_1(%arg0: i32) -> (i32, i32) {
    %c0_i32 = arith.constant 0 : i32
    %c0_i32_0 = arith.constant 0 : i32
    %c0_i32_1 = arith.constant 0 : i32
    return %c0_i32, %c0_i32_0 : i32, i32
  }
  func.func @transform_2(%arg0: i32) -> (i32, i32) {
    %c0_i32 = arith.constant 0 : i32
    %c0_i32_0 = arith.constant 0 : i32
    %c0_i32_1 = arith.constant 0 : i32
    return %c0_i32, %c0_i32_0 : i32, i32
  }
  func.func @transform_3(%arg0: i32) -> (i32, i32) {
    %c0_i32 = arith.constant 0 : i32
    %c0_i32_0 = arith.constant 0 : i32
    %c0_i32_1 = arith.constant 0 : i32
    return %c0_i32, %c0_i32_0 : i32, i32
  }
  func.func @transform_4(%arg0: i32) -> (i32, i32) {
    %c0_i32 = arith.constant 0 : i32
    %c0_i32_0 = arith.constant 0 : i32
    %c0_i32_1 = arith.constant 0 : i32
    return %c0_i32, %c0_i32_0 : i32, i32
  }
  func.func @transform_5(%arg0: i32) -> (i32, i32) {
    %c0_i32 = arith.constant 0 : i32
    %c0_i32_0 = arith.constant 0 : i32
    %c0_i32_1 = arith.constant 0 : i32
    return %c0_i32, %c0_i32_0 : i32, i32
  }
  func.func @transform_6(%arg0: i32) -> (i32, i32) {
    %c0_i32 = arith.constant 0 : i32
    %c0_i32_0 = arith.constant 0 : i32
    %c0_i32_1 = arith.constant 0 : i32
    return %c0_i32, %c0_i32_0 : i32, i32
  }
  func.func @transform_7(%arg0: i32) -> (i32, i32) {
    %c0_i32 = arith.constant 0 : i32
    %c0_i32_0 = arith.constant 0 : i32
    %c0_i32_1 = arith.constant 0 : i32
    return %c0_i32, %c0_i32_0 : i32, i32
  }
  func.func @transform_8(%arg0: i32) -> (i32, i32) {
    %c0_i32 = arith.constant 0 : i32
    %c0_i32_0 = arith.constant 0 : i32
    return %c0_i32, %arg0 : i32, i32
  }
}

</mosaic_0001>

<bundles_post_ra>
// kernel: tpu_custom_call.1
= control target key start
LH: loop header
LB: loop body
LE: loop exit
PB: predicated region body
PF: predicated region fallthrough
CT: control target
= control target key end

     0   :  { %13 = vsyncpa [#allocation4], 0  ;;  %s5010_s0 = inlined_call_operand.vmem [shape: f32[32,512], index: 0, kind: input, shape index: {}]   ;;  %s5011_s1 = inlined_call_operand.vmem [shape: f32[96,32], index: 1, kind: input, shape index: {}]   ;;  %s5012_s2 = inlined_call_operand.vmem [shape: f32[32,32], index: 2, kind: input, shape index: {}]   ;;  %s5013_s3 = inlined_call_operand.vmem [shape: f32[32,1], index: 3, kind: input, shape index: {}]   ;;  %s5014_s4 = inlined_call_operand.vmem [shape: f32[128,32], index: 4, kind: input, shape index: {}]   ;;  %s5015_s5 = inlined_call_operand.vmem [shape: f32[128,1], index: 5, kind: input, shape index: {}]   ;;  %s5016_s6 = inlined_call_operand.vmem [shape: f32[32,128], index: 6, kind: input, shape index: {}]   ;;  %s5017_s7 = inlined_call_operand.vmem [shape: f32[32,1], index: 7, kind: input, shape index: {}]   ;;  %s5018_s8 = inlined_call_operand.hbm [shape: f32[32,512], index: 8, kind: output, shape index: {}]  }
   0x1   :  { %15 = vsyncpa [#allocation4 + $0x1], 0  ;;  %s3002_s27 = smov 0   ;;  %s3004_s28 = smov 0  }
   0x2   :  { %s3006_s29 = smov 0   ;;  %s3008_s30 = smov 0  }
   0x3 LB: > { %s2594_s9 = sadd.s32 4294967295, %s2943_s30   ;;  %s2595_s10 = sadd.s32 4294967294, %s2943_s30   ;;  %s2943_s30 = sphi %s3008_s30, %s5313_s30   ;;  %s2939_s29 = sphi %s3006_s29, %s5312_s29   ;;  %s2935_s28 = sphi %s3004_s28, %s5311_s28   ;;  %s2931_s27 = sphi %s3002_s27, %s5310_s27  }
   0x4   : > { %s3025_s11 = sadd.s32 1, %s2943_s30   ;;  %s28_s12 = sadd.s32 1, %s2939_s29 }
   0x5   : > { %s25_s13 = ssub.s32 %s2943_s30, %s3025_s11  ;;  %p35_p0 = scmp.ne.s32.totalorder %s2939_s29, %s2935_s28 }
   0x6   : > { %p26_p1 = scmp.eq.s32.totalorder %s25_s13, 0  ;;  %p36_p2 = scmp.eq.s32.totalorder %s2943_s30, 0 }
   0x7   : > { %p212_p3 = scmp.eq.s32.totalorder %s2594_s9, 1  ;;  %p217_p4 = scmp.ne.s32.totalorder %s2935_s28, %s2931_s27 }
   0x8   : > { %s3038_s14 = scalar_select %p26_p1, %s2939_s29, %s28_s12  }
   0x9   : > { %p37_p5 = por %p36_p2, %p35_p0  ;;  %p3040_p6 = por %p212_p3, %p35_p0 }
   0xa   : > { %p218_p7 = scmp.eq.s32.totalorder %s2595_s10, 1  ;;  %p2597_p9 = scmp.ge.s32.totalorder %s2943_s30, 2 }
   0xc   : > { %p3044_p8 = por %p218_p7, %p217_p4  ;;  %255 = sbr.rel (%p2597_p9) target bundleno = 29 (0x1d), region = 44 }
  0x11   : > { %258 = sbr.rel (!%p37_p5) target bundleno = 29 (0x1d), region = 48  ;;  %s260_s17 = sand.u32 (%p37_p5), 1, %s2939_s29  }
  0x12   : > { %s2673_s18 = sshll.u32 (%p37_p5), %s2943_s30, 4  ;;  %s2598_s19 = sshll.u32 (%p37_p5), %s260_s17, 6 }
  0x13   : > { %s265_s22 = scalar_lea.vmem (%p37_p5), %s5010_s0, %s2673_s18  ;;  %s262_s23 = scalar_lea.vmem (%p37_p5), [#allocation2], %s2598_s19 }
  0x14   : > { %v278_v0 = vld [vmem:[%s265_s22] sm:$0xff] (%p37_p5)  ;;  %v280_v1 = vld [vmem:[%s265_s22 + $0x8] sm:$0xff] (%p37_p5) }
  0x15   : > { %v282_v2 = vld [vmem:[%s265_s22 + $0x20] sm:$0xff] (%p37_p5)  ;;  %279 = vst [vmem:[%s262_s23] sm:$0xff] (%p37_p5), %v278_v0  ;;  %v284_v3 = vld [vmem:[%s265_s22 + $0x28] sm:$0xff] (%p37_p5) }
  0x16   : > { %281 = vst [vmem:[%s262_s23 + $0x8] sm:$0xff] %v280_v1  ;;  %v286_v4 = vld [vmem:[%s265_s22 + $0x40] sm:$0xff]  ;;  %v288_v5 = vld [vmem:[%s265_s22 + $0x48] sm:$0xff] }
  0x17   : > { %283 = vst [vmem:[%s262_s23 + $0x10] sm:$0xff] %v282_v2  ;;  %v290_v6 = vld [vmem:[%s265_s22 + $0x60] sm:$0xff]  ;;  %v292_v7 = vld [vmem:[%s265_s22 + $0x68] sm:$0xff] }
  0x18   : > { %285 = vst [vmem:[%s262_s23 + $0x18] sm:$0xff] %v284_v3 }
  0x19   : > { %287 = vst [vmem:[%s262_s23 + $0x20] sm:$0xff] %v286_v4 }
  0x1a   : > { %289 = vst [vmem:[%s262_s23 + $0x28] sm:$0xff] %v288_v5 }
  0x1b   : > { %291 = vst [vmem:[%s262_s23 + $0x30] sm:$0xff] %v290_v6 }
  0x1c   : > { %293 = vst [vmem:[%s262_s23 + $0x38] sm:$0xff] %v292_v7 }
  0x1d PF: > { %p2601_p10 = scmp.ge.s32.totalorder %s2943_s30, 1  ;;  %p298_p11 = scmp.lt.s32.totalorder %s2943_s30, 3 }
  0x1f   : > { %p299_p12 = pnand %p2601_p10, %p298_p11 }
  0x21   : > { %302 = sbr.rel (%p299_p12) target bundleno = 1244 (0x4dc), region = 71 }
  0x26   : > { %s305_s24 = sand.u32 1, %s2935_s28   ;;  %v348_v16 = vld [vmem:[%s5011_s1] sm:$0xff]  ;;  %vm360_vm0 = vcmask 261120   ;;  %v349_v17 = vld [vmem:[%s5011_s1 + $0x8] sm:$0xff]  ;;  %v350_v18 = vld [vmem:[%s5011_s1 + $0x10] sm:$0xff]  ;;  %s2945_s22 = smov 1  }
  0x27   : > { %s3061_s25 = sshll.u32 %s305_s24, 6  ;;  %v351_v19 = vld [vmem:[%s5011_s1 + $0x18] sm:$0xff]  ;;  %v352_v20 = vld [vmem:[%s5011_s1 + $0x20] sm:$0xff]  ;;  %v353_v21 = vld [vmem:[%s5011_s1 + $0x28] sm:$0xff]  ;;  %s2946_s23 = smov 2  }
  0x28   : > { %s3064_s26 = scalar_lea.vmem [#allocation2], %s3061_s25  ;;  %v354_v22 = vld [vmem:[%s5011_s1 + $0x30] sm:$0xff]  ;;  %v355_v23 = vld [vmem:[%s5011_s1 + $0x38] sm:$0xff]  ;;  %v356_v30 = vld [vmem:[%s5011_s1 + $0x40] sm:$0xff]  ;;  %s2947_s13 = smov 3  }
  0x29   : > { %v346_v8 = vld [vmem:[%s3064_s26 + $0x30] sm:$0xff]  ;;  %v347_v9 = vld [vmem:[%s3064_s26 + $0x38] sm:$0xff]  ;;  %v344_v10 = vld [vmem:[%s3064_s26 + $0x20] sm:$0xff]  ;;  %s2948_s17 = smov 4   ;;  %s2949_s18 = smov 5  }
  0x2a   : > { %409 = vmatpush.msra.mxu0 %v346_v8  ;;  %462 = vmatpush.msra.mxu1 %v347_v9  ;;  %v345_v11 = vld [vmem:[%s3064_s26 + $0x28] sm:$0xff]  ;;  %v342_v12 = vld [vmem:[%s3064_s26 + $0x10] sm:$0xff]  ;;  %v343_v13 = vld [vmem:[%s3064_s26 + $0x18] sm:$0xff]  ;;  %s2950_s19 = smov 7   ;;  %s2951_s20 = smov 6  }
  0x2b   : > { %v340_v14 = vld [vmem:[%s3064_s26] sm:$0xff]  ;;  %v341_v15 = vld [vmem:[%s3064_s26 + $0x8] sm:$0xff]  ;;  %v358_v36 = vld [vmem:[%s5011_s1 + $0x50] sm:$0xff] }
  0x2c   : > { %410 = vmatpush.msra.mxu0 %v344_v10  ;;  %463 = vmatpush.msra.mxu1 %v345_v11  ;;  %v357_v35 = vld [vmem:[%s5011_s1 + $0x48] sm:$0xff]  ;;  %v359_v39 = vld [vmem:[%s5011_s1 + $0x58] sm:$0xff] }
  0x2e   : > { %411 = vmatpush.msra.mxu0 %v342_v12  ;;  %464 = vmatpush.msra.mxu1 %v343_v13  ;;  %v503_v12 = vlaneseq }
  0x30   : > { %412 = vmatpush.msra.mxu0 %v340_v14  ;;  %465 = vmatpush.msra.mxu1 %v341_v15 }
  0x31   : > { %2604 = vmatmul.msk.f32.vlgmr.msra.gmra.mxu0 %vm360_vm0, %v348_v16  ;;  %2616 = vmatmul.msk.f32.vlgmr.msra.gmra.mxu1 %vm360_vm0, %v348_v16 }
  0x39   : > { %2605 = vmatmul.msk.f32.gmra.mxu0 %vm360_vm0, %v349_v17  ;;  %2617 = vmatmul.msk.f32.gmra.mxu1 %vm360_vm0, %v349_v17 }
  0x41   : > { %2606 = vmatmul.msk.f32.gmra.mxu0 %vm360_vm0, %v350_v18  ;;  %2618 = vmatmul.msk.f32.gmra.mxu1 %vm360_vm0, %v350_v18 }
  0x49   : > { %2607 = vmatmul.msk.f32.gmra.mxu0 %vm360_vm0, %v351_v19  ;;  %2619 = vmatmul.msk.f32.gmra.mxu1 %vm360_vm0, %v351_v19 }
  0x51   : > { %2608 = vmatmul.msk.f32.gmra.mxu0 %vm360_vm0, %v352_v20  ;;  %2620 = vmatmul.msk.f32.gmra.mxu1 %vm360_vm0, %v352_v20 }
  0x59   : > { %2609 = vmatmul.msk.f32.gmra.mxu0 %vm360_vm0, %v353_v21  ;;  %2621 = vmatmul.msk.f32.gmra.mxu1 %vm360_vm0, %v353_v21 }
  0x61   : > { %2610 = vmatmul.msk.f32.gmra.mxu0 %vm360_vm0, %v354_v22  ;;  %2622 = vmatmul.msk.f32.gmra.mxu1 %vm360_vm0, %v354_v22  ;;  %v3222_v22 = vand.u32 127, %v503_v12 }
  0x63   : > { %vm610_vm1 = vcmp.lt.s32.totalorder %v3222_v22, 1  ;;  %vm812_vm4 = vcmp.lt.s32.totalorder %v3222_v22, 3  ;;  %vm711_vm5 = vcmp.lt.s32.totalorder %v3222_v22, 2  ;;  %vm913_vm9 = vcmp.lt.s32.totalorder %v3222_v22, 4 }
  0x64   : > { %vm1014_vm11 = vcmp.lt.s32.totalorder %v3222_v22, 5  ;;  %vm1115_vm15 = vcmp.lt.s32.totalorder %v3222_v22, 6 }
  0x69   : > { %2611 = vmatmul.msk.f32.gmra.mxu0 %vm360_vm0, %v355_v23  ;;  %2623 = vmatmul.msk.f32.gmra.mxu1 %vm360_vm0, %v355_v23 }
  0x71   : > { %2612 = vmatmul.msk.f32.gmra.mxu0 %vm360_vm0, %v356_v30  ;;  %2624 = vmatmul.msk.f32.gmra.mxu1 %vm360_vm0, %v356_v30 }
  0x79   : > { %2613 = vmatmul.msk.f32.gmra.mxu0 %vm360_vm0, %v357_v35  ;;  %2625 = vmatmul.msk.f32.gmra.mxu1 %vm360_vm0, %v357_v35  ;;  %v505_v35 = vadd.s32 128, %v3222_v22 }
  0x81   : > { %2614 = vmatmul.msk.f32.gmra.mxu0 %vm360_vm0, %v358_v36  ;;  %2626 = vmatmul.msk.f32.gmra.mxu1 %vm360_vm0, %v358_v36 }
  0x89   : > { %2627 = vmatmul.msk.f32.gmra.mxu1 %vm360_vm0, %v359_v39  ;;  %2615 = vmatmul.msk.f32.gmra.mxu0 %vm360_vm0, %v359_v39 }
  0xae   : > { %v3114_v24 = vpop.f32.mrf.mxu0  ;;  %v3116_v25 = vpop.f32.mrf.mxu1 }
  0xb6   : > { %v3118_v26 = vpop.f32.mrf.mxu0  ;;  %v3120_v27 = vpop.f32.mrf.mxu1 }
  0xbe   : > { %v3122_v28 = vpop.f32.mrf.mxu0  ;;  %v3124_v29 = vpop.f32.mrf.mxu1 }
  0xc6   : > { %v3131_v31 = vpop.f32.mrf.mxu0  ;;  %v3133_v32 = vpop.f32.mrf.mxu1 }
  0xce   : > { %v426_v33 = vpop.f32.mrf.mxu0  ;;  %v479_v34 = vpop.f32.mrf.mxu1 }
  0xcf   : > { %602 = vrot.lane.b32.xlu1 %v479_v34, %s2945_s22  ;;  %695 = vrot.lane.b32.xlu2 %v426_v33, %s2946_s23  ;;  %v531_v42 = vmul.f32 %v479_v34, %v3116_v25  ;;  %v530_v43 = vmul.f32 %v426_v33, %v3114_v24 }
  0xd0   : > { %594 = vrot.lane.b32.xlu0 %v426_v33, %s2945_s22 }
  0xd1   : > { %v544_v49 = vrot.slane %v531_v42, 4  ;;  %v538_v52 = vrot.slane %v530_v43, 4 }
  0xd3   : > { %v545_v55 = vadd.f32 %v544_v49, %v531_v42  ;;  %v539_v59 = vadd.f32 %v538_v52, %v530_v43  ;;  %v3235_v49 = vand.u32 7, %v3222_v22 }
  0xd5   : > { %v546_v0 = vrot.slane %v545_v55, 2  ;;  %v540_v4 = vrot.slane %v539_v59, 2  ;;  %vm683_vm2 = vcmp.ge.s32.totalorder %v3235_v49, 1  ;;  %vm885_vm6 = vcmp.ge.s32.totalorder %v3235_v49, 3 }
  0xd6   : > { %v429_v37 = vpop.f32.mrf.mxu0  ;;  %v482_v38 = vpop.f32.mrf.mxu1  ;;  %vm784_vm8 = vcmp.ge.s32.totalorder %v3235_v49, 2  ;;  %vm986_vm12 = vcmp.ge.s32.totalorder %v3235_v49, 4  ;;  %vm1087_vm14 = vcmp.ge.s32.totalorder %v3235_v49, 5 }
  0xd7   : > { %796 = vrot.lane.b32.xlu1 %v426_v33, %s2947_s13  ;;  %804 = vrot.lane.b32.xlu2 %v479_v34, %s2947_s13  ;;  %v532_v44 = vmul.f32 %v429_v37, %v3118_v26  ;;  %v533_v45 = vmul.f32 %v482_v38, %v3120_v27  ;;  %v547_v8 = vadd.f32 %v546_v0, %v545_v55 }
  0xd8   : > { %703 = vrot.lane.b32.xlu0 %v479_v34, %s2946_s23  ;;  %v541_v13 = vadd.f32 %v540_v4, %v539_v59 }
  0xd9   : > { %v556_v53 = vrot.slane %v533_v45, 4  ;;  %v550_v54 = vrot.slane %v532_v44, 4  ;;  %v548_v18 = vrot.slane %v547_v8, 1 }
  0xda   : > { %v542_v23 = vrot.slane %v541_v13, 1 }
  0xdb   : > { %v557_v62 = vadd.f32 %v556_v53, %v533_v45  ;;  %v551_v63 = vadd.f32 %v550_v54, %v532_v44  ;;  %v549_v36 = vadd.f32 %v548_v18, %v547_v8 }
  0xdd   : > { %v558_v6 = vrot.slane %v557_v62, 2  ;;  %v552_v7 = vrot.slane %v551_v63, 2 }
  0xde   : > { %v432_v40 = vpop.f32.mrf.mxu0  ;;  %v3180_v41 = vpop.f32.mrf.mxu1 }
  0xdf   : > { %905 = vrot.lane.b32.xlu1 %v479_v34, %s2948_s17  ;;  %998 = vrot.lane.b32.xlu2 %v426_v33, %s2949_s18  ;;  %v535_v48 = vmul.f32 %v3180_v41, %v3124_v29  ;;  %v534_v50 = vmul.f32 %v432_v40, %v3122_v28  ;;  %v559_v16 = vadd.f32 %v558_v6, %v557_v62 }
  0xe0   : > { %897 = vrot.lane.b32.xlu0 %v426_v33, %s2948_s17  ;;  %v553_v17 = vadd.f32 %v552_v7, %v551_v63 }
  0xe1   : > { %v568_v56 = vrot.slane %v535_v48, 4  ;;  %v562_v57 = vrot.slane %v534_v50, 4 }
  0xe3   : > { %v569_v1 = vadd.f32 %v568_v56, %v535_v48  ;;  %v563_v3 = vadd.f32 %v562_v57, %v534_v50  ;;  %v3239_v50 = vmul.f32 0.35355338, %v549_v36 }
  0xe5   : > { %v570_v9 = vrot.slane %v569_v1, 2  ;;  %v564_v10 = vrot.slane %v563_v3, 2  ;;  %5124 = vst [vmem:[#allocation6_spill] sm:$0xff] %v3239_v50 }
  0xe6   : > { %v3195_v46 = vpop.f32.mrf.mxu1  ;;  %v3208_v58 = vpop.f32.mrf.mxu0 }
  0xe7   : > { %1208 = vrot.lane.b32.xlu1 %v479_v34, %s2950_s19  ;;  %1099 = vrot.lane.b32.xlu2 %v426_v33, %s2951_s20  ;;  %v537_v51 = vmul.f32 %v3195_v46, %v3133_v32  ;;  %v536_v2 = vmul.f32 %v3208_v58, %v3131_v31  ;;  %v571_v19 = vadd.f32 %v570_v9, %v569_v1  ;;  %v5020_v9 = vmov -1e+30  }
  0xe8   : > { %1006 = vrot.lane.b32.xlu0 %v479_v34, %s2949_s18  ;;  %v565_v20 = vadd.f32 %v564_v10, %v563_v3  ;;  %v3275_v10 = vsel %vm683_vm2, 0.0, %v5020_v9 }
  0xe9   : > { %v580_v60 = vrot.slane %v537_v51, 4  ;;  %v574_v11 = vrot.slane %v536_v2, 4 }
  0xeb   : > { %v581_v5 = vadd.f32 %v580_v60, %v537_v51  ;;  %v575_v21 = vadd.f32 %v574_v11, %v536_v2 }
  0xed   : > { %v582_v14 = vrot.slane %v581_v5, 2  ;;  %v576_v39 = vrot.slane %v575_v21, 2 }
  0xef   : > { %604 = vrot.lane.b32.xlu1 %v482_v38, %s2945_s22  ;;  %697 = vrot.lane.b32.xlu2 %v429_v37, %s2946_s23  ;;  %v583_v30 = vadd.f32 %v582_v14, %v581_v5  ;;  %v3245_v56 = vadd.f32 %v576_v39, %v575_v21 }
  0xf0   : > { %1107 = vrot.lane.b32.xlu0 %v479_v34, %s2951_s20  ;;  %v554_v34 = vrot.slane %v553_v17, 1 }
  0xf1   : > { %v584_v42 = vrot.slane %v583_v30, 1  ;;  %v578_v5 = vrot.slane %v3245_v56, 1 }
  0xf2   : > { %v555_v48 = vadd.f32 %v554_v34, %v553_v17 }
  0xf3   : > { %v585_v62 = vadd.f32 %v584_v42, %v583_v30 }
  0xf4   : > { %v3253_v0 = vmul.f32 0.35355338, %v555_v48 }
  0xf5   : > { %v3270_v8 = vmul.f32 0.35355338, %v585_v62 }
  0xf6   : > { %5127 = vst [vmem:[#allocation9_spill] sm:$0xff] %v3253_v0 }
  0xf7   : > { %798 = vrot.lane.b32.xlu1 %v429_v37, %s2947_s13  ;;  %806 = vrot.lane.b32.xlu2 %v482_v38, %s2947_s13  ;;  %5129 = vst [vmem:[#allocation11_spill] sm:$0xff] %v3270_v8 }
  0xf8   : > { %1200 = vrot.lane.b32.xlu0 %v426_v33, %s2950_s19  ;;  %v560_v33 = vrot.slane %v559_v16, 1 }
  0xfa   : > { %v561_v45 = vadd.f32 %v560_v33, %v559_v16 }
  0xfc   : > { %v3251_v63 = vmul.f32 0.35355338, %v561_v45 }
  0xfe   : > { %5126 = vst [vmem:[#allocation8_spill] sm:$0xff] %v3251_v63 }
  0xff   : > { %907 = vrot.lane.b32.xlu1 %v482_v38, %s2948_s17  ;;  %1000 = vrot.lane.b32.xlu2 %v429_v37, %s2949_s18 }
 0x100   : > { %596 = vrot.lane.b32.xlu0 %v429_v37, %s2945_s22 }
 0x107   : > { %1101 = vrot.lane.b32.xlu1 %v429_v37, %s2951_s20  ;;  %1109 = vrot.lane.b32.xlu2 %v482_v38, %s2951_s20 }
 0x108   : > { %705 = vrot.lane.b32.xlu0 %v482_v38, %s2946_s23 }
 0x10f   : > { %1202 = vrot.lane.b32.xlu1 %v429_v37, %s2950_s19  ;;  %1210 = vrot.lane.b32.xlu2 %v482_v38, %s2950_s19 }
 0x110   : > { %899 = vrot.lane.b32.xlu0 %v429_v37, %s2948_s17  ;;  %v572_v37 = vrot.slane %v571_v19, 1 }
 0x112   : > { %v573_v52 = vadd.f32 %v572_v37, %v571_v19 }
 0x114   : > { %v3262_v3 = vmul.f32 0.35355338, %v573_v52 }
 0x116   : > { %5128 = vst [vmem:[#allocation10_spill] sm:$0xff] %v3262_v3 }
 0x117   : > { %699 = vrot.lane.b32.xlu2 %v432_v40, %s2946_s23  ;;  %598 = vrot.lane.b32.xlu1 %v432_v40, %s2945_s22 }
 0x118   : > { %1008 = vrot.lane.b32.xlu0 %v482_v38, %s2949_s18  ;;  %v566_v38 = vrot.slane %v565_v20, 1 }
 0x11a   : > { %v567_v55 = vadd.f32 %v566_v38, %v565_v20 }
 0x11c   : > { %v3264_v4 = vmul.f32 0.35355338, %v567_v55 }
 0x11f   : > { %808 = vrot.lane.b32.xlu2 %v3180_v41, %s2947_s13  ;;  %606 = vrot.lane.b32.xlu1 %v3180_v41, %s2945_s22 }
 0x120   : > { %707 = vrot.lane.b32.xlu0 %v3180_v41, %s2946_s23 }
 0x127   : > { %1002 = vrot.lane.b32.xlu2 %v432_v40, %s2949_s18  ;;  %800 = vrot.lane.b32.xlu1 %v432_v40, %s2947_s13 }
 0x128   : > { %901 = vrot.lane.b32.xlu0 %v432_v40, %s2948_s17 }
 0x129   : > { %v3197_v47 = vpop.permute.xlu2 %695 }
 0x12f   : > { %1111 = vrot.lane.b32.xlu2 %v3180_v41, %s2951_s20  ;;  %909 = vrot.lane.b32.xlu1 %v3180_v41, %s2948_s17 }
 0x130   : > { %1010 = vrot.lane.b32.xlu0 %v3180_v41, %s2949_s18 }
 0x131   : > { %v3212_v61 = vpop.permute.xlu2 %804 }
 0x137   : > { %1103 = vrot.lane.b32.xlu1 %v432_v40, %s2951_s20  ;;  %701 = vrot.lane.b32.xlu2 %v3208_v58, %s2946_s23 }
 0x138   : > { %1204 = vrot.lane.b32.xlu0 %v432_v40, %s2950_s19  ;;  %v543_v40 = vadd.f32 %v542_v23, %v541_v13 }
 0x139   : > { %v3220_v15 = vpop.permute.xlu2 %998 }
 0x13a   : > { %v3247_v57 = vmul.f32 0.35355338, %v543_v40 }
 0x13c   : > { %5125 = vst [vmem:[#allocation7_spill] sm:$0xff] %v3247_v57 }
 0x13f   : > { %1212 = vrot.lane.b32.xlu1 %v3180_v41, %s2950_s19  ;;  %709 = vrot.lane.b32.xlu2 %v3195_v46, %s2946_s23  ;;  %v3237_v41 = vand.u32 7, %v505_v35 }
 0x140   : > { %600 = vrot.lane.b32.xlu0 %v3208_v58, %s2945_s22 }
 0x141   : > { %v603_v43 = vpop.permute.xlu1 %602  ;;  %v3232_v44 = vpop.permute.xlu2 %1099  ;;  %vm684_vm3 = vcmp.ge.s32.totalorder %v3237_v41, 1  ;;  %vm886_vm7 = vcmp.ge.s32.totalorder %v3237_v41, 3  ;;  %vm785_vm10 = vcmp.ge.s32.totalorder %v3237_v41, 2  ;;  %vm987_vm13 = vcmp.ge.s32.totalorder %v3237_v41, 4 }
 0x142   : > { %v595_v51 = vpop.permute.xlu0 %594  ;;  %v3280_v11 = vsel %vm684_vm3, 0.0, %v5020_v9  ;;  %vm1088_vm2 = vcmp.ge.s32.totalorder %v3237_v41, 5  ;;  %vm1188_vm3 = vcmp.ge.s32.totalorder %v3235_v49, 6 }
 0x143   : > { %v611_v53 = vsel %vm610_vm1, %v595_v51, %v603_v43  ;;  %v615_v54 = vsel %vm610_vm1, %v603_v43, %v595_v51  ;;  %v3312_v43 = vsel %vm886_vm7, 0.0, %v5020_v9  ;;  %vm1216_vm7 = vcmp.lt.s32.totalorder %v3222_v22, 7  ;;  %v2116_v22 = vld [vmem:[%s5015_s5 + $0x68] sm:$0xff] }
 0x144   : > { %v619_v59 = vmul.f32 %v615_v54, %v3114_v24  ;;  %v620_v60 = vmul.f32 %v611_v53, %v3116_v25 }
 0x146   : > { %v627_v1 = vrot.slane %v619_v59, 4  ;;  %v633_v2 = vrot.slane %v620_v60, 4 }
 0x147   : > { %802 = vrot.lane.b32.xlu1 %v3208_v58, %s2947_s13  ;;  %810 = vrot.lane.b32.xlu2 %v3195_v46, %s2947_s13 }
 0x148   : > { %v628_v6 = vadd.f32 %v627_v1, %v619_v59  ;;  %v634_v7 = vadd.f32 %v633_v2, %v620_v60  ;;  %608 = vrot.lane.b32.xlu0 %v3195_v46, %s2945_s22  ;;  %v3324_v60 = vsel %vm784_vm8, 0.0, %v5020_v9  ;;  %vm1289_vm8 = vcmp.ge.s32.totalorder %v3235_v49, 7 }
 0x149   : > { %v797_v12 = vpop.permute.xlu1 %796  ;;  %v3284_v13 = vpop.permute.xlu2 %697 }
 0x14a   : > { %v629_v14 = vrot.slane %v628_v6, 2  ;;  %v635_v16 = vrot.slane %v634_v7, 2  ;;  %v813_v17 = vsel %vm812_vm4, %v797_v12, %v3212_v61  ;;  %v817_v18 = vsel %vm812_vm4, %v3212_v61, %v797_v12  ;;  %v704_v19 = vpop.permute.xlu0 %703 }
 0x14b   : > { %v821_v20 = vmul.f32 %v817_v18, %v3114_v24  ;;  %v822_v21 = vmul.f32 %v813_v17, %v3116_v25  ;;  %v712_v23 = vsel %vm711_vm5, %v3197_v47, %v704_v19  ;;  %v716_v30 = vsel %vm711_vm5, %v704_v19, %v3197_v47 }
 0x14c   : > { %v630_v33 = vadd.f32 %v629_v14, %v628_v6  ;;  %v636_v34 = vadd.f32 %v635_v16, %v634_v7  ;;  %v720_v35 = vmul.f32 %v716_v30, %v3114_v24  ;;  %v721_v36 = vmul.f32 %v712_v23, %v3116_v25 }
 0x14d   : > { %v829_v61 = vrot.slane %v821_v20, 4  ;;  %v835_v37 = vrot.slane %v822_v21, 4  ;;  %v3307_v47 = vsel %vm885_vm6, 0.0, %v5020_v9  ;;  %vm1189_vm6 = vcmp.ge.s32.totalorder %v3237_v41, 6 }
 0x14e   : > { %v631_v38 = vrot.slane %v630_v33, 1  ;;  %v637_v39 = vrot.slane %v636_v34, 1  ;;  %v728_v40 = vrot.slane %v720_v35, 4  ;;  %v734_v42 = vrot.slane %v721_v36, 4 }
 0x14f   : > { %v830_v45 = vadd.f32 %v829_v61, %v821_v20  ;;  %v836_v48 = vadd.f32 %v835_v37, %v822_v21  ;;  %911 = vrot.lane.b32.xlu1 %v3195_v46, %s2948_s17  ;;  %1004 = vrot.lane.b32.xlu2 %v3208_v58, %s2949_s18 }
 0x150   : > { %v632_v51 = vadd.f32 %v631_v38, %v630_v33  ;;  %v638_v52 = vadd.f32 %v637_v39, %v636_v34  ;;  %v729_v53 = vadd.f32 %v728_v40, %v720_v35  ;;  %v735_v54 = vadd.f32 %v734_v42, %v721_v36  ;;  %903 = vrot.lane.b32.xlu0 %v3208_v58, %s2948_s17 }
 0x151   : > { %v831_v55 = vrot.slane %v830_v45, 2  ;;  %v837_v59 = vrot.slane %v836_v48, 2  ;;  %v906_v62 = vpop.permute.xlu1 %905  ;;  %v3326_v1 = vpop.permute.xlu2 %806 }
 0x152   : > { %v675_v2 = vmul.f32 0.35355338, %v632_v51  ;;  %v676_v6 = vmul.f32 0.35355338, %v638_v52  ;;  %v730_v7 = vrot.slane %v729_v53, 2  ;;  %v736_v12 = vrot.slane %v735_v54, 2  ;;  %v898_v14 = vpop.permute.xlu0 %897 }
 0x153   : > { %v832_v16 = vadd.f32 %v831_v55, %v830_v45  ;;  %v838_v17 = vadd.f32 %v837_v59, %v836_v48  ;;  %v914_v18 = vsel %vm913_vm9, %v898_v14, %v906_v62  ;;  %v918_v19 = vsel %vm913_vm9, %v906_v62, %v898_v14 }
 0x154   : > { %v3333_v20 = vadd.f32 %v3275_v10, %v675_v2  ;;  %v3336_v21 = vadd.f32 %v3280_v11, %v676_v6  ;;  %v731_v23 = vadd.f32 %v730_v7, %v729_v53  ;;  %v737_v30 = vadd.f32 %v736_v12, %v735_v54 }
 0x155   : > { %v833_v33 = vrot.slane %v832_v16, 1  ;;  %v839_v34 = vrot.slane %v838_v17, 1  ;;  %v922_v35 = vmul.f32 %v918_v19, %v3114_v24  ;;  %v923_v36 = vmul.f32 %v914_v18, %v3116_v25 }
 0x156   : > { %5130 = vst [vmem:[#allocation12_spill] sm:$0xff] %v3333_v20  ;;  %v1301_v61 = vmax.f32 %v3247_v57, %v3333_v20  ;;  %v1302_v37 = vmax.f32 %v3239_v50, %v3336_v21  ;;  %v732_v38 = vrot.slane %v731_v23, 1  ;;  %v738_v39 = vrot.slane %v737_v30, 1 }
 0x157   : > { %5131 = vst [vmem:[#allocation13_spill] sm:$0xff] %v3336_v21  ;;  %v834_v40 = vadd.f32 %v833_v33, %v832_v16  ;;  %v840_v42 = vadd.f32 %v839_v34, %v838_v17  ;;  %v930_v45 = vrot.slane %v922_v35, 4  ;;  %v936_v48 = vrot.slane %v923_v36, 4  ;;  %1105 = vrot.lane.b32.xlu1 %v3208_v58, %s2951_s20  ;;  %1113 = vrot.lane.b32.xlu2 %v3195_v46, %s2951_s20 }
 0x158   : > { %v3351_v51 = vsel %vm785_vm10, 0.0, %v5020_v9  ;;  %v733_v52 = vadd.f32 %v732_v38, %v731_v23  ;;  %v739_v53 = vadd.f32 %v738_v39, %v737_v30  ;;  %1012 = vrot.lane.b32.xlu0 %v3195_v46, %s2949_s18  ;;  %v579_v16 = vadd.f32 %v578_v5, %v3245_v56  ;;  %v3378_v5 = vpop.f32.mrf.mxu0 }
 0x159   : > { %v877_v54 = vmul.f32 0.35355338, %v834_v40  ;;  %v931_v55 = vadd.f32 %v930_v45, %v922_v35  ;;  %v937_v59 = vadd.f32 %v936_v48, %v923_v36  ;;  %v3357_v62 = vpop.permute.xlu1 %1208  ;;  %v3359_v2 = vpop.permute.xlu2 %1000  ;;  %v878_v6 = vmul.f32 0.35355338, %v840_v42 }
 0x15a   : > { %v776_v7 = vmul.f32 0.35355338, %v733_v52  ;;  %v777_v12 = vmul.f32 0.35355338, %v739_v53  ;;  %v1007_v14 = vpop.permute.xlu0 %1006  ;;  %vm1290_vm10 = vcmp.ge.s32.totalorder %v3237_v41, 7 }
 0x15b   : > { %v932_v17 = vrot.slane %v931_v55, 2  ;;  %v938_v18 = vrot.slane %v937_v59, 2  ;;  %v1015_v30 = vsel %vm1014_vm11, %v3220_v15, %v1007_v14  ;;  %v1019_v56 = vsel %vm1014_vm11, %v1007_v14, %v3220_v15 }
 0x15c   : > { %v3367_v19 = vadd.f32 %v3324_v60, %v776_v7  ;;  %v3370_v23 = vadd.f32 %v3351_v51, %v777_v12  ;;  %v1023_v35 = vmul.f32 %v1019_v56, %v3114_v24  ;;  %v1024_v36 = vmul.f32 %v1015_v30, %v3116_v25 }
 0x15d   : > { %v933_v33 = vadd.f32 %v932_v17, %v931_v55  ;;  %v939_v34 = vadd.f32 %v938_v18, %v937_v59  ;;  %v3383_v38 = vadd.f32 %v3307_v47, %v877_v54  ;;  %v3386_v39 = vadd.f32 %v3312_v43, %v878_v6 }
 0x15e   : > { %5132 = vst [vmem:[#allocation14_spill] sm:$0xff] %v3367_v19  ;;  %v1309_v40 = vmax.f32 %v1301_v61, %v3367_v19  ;;  %v1310_v42 = vmax.f32 %v1302_v37, %v3370_v23  ;;  %v1031_v48 = vrot.slane %v1023_v35, 4  ;;  %v1037_v52 = vrot.slane %v1024_v36, 4 }
 0x15f   : > { %5133 = vst [vmem:[#allocation15_spill] sm:$0xff] %v3370_v23  ;;  %v934_v45 = vrot.slane %v933_v33, 1  ;;  %v940_v15 = vrot.slane %v939_v34, 1  ;;  %1214 = vrot.lane.b32.xlu1 %v3195_v46, %s2950_s19  ;;  %1629 = vrot.lane.b32.xlu2 %v3378_v5, %s2945_s22  ;;  %v3399_v61 = vmul.f32 0.35355338, %v579_v16  ;;  %v3408_v12 = vsel %vm986_vm12, 0.0, %v5020_v9 }
 0x160   : > { %5134 = vst [vmem:[#allocation16_spill] sm:$0xff] %v3383_v38  ;;  %v1318_v53 = vmax.f32 %v1310_v42, %v3386_v39  ;;  %v1317_v54 = vmax.f32 %v1309_v40, %v3383_v38  ;;  %1206 = vrot.lane.b32.xlu0 %v3208_v58, %s2950_s19  ;;  %v1032_v59 = vadd.f32 %v1031_v48, %v1023_v35  ;;  %v3413_v58 = vsel %vm987_vm13, 0.0, %v5020_v9  ;;  %v3429_v35 = vpop.f32.mrf.mxu1 }
 0x161   : > { %5135 = vst [vmem:[#allocation17_spill] sm:$0xff] %v3386_v39  ;;  %v935_v37 = vadd.f32 %v934_v45, %v933_v33  ;;  %v941_v55 = vadd.f32 %v940_v15, %v939_v34  ;;  %v1038_v6 = vadd.f32 %v1037_v52, %v1024_v36  ;;  %v3401_v7 = vpop.permute.xlu1 %604  ;;  %v3403_v46 = vpop.permute.xlu2 %1109  ;;  %v3419_v14 = vsel %vm1087_vm14, 0.0, %v5020_v9 }
 0x162   : > { %5136 = vst [vmem:[#allocation18_spill] sm:$0xff] %v3399_v61  ;;  %v1108_v16 = vpop.permute.xlu0 %1107  ;;  %v1033_v30 = vrot.slane %v1032_v59, 2  ;;  %v3440_v15 = vsel %vm1088_vm2, 0.0, %v5020_v9  ;;  %v3485_v39 = vpop.f32.mrf.mxu0 }
 0x163   : > { %5137 = vst [vmem:[#allocation19_spill] sm:$0xff] %v3413_v58  ;;  %v978_v17 = vmul.f32 0.35355338, %v935_v37  ;;  %v979_v18 = vmul.f32 0.35355338, %v941_v55  ;;  %v1039_v56 = vrot.slane %v1038_v6, 2  ;;  %v1116_v33 = vsel %vm1115_vm15, %v3232_v44, %v1108_v16 }
 0x164   : > { %v1120_v34 = vsel %vm1115_vm15, %v1108_v16, %v3232_v44  ;;  %5138 = vst [vmem:[#allocation20_spill] sm:$0xff] %v3429_v35  ;;  %v1034_v42 = vadd.f32 %v1033_v30, %v1032_v59  ;;  %v1125_v52 = vmul.f32 %v1116_v33, %v3116_v25 }
 0x165   : > { %v3432_v36 = vadd.f32 %v3408_v12, %v978_v17  ;;  %v3435_v40 = vadd.f32 %v3413_v58, %v979_v18  ;;  %v1040_v45 = vadd.f32 %v1039_v56, %v1038_v6  ;;  %v1124_v48 = vmul.f32 %v1120_v34, %v3114_v24  ;;  %5143 = vst [vmem:[#allocation25_spill] sm:$0xff] %v3485_v39 }
 0x166   : > { %v1035_v55 = vrot.slane %v1034_v42, 1  ;;  %v3458_v6 = vsel %vm1188_vm3, 0.0, %v5020_v9  ;;  %v1138_v16 = vrot.slane %v1125_v52, 4 }
 0x167   : > { %5139 = vst [vmem:[#allocation21_spill] sm:$0xff] %v3432_v36  ;;  %v3446_v44 = vmax.f32 %v1317_v54, %v3432_v36  ;;  %v3449_v37 = vmax.f32 %v1318_v53, %v3435_v40  ;;  %v1041_v59 = vrot.slane %v1040_v45, 1  ;;  %1677 = vrot.lane.b32.xlu1 %v3378_v5, %s2946_s23  ;;  %1685 = vrot.lane.b32.xlu2 %v3429_v35, %s2946_s23  ;;  %v3463_v54 = vsel %vm1189_vm6, 0.0, %v5020_v9 }
 0x168   : > { %5140 = vst [vmem:[#allocation22_spill] sm:$0xff] %v3435_v40  ;;  %v1132_v53 = vrot.slane %v1124_v48, 4  ;;  %1637 = vrot.lane.b32.xlu0 %v3429_v35, %s2945_s22  ;;  %v1036_v17 = vadd.f32 %v1035_v55, %v1034_v42  ;;  %v1139_v34 = vadd.f32 %v1138_v16, %v1125_v52 }
 0x169   : > { %5141 = vst [vmem:[#allocation23_spill] sm:$0xff] %v3458_v6  ;;  %v1042_v18 = vadd.f32 %v1041_v59, %v1040_v45  ;;  %v799_v30 = vpop.permute.xlu1 %798  ;;  %v3469_v56 = vpop.permute.xlu2 %1210 }
 0x16a   : > { %5142 = vst [vmem:[#allocation24_spill] sm:$0xff] %v3463_v54  ;;  %v1133_v33 = vadd.f32 %v1132_v53, %v1124_v48  ;;  %v1201_v40 = vpop.permute.xlu0 %1200  ;;  %v814_v9 = vsel %vm812_vm4, %v799_v30, %v3326_v1  ;;  %v818_v36 = vsel %vm812_vm4, %v3326_v1, %v799_v30  ;;  %v1079_v42 = vmul.f32 0.35355338, %v1036_v17 }
 0x16b   : > { %v1080_v45 = vmul.f32 0.35355338, %v1042_v18  ;;  %v1217_v55 = vsel %vm1216_vm7, %v1201_v40, %v3357_v62  ;;  %v1221_v48 = vsel %vm1216_vm7, %v3357_v62, %v1201_v40  ;;  %v1140_v59 = vrot.slane %v1139_v34, 2 }
 0x16c   : > { %v1134_v52 = vrot.slane %v1133_v33, 2  ;;  %v1225_v53 = vmul.f32 %v1221_v48, %v3114_v24  ;;  %v1226_v16 = vmul.f32 %v1217_v55, %v3116_v25  ;;  %v3488_v1 = vadd.f32 %v3419_v14, %v1079_v42 }
 0x16d   : > { %v3491_v17 = vadd.f32 %v3440_v15, %v1080_v45  ;;  %v823_v18 = vmul.f32 %v818_v36, %v3118_v26  ;;  %v824_v30 = vmul.f32 %v814_v9, %v3120_v27  ;;  %v1141_v62 = vadd.f32 %v1140_v59, %v1139_v34 }
 0x16e   : > { %5144 = vst [vmem:[#allocation26_spill] sm:$0xff] %v3488_v1  ;;  %v1135_v38 = vadd.f32 %v1134_v52, %v1133_v33  ;;  %v1233_v40 = vrot.slane %v1225_v53, 4  ;;  %v1239_v23 = vrot.slane %v1226_v16, 4  ;;  %v1333_v24 = vmax.f32 %v3446_v44, %v3488_v1 }
 0x16f   : > { %5145 = vst [vmem:[#allocation27_spill] sm:$0xff] %v3491_v17  ;;  %v1334_v25 = vmax.f32 %v3449_v37, %v3491_v17  ;;  %v841_v55 = vrot.slane %v823_v18, 4  ;;  %v847_v42 = vrot.slane %v824_v30, 4  ;;  %1733 = vrot.lane.b32.xlu1 %v3429_v35, %s2947_s13  ;;  %1631 = vrot.lane.b32.xlu2 %v3485_v39, %s2945_s22  ;;  %v1142_v9 = vrot.slane %v1141_v62, 1 }
 0x170   : > { %v1136_v36 = vrot.slane %v1135_v38, 1  ;;  %v1234_v33 = vadd.f32 %v1233_v40, %v1225_v53  ;;  %v1240_v34 = vadd.f32 %v1239_v23, %v1226_v16  ;;  %1725 = vrot.lane.b32.xlu0 %v3378_v5, %s2947_s13  ;;  %v5146_v45 = vmov -1e+30  }
 0x171   : > { %v3508_v44 = vsel %vm1289_vm8, 0.0, %v5146_v45  ;;  %v3513_v37 = vsel %vm1290_vm10, 0.0, %v5146_v45  ;;  %v842_v48 = vadd.f32 %v841_v55, %v823_v18  ;;  %v848_v52 = vadd.f32 %v847_v42, %v824_v30  ;;  %v3515_v59 = vpop.permute.xlu1 %907  ;;  %v3517_v17 = vpop.permute.xlu2 %699 }
 0x172   : > { %5147 = vst [vmem:[#allocation28_spill] sm:$0xff] %v3508_v44  ;;  %v1137_v23 = vadd.f32 %v1136_v36, %v1135_v38  ;;  %v1143_v53 = vadd.f32 %v1142_v9, %v1141_v62  ;;  %v1235_v16 = vrot.slane %v1234_v33, 2  ;;  %v1241_v40 = vrot.slane %v1240_v34, 2  ;;  %v597_v1 = vpop.permute.xlu0 %596  ;;  %v3525_v45 = vpop.f32.mrf.mxu1 }
 0x173   : > { %5148 = vst [vmem:[#allocation29_spill] sm:$0xff] %v3513_v37  ;;  %v843_v19 = vrot.slane %v842_v48, 2  ;;  %v849_v49 = vrot.slane %v848_v52, 2  ;;  %v612_v21 = vsel %vm610_vm1, %v597_v1, %v3401_v7  ;;  %v616_v41 = vsel %vm610_vm1, %v3401_v7, %v597_v1 }
 0x174   : > { %v1180_v18 = vmul.f32 0.35355338, %v1137_v23  ;;  %v1181_v30 = vmul.f32 0.35355338, %v1143_v53  ;;  %v1236_v55 = vadd.f32 %v1235_v16, %v1234_v33  ;;  %v1242_v42 = vadd.f32 %v1241_v40, %v1240_v34 }
 0x175   : > { %v844_v38 = vadd.f32 %v843_v19, %v842_v48  ;;  %v850_v62 = vadd.f32 %v849_v49, %v848_v52  ;;  %v621_v36 = vmul.f32 %v616_v41, %v3118_v26  ;;  %v622_v9 = vmul.f32 %v612_v21, %v3120_v27 }
 0x176   : > { %v3530_v20 = vadd.f32 %v3458_v6, %v1180_v18  ;;  %v3533_v8 = vadd.f32 %v3463_v54, %v1181_v30  ;;  %v1237_v61 = vrot.slane %v1236_v55, 1  ;;  %v1243_v7 = vrot.slane %v1242_v42, 1 }
 0x177   : > { %v845_v1 = vrot.slane %v844_v38, 1  ;;  %v851_v23 = vrot.slane %v850_v62, 1  ;;  %v639_v33 = vrot.slane %v621_v36, 4  ;;  %v645_v34 = vrot.slane %v622_v9, 4  ;;  %1679 = vrot.lane.b32.xlu1 %v3485_v39, %s2946_s23  ;;  %1687 = vrot.lane.b32.xlu2 %v3525_v45, %s2946_s23 }
 0x178   : > { %5149 = vst [vmem:[#allocation30_spill] sm:$0xff] %v3530_v20  ;;  %v1341_v21 = vmax.f32 %v1333_v24, %v3530_v20  ;;  %v1342_v19 = vmax.f32 %v1334_v25, %v3533_v8  ;;  %v1238_v48 = vadd.f32 %v1237_v61, %v1236_v55  ;;  %v1244_v52 = vadd.f32 %v1243_v7, %v1242_v42 }
 0x179   : > { %5150 = vst [vmem:[#allocation31_spill] sm:$0xff] %v3533_v8  ;;  %1639 = vrot.lane.b32.xlu0 %v3525_v45, %s2945_s22  ;;  %v846_v53 = vadd.f32 %v845_v1, %v844_v38  ;;  %v852_v16 = vadd.f32 %v851_v23, %v850_v62  ;;  %v640_v40 = vadd.f32 %v639_v33, %v621_v36  ;;  %v1102_v41 = vpop.permute.xlu1 %1101  ;;  %v3543_v18 = vpop.permute.xlu2 %808 }
 0x17a   : > { %v646_v49 = vadd.f32 %v645_v34, %v622_v9  ;;  %v1281_v30 = vmul.f32 0.35355338, %v1238_v48  ;;  %v1282_v35 = vmul.f32 0.35355338, %v1244_v52  ;;  %v1117_v24 = vsel %vm1115_vm15, %v1102_v41, %v3403_v46  ;;  %v706_v25 = vpop.permute.xlu0 %705 }
 0x17b   : > { %v1121_v61 = vsel %vm1115_vm15, %v3403_v46, %v1102_v41  ;;  %v879_v55 = vmul.f32 0.35355338, %v846_v53  ;;  %v880_v42 = vmul.f32 0.35355338, %v852_v16  ;;  %v641_v38 = vrot.slane %v640_v40, 2 }
 0x17c   : > { %v647_v62 = vrot.slane %v646_v49, 2  ;;  %v3552_v36 = vadd.f32 %v3508_v44, %v1281_v30  ;;  %v3555_v9 = vadd.f32 %v3513_v37, %v1282_v35  ;;  %v1126_v7 = vmul.f32 %v1121_v61, %v3118_v26 }
 0x17d   : > { %v1127_v1 = vmul.f32 %v1117_v24, %v3120_v27  ;;  %v3560_v23 = vadd.f32 %v3307_v47, %v879_v55  ;;  %v3563_v46 = vadd.f32 %v3312_v43, %v880_v42  ;;  %v642_v33 = vadd.f32 %v641_v38, %v640_v40 }
 0x17e   : > { %5151 = vst [vmem:[#allocation32_spill] sm:$0xff] %v3552_v36  ;;  %v648_v34 = vadd.f32 %v647_v62, %v646_v49  ;;  %v3566_v48 = vmax.f32 %v1341_v21, %v3552_v36  ;;  %v3569_v52 = vmax.f32 %v1342_v19, %v3555_v9  ;;  %v1144_v35 = vrot.slane %v1126_v7, 4  ;;  %v3599_v36 = vpop.f32.mrf.mxu1 }
 0x17f   : > { %5152 = vst [vmem:[#allocation33_spill] sm:$0xff] %v3555_v9  ;;  %v1150_v53 = vrot.slane %v1127_v1, 4  ;;  %v643_v16 = vrot.slane %v642_v33, 1  ;;  %v713_v30 = vsel %vm711_vm5, %v3284_v13, %v706_v25  ;;  %v717_v24 = vsel %vm711_vm5, %v706_v25, %v3284_v13  ;;  %1735 = vrot.lane.b32.xlu1 %v3525_v45, %s2947_s13  ;;  %1775 = vrot.lane.b32.xlu2 %v3485_v39, %s2948_s17  ;;  %v3597_v25 = vpop.f32.mrf.mxu0 }
 0x180   : > { %5153 = vst [vmem:[#allocation34_spill] sm:$0xff] %v3560_v23  ;;  %v649_v41 = vrot.slane %v648_v34, 1  ;;  %v1145_v21 = vadd.f32 %v1144_v35, %v1126_v7  ;;  %v722_v40 = vmul.f32 %v717_v24, %v3118_v26  ;;  %v723_v49 = vmul.f32 %v713_v30, %v3120_v27 }
 0x181   : > { %5154 = vst [vmem:[#allocation35_spill] sm:$0xff] %v3563_v46  ;;  %v1151_v19 = vadd.f32 %v1150_v53, %v1127_v1  ;;  %1727 = vrot.lane.b32.xlu0 %v3485_v39, %s2947_s13  ;;  %v644_v61 = vadd.f32 %v643_v16, %v642_v33  ;;  %v1203_v42 = vpop.permute.xlu1 %1202  ;;  %v3585_v38 = vpop.permute.xlu2 %1002 }
 0x182   : > { %5155 = vst [vmem:[#allocation36_spill] sm:$0xff] %v3566_v48  ;;  %v650_v55 = vadd.f32 %v649_v41, %v648_v34  ;;  %v1146_v62 = vrot.slane %v1145_v21, 2  ;;  %v740_v1 = vrot.slane %v722_v40, 4  ;;  %v746_v35 = vrot.slane %v723_v49, 4  ;;  %v900_v53 = vpop.permute.xlu0 %899 }
 0x183   : > { %5156 = vst [vmem:[#allocation37_spill] sm:$0xff] %v3569_v52  ;;  %v1152_v7 = vrot.slane %v1151_v19, 2  ;;  %v677_v30 = vmul.f32 0.35355338, %v644_v61  ;;  %v1218_v33 = vsel %vm1216_vm7, %v1203_v42, %v3469_v56  ;;  %v1222_v34 = vsel %vm1216_vm7, %v3469_v56, %v1203_v42 }
 0x184   : > { %v678_v24 = vmul.f32 0.35355338, %v650_v55  ;;  %v1147_v16 = vadd.f32 %v1146_v62, %v1145_v21  ;;  %v741_v13 = vadd.f32 %v740_v1, %v722_v40  ;;  %v747_v9 = vadd.f32 %v746_v35, %v723_v49 }
 0x185   : > { %v1153_v41 = vadd.f32 %v1152_v7, %v1151_v19  ;;  %v3602_v8 = vadd.f32 %v3275_v10, %v677_v30  ;;  %v1227_v55 = vmul.f32 %v1222_v34, %v3118_v26  ;;  %v1228_v20 = vmul.f32 %v1218_v33, %v3120_v27 }
 0x186   : > { %v3605_v61 = vadd.f32 %v3280_v11, %v678_v24  ;;  %v1148_v52 = vrot.slane %v1147_v16, 1  ;;  %v742_v21 = vrot.slane %v741_v13, 2  ;;  %v748_v19 = vrot.slane %v747_v9, 2 }
 0x187   : > { %5157 = vst [vmem:[#allocation38_spill] sm:$0xff] %v3602_v8  ;;  %v1154_v56 = vrot.slane %v1153_v41, 1  ;;  %v1303_v40 = vmax.f32 %v3253_v0, %v3602_v8  ;;  %v1245_v42 = vrot.slane %v1227_v55, 4  ;;  %v1251_v62 = vrot.slane %v1228_v20, 4  ;;  %1641 = vrot.lane.b32.xlu2 %v3599_v36, %s2945_s22  ;;  %1633 = vrot.lane.b32.xlu1 %v3597_v25, %s2945_s22 }
 0x188   : > { %5158 = vst [vmem:[#allocation39_spill] sm:$0xff] %v3605_v61  ;;  %v1304_v49 = vmax.f32 %v3251_v63, %v3605_v61  ;;  %v1149_v7 = vadd.f32 %v1148_v52, %v1147_v16  ;;  %v743_v35 = vadd.f32 %v742_v21, %v741_v13  ;;  %v749_v30 = vadd.f32 %v748_v19, %v747_v9 }
 0x189   : > { %v1155_v1 = vadd.f32 %v1154_v56, %v1153_v41  ;;  %1729 = vrot.lane.b32.xlu0 %v3597_v25, %s2947_s13  ;;  %v1246_v24 = vadd.f32 %v1245_v42, %v1227_v55  ;;  %v1252_v33 = vadd.f32 %v1251_v62, %v1228_v20  ;;  %v915_v34 = vsel %vm913_vm9, %v900_v53, %v3515_v59  ;;  %v3625_v8 = vpop.permute.xlu2 %1111  ;;  %v3627_v63 = vpop.permute.xlu1 %598 }
 0x18a   : > { %v919_v61 = vsel %vm913_vm9, %v3515_v59, %v900_v53  ;;  %v1182_v52 = vmul.f32 0.35355338, %v1149_v7  ;;  %v744_v9 = vrot.slane %v743_v35, 1  ;;  %v750_v16 = vrot.slane %v749_v30, 1  ;;  %v1009_v41 = vpop.permute.xlu0 %1008 }
 0x18b   : > { %v1183_v13 = vmul.f32 0.35355338, %v1155_v1  ;;  %v1247_v56 = vrot.slane %v1246_v24, 2  ;;  %v1253_v55 = vrot.slane %v1252_v33, 2  ;;  %v924_v20 = vmul.f32 %v919_v61, %v3118_v26 }
 0x18c   : > { %v925_v21 = vmul.f32 %v915_v34, %v3120_v27  ;;  %v3632_v19 = vadd.f32 %v3458_v6, %v1182_v52  ;;  %v745_v53 = vadd.f32 %v744_v9, %v743_v35  ;;  %v751_v42 = vadd.f32 %v750_v16, %v749_v30 }
 0x18d   : > { %v3635_v59 = vadd.f32 %v3463_v54, %v1183_v13  ;;  %v1248_v62 = vadd.f32 %v1247_v56, %v1246_v24  ;;  %v1254_v7 = vadd.f32 %v1253_v55, %v1252_v33  ;;  %v942_v1 = vrot.slane %v924_v20, 4 }
 0x18e   : > { %5159 = vst [vmem:[#allocation40_spill] sm:$0xff] %v3632_v19  ;;  %v948_v0 = vrot.slane %v925_v21, 4  ;;  %v778_v50 = vmul.f32 0.35355338, %v745_v53  ;;  %v779_v48 = vmul.f32 0.35355338, %v751_v42  ;;  %v1016_v61 = vsel %vm1014_vm11, %v3359_v2, %v1009_v41 }
 0x18f   : > { %5160 = vst [vmem:[#allocation41_spill] sm:$0xff] %v3635_v59  ;;  %v1020_v34 = vsel %vm1014_vm11, %v1009_v41, %v3359_v2  ;;  %v1249_v52 = vrot.slane %v1248_v62, 1  ;;  %v1255_v57 = vrot.slane %v1254_v7, 1  ;;  %v943_v13 = vadd.f32 %v942_v1, %v924_v20  ;;  %1689 = vrot.lane.b32.xlu2 %v3599_v36, %s2946_s23  ;;  %1681 = vrot.lane.b32.xlu1 %v3597_v25, %s2946_s23 }
 0x190   : > { %v949_v39 = vadd.f32 %v948_v0, %v925_v21  ;;  %v3648_v35 = vadd.f32 %v3324_v60, %v778_v50  ;;  %v3651_v30 = vadd.f32 %v3351_v51, %v779_v48  ;;  %v1025_v24 = vmul.f32 %v1020_v34, %v3118_v26 }
 0x191   : > { %v1026_v2 = vmul.f32 %v1016_v61, %v3120_v27  ;;  %1785 = vrot.lane.b32.xlu0 %v3599_v36, %s2948_s17  ;;  %v1250_v0 = vadd.f32 %v1249_v52, %v1248_v62  ;;  %v1256_v33 = vadd.f32 %v1255_v57, %v1254_v7  ;;  %v944_v9 = vrot.slane %v943_v13, 2  ;;  %v607_v41 = vpop.permute.xlu1 %606  ;;  %v3657_v56 = vpop.permute.xlu2 %701 }
 0x192   : > { %5161 = vst [vmem:[#allocation42_spill] sm:$0xff] %v3648_v35  ;;  %v950_v16 = vrot.slane %v949_v39, 2  ;;  %v1311_v50 = vmax.f32 %v1303_v40, %v3648_v35  ;;  %v1312_v55 = vmax.f32 %v1304_v49, %v3651_v30  ;;  %v1043_v48 = vrot.slane %v1025_v24, 4  ;;  %v708_v21 = vpop.permute.xlu0 %707  ;;  %v3669_v52 = vpop.f32.mrf.mxu1 }
 0x193   : > { %5162 = vst [vmem:[#allocation43_spill] sm:$0xff] %v3651_v30  ;;  %v1049_v20 = vrot.slane %v1026_v2, 4  ;;  %v1283_v26 = vmul.f32 0.35355338, %v1250_v0  ;;  %v1284_v53 = vmul.f32 0.35355338, %v1256_v33  ;;  %v945_v27 = vadd.f32 %v944_v9, %v943_v13 }
 0x194   : > { %v951_v42 = vadd.f32 %v950_v16, %v949_v39  ;;  %v1320_v1 = vmax.f32 %v1312_v55, %v3563_v46  ;;  %v1319_v57 = vmax.f32 %v1311_v50, %v3560_v23  ;;  %v1044_v62 = vadd.f32 %v1043_v48, %v1025_v24  ;;  %v3703_v23 = vpop.f32.mrf.mxu0 }
 0x195   : > { %v1050_v7 = vadd.f32 %v1049_v20, %v1026_v2  ;;  %v3664_v61 = vadd.f32 %v3508_v44, %v1283_v26  ;;  %v3667_v40 = vadd.f32 %v3513_v37, %v1284_v53  ;;  %v946_v49 = vrot.slane %v945_v27, 1  ;;  %5167 = vst [vmem:[#allocation48_spill] sm:$0xff] %v3703_v23 }
 0x196   : > { %v952_v34 = vrot.slane %v951_v42, 1  ;;  %v1045_v0 = vrot.slane %v1044_v62, 2  ;;  %v714_v39 = vsel %vm711_vm5, %v3517_v17, %v708_v21  ;;  %v718_v13 = vsel %vm711_vm5, %v708_v21, %v3517_v17 }
 0x197   : > { %5163 = vst [vmem:[#allocation44_spill] sm:$0xff] %v3664_v61  ;;  %v1051_v33 = vrot.slane %v1050_v7, 2  ;;  %v947_v24 = vadd.f32 %v946_v49, %v945_v27  ;;  %v724_v9 = vmul.f32 %v718_v13, %v3122_v28  ;;  %v725_v16 = vmul.f32 %v714_v39, %v3124_v29  ;;  %1777 = vrot.lane.b32.xlu2 %v3597_v25, %s2948_s17 }
 0x198   : > { %5164 = vst [vmem:[#allocation45_spill] sm:$0xff] %v3667_v40  ;;  %v953_v2 = vadd.f32 %v952_v34, %v951_v42  ;;  %v1046_v50 = vadd.f32 %v1045_v0, %v1044_v62  ;;  %v613_v48 = vsel %vm610_vm1, %v3627_v63, %v607_v41  ;;  %v617_v20 = vsel %vm610_vm1, %v607_v41, %v3627_v63 }
 0x199   : > { %v1052_v55 = vadd.f32 %v1051_v33, %v1050_v7  ;;  %1643 = vrot.lane.b32.xlu0 %v3669_v52, %s2945_s22  ;;  %v980_v17 = vmul.f32 0.35355338, %v947_v24  ;;  %v752_v26 = vrot.slane %v724_v9, 4  ;;  %v758_v53 = vrot.slane %v725_v16, 4  ;;  %1737 = vrot.lane.b32.xlu1 %v3599_v36, %s2947_s13  ;;  %v801_v27 = vpop.permute.xlu1 %800  ;;  %v3691_v42 = vpop.permute.xlu2 %709 }
 0x19a   : > { %v981_v21 = vmul.f32 0.35355338, %v953_v2  ;;  %v1047_v62 = vrot.slane %v1046_v50, 1  ;;  %v623_v49 = vmul.f32 %v617_v20, %v3122_v28  ;;  %v624_v34 = vmul.f32 %v613_v48, %v3124_v29  ;;  %v3695_v63 = vpop.permute.xlu0 %901 }
 0x19b   : > { %v1053_v7 = vrot.slane %v1052_v55, 1  ;;  %v3698_v41 = vadd.f32 %v3408_v12, %v980_v17  ;;  %v753_v33 = vadd.f32 %v752_v26, %v724_v9  ;;  %v759_v39 = vadd.f32 %v758_v53, %v725_v16 }
 0x19c   : > { %v3701_v0 = vadd.f32 %v3413_v58, %v981_v21  ;;  %v1048_v13 = vadd.f32 %v1047_v62, %v1046_v50  ;;  %v651_v2 = vrot.slane %v623_v49, 4  ;;  %v657_v46 = vrot.slane %v624_v34, 4 }
 0x19d   : > { %5165 = vst [vmem:[#allocation46_spill] sm:$0xff] %v3698_v41  ;;  %v1054_v24 = vadd.f32 %v1053_v7, %v1052_v55  ;;  %v1327_v20 = vmax.f32 %v1319_v57, %v3698_v41  ;;  %v754_v30 = vrot.slane %v753_v33, 2  ;;  %v760_v35 = vrot.slane %v759_v39, 2 }
 0x19e   : > { %5166 = vst [vmem:[#allocation47_spill] sm:$0xff] %v3701_v0  ;;  %v1328_v48 = vmax.f32 %v1320_v1, %v3701_v0  ;;  %v1081_v37 = vmul.f32 0.35355338, %v1048_v13  ;;  %v652_v44 = vadd.f32 %v651_v2, %v623_v49  ;;  %v658_v54 = vadd.f32 %v657_v46, %v624_v34 }
 0x19f   : > { %v1082_v17 = vmul.f32 0.35355338, %v1054_v24  ;;  %v755_v21 = vadd.f32 %v754_v30, %v753_v33  ;;  %v761_v6 = vadd.f32 %v760_v35, %v759_v39  ;;  %v815_v9 = vsel %vm812_vm4, %v801_v27, %v3543_v18  ;;  %1635 = vrot.lane.b32.xlu2 %v3703_v23, %s2945_s22 }
 0x1a0   : > { %v819_v16 = vsel %vm812_vm4, %v3543_v18, %v801_v27  ;;  %v3716_v1 = vadd.f32 %v3419_v14, %v1081_v37  ;;  %v653_v46 = vrot.slane %v652_v44, 2  ;;  %v659_v30 = vrot.slane %v658_v54, 2 }
 0x1a1   : > { %v3719_v57 = vadd.f32 %v3440_v15, %v1082_v17  ;;  %1683 = vrot.lane.b32.xlu0 %v3703_v23, %s2946_s23  ;;  %v756_v35 = vrot.slane %v755_v21, 1  ;;  %v762_v50 = vrot.slane %v761_v6, 1  ;;  %v825_v55 = vmul.f32 %v819_v16, %v3122_v28  ;;  %1691 = vrot.lane.b32.xlu1 %v3669_v52, %s2946_s23  ;;  %v3727_v26 = vpop.permute.xlu1 %909  ;;  %v3729_v37 = vpop.permute.xlu2 %810 }
 0x1a2   : > { %5168 = vst [vmem:[#allocation49_spill] sm:$0xff] %v3716_v1  ;;  %v826_v18 = vmul.f32 %v815_v9, %v3124_v29  ;;  %v1335_v53 = vmax.f32 %v1327_v20, %v3716_v1  ;;  %v654_v62 = vadd.f32 %v653_v46, %v652_v44  ;;  %v660_v7 = vadd.f32 %v659_v30, %v658_v54  ;;  %v1011_v49 = vpop.permute.xlu0 %1010 }
 0x1a3   : > { %5169 = vst [vmem:[#allocation50_spill] sm:$0xff] %v3719_v57  ;;  %v1336_v27 = vmax.f32 %v1328_v48, %v3719_v57  ;;  %v757_v34 = vadd.f32 %v756_v35, %v755_v21  ;;  %v763_v33 = vadd.f32 %v762_v50, %v761_v6  ;;  %v853_v39 = vrot.slane %v825_v55, 4 }
 0x1a4   : > { %v859_v13 = vrot.slane %v826_v18, 4  ;;  %v1343_v24 = vmax.f32 %v1335_v53, %v3632_v19  ;;  %v655_v17 = vrot.slane %v654_v62, 1  ;;  %v661_v9 = vrot.slane %v660_v7, 1 }
 0x1a5   : > { %v1344_v2 = vmax.f32 %v1336_v27, %v3635_v59  ;;  %v780_v16 = vmul.f32 0.35355338, %v757_v34  ;;  %v781_v0 = vmul.f32 0.35355338, %v763_v33  ;;  %v854_v41 = vadd.f32 %v853_v39, %v825_v55 }
 0x1a6   : > { %v860_v58 = vadd.f32 %v859_v13, %v826_v18  ;;  %v3736_v20 = vmax.f32 %v1343_v24, %v3664_v61  ;;  %v656_v44 = vadd.f32 %v655_v17, %v654_v62  ;;  %v662_v6 = vadd.f32 %v661_v9, %v660_v7 }
 0x1a7   : > { %v3739_v54 = vmax.f32 %v1344_v2, %v3667_v40  ;;  %v3742_v48 = vadd.f32 %v3324_v60, %v780_v16  ;;  %v3745_v21 = vadd.f32 %v3351_v51, %v781_v0  ;;  %v855_v46 = vrot.slane %v854_v41, 2  ;;  %1779 = vrot.lane.b32.xlu2 %v3703_v23, %s2948_s17 }
 0x1a8   : > { %v861_v30 = vrot.slane %v860_v58, 2  ;;  %v679_v35 = vmul.f32 0.35355338, %v656_v44  ;;  %v680_v50 = vmul.f32 0.35355338, %v662_v6  ;;  %v715_v55 = vsel %vm711_vm5, %v3657_v56, %v3691_v42 }
 0x1a9   : > { %5170 = vst [vmem:[#allocation51_spill] sm:$0xff] %v3742_v48  ;;  %v719_v18 = vsel %vm711_vm5, %v3691_v42, %v3657_v56  ;;  %1731 = vrot.lane.b32.xlu0 %v3703_v23, %s2947_s13  ;;  %v856_v0 = vadd.f32 %v855_v46, %v854_v41  ;;  %v727_v62 = vmul.f32 %v715_v55, %v3133_v32  ;;  %v1104_v7 = vpop.permute.xlu1 %1103  ;;  %v3763_v34 = vpop.permute.xlu2 %1004 }
 0x1aa   : > { %5171 = vst [vmem:[#allocation52_spill] sm:$0xff] %v3745_v21  ;;  %v862_v53 = vadd.f32 %v861_v30, %v860_v58  ;;  %v726_v27 = vmul.f32 %v719_v18, %v3131_v31  ;;  %1739 = vrot.lane.b32.xlu1 %v3669_v52, %s2947_s13  ;;  %v3766_v33 = vadd.f32 %v3275_v10, %v679_v35  ;;  %v3777_v41 = vpop.permute.xlu0 %1204  ;;  %s4957_s13 = scalar_lea.vmem [#allocation3], %s3061_s25  ;;  %s2674_s25 = sshll.u32 %s2594_s9, 4 }
 0x1ab   : > { %v3769_v56 = vadd.f32 %v3280_v11, %v680_v50  ;;  %v1017_v58 = vsel %vm1014_vm11, %v3585_v38, %v1011_v49  ;;  %v1021_v42 = vsel %vm1014_vm11, %v1011_v49, %v3585_v38  ;;  %v857_v39 = vrot.slane %v856_v0, 1  ;;  %s2512_s9 = scalar_lea.sflag [#allocation4], %s305_s24 }
 0x1ac   : > { %5172 = vst [vmem:[#allocation53_spill] sm:$0xff] %v3766_v33  ;;  %v863_v13 = vrot.slane %v862_v53, 1  ;;  %v764_v24 = vrot.slane %v726_v27, 4  ;;  %v770_v2 = vrot.slane %v727_v62, 4  ;;  %v1305_v17 = vmax.f32 %v3264_v4, %v3766_v33  ;;  %v5183_v33 = vld [vmem:[#allocation23_spill] sm:$0xff] }
 0x1ad   : > { %5173 = vst [vmem:[#allocation54_spill] sm:$0xff] %v3769_v56  ;;  %v1306_v9 = vmax.f32 %v3262_v3, %v3769_v56  ;;  %v1027_v16 = vmul.f32 %v1021_v42, %v3122_v28  ;;  %v1028_v44 = vmul.f32 %v1017_v58, %v3124_v29  ;;  %v858_v6 = vadd.f32 %v857_v39, %v856_v0 }
 0x1ae   : > { %v864_v46 = vadd.f32 %v863_v13, %v862_v53  ;;  %v765_v30 = vadd.f32 %v764_v24, %v726_v27  ;;  %v771_v38 = vadd.f32 %v770_v2, %v727_v62  ;;  %v3789_v35 = vmax.f32 %v1305_v17, %v3742_v48 }
 0x1af   : > { %v3786_v49 = vmax.f32 %v1306_v9, %v3745_v21  ;;  %v1055_v50 = vrot.slane %v1027_v16, 4  ;;  %v1061_v55 = vrot.slane %v1028_v44, 4  ;;  %v881_v18 = vmul.f32 0.35355338, %v858_v6  ;;  %1835 = vrot.lane.b32.xlu2 %v3669_v52, %s2949_s18 }
 0x1b0   : > { %v882_v40 = vmul.f32 0.35355338, %v864_v46  ;;  %v766_v61 = vrot.slane %v765_v30, 2  ;;  %v772_v59 = vrot.slane %v771_v38, 2  ;;  %v916_v53 = vsel %vm913_vm9, %v3695_v63, %v3727_v26 }
 0x1b1   : > { %v1056_v58 = vadd.f32 %v1055_v50, %v1027_v16  ;;  %v1062_v0 = vadd.f32 %v1061_v55, %v1028_v44  ;;  %v920_v27 = vsel %vm913_vm9, %v3727_v26, %v3695_v63  ;;  %1787 = vrot.lane.b32.xlu0 %v3669_v52, %s2948_s17  ;;  %v3804_v62 = vadd.f32 %v3307_v47, %v881_v18  ;;  %v1213_v24 = vpop.permute.xlu1 %1212  ;;  %v3811_v2 = vpop.permute.xlu2 %1113 }
 0x1b2   : > { %v3807_v42 = vadd.f32 %v3312_v43, %v882_v40  ;;  %v767_v39 = vadd.f32 %v766_v61, %v765_v30  ;;  %v773_v13 = vadd.f32 %v772_v59, %v771_v38  ;;  %1827 = vrot.lane.b32.xlu1 %v3703_v23, %s2949_s18  ;;  %v926_v63 = vmul.f32 %v920_v27, %v3122_v28  ;;  %v3815_v16 = vpop.permute.xlu0 %600 }
 0x1b3   : > { %5174 = vst [vmem:[#allocation55_spill] sm:$0xff] %v3804_v62  ;;  %v1057_v17 = vrot.slane %v1056_v58, 2  ;;  %v1063_v9 = vrot.slane %v1062_v0, 2  ;;  %v927_v26 = vmul.f32 %v916_v53, %v3124_v29  ;;  %v1118_v18 = vsel %vm1115_vm15, %v1104_v7, %v3625_v8 }
 0x1b4   : > { %5175 = vst [vmem:[#allocation56_spill] sm:$0xff] %v3807_v42  ;;  %v768_v61 = vrot.slane %v767_v39, 1  ;;  %v774_v44 = vrot.slane %v773_v13, 1  ;;  %v954_v30 = vrot.slane %v926_v63, 4  ;;  %v1122_v53 = vsel %vm1115_vm15, %v3625_v8, %v1104_v7 }
 0x1b5   : > { %v1058_v6 = vadd.f32 %v1057_v17, %v1056_v58  ;;  %v1064_v46 = vadd.f32 %v1063_v9, %v1062_v0  ;;  %v960_v38 = vrot.slane %v927_v26, 4  ;;  %v1128_v58 = vmul.f32 %v1122_v53, %v3122_v28 }
 0x1b6   : > { %v769_v50 = vadd.f32 %v768_v61, %v767_v39  ;;  %v775_v55 = vadd.f32 %v774_v44, %v773_v13  ;;  %v955_v19 = vadd.f32 %v954_v30, %v926_v63  ;;  %v1129_v0 = vmul.f32 %v1118_v18, %v3124_v29 }
 0x1b7   : > { %v1059_v27 = vrot.slane %v1058_v6, 1  ;;  %v1065_v40 = vrot.slane %v1064_v46, 1  ;;  %v961_v59 = vadd.f32 %v960_v38, %v927_v26  ;;  %1833 = vrot.lane.b32.xlu2 %v3599_v36, %s2949_s18  ;;  %v1156_v63 = vrot.slane %v1128_v58, 4 }
 0x1b8   : > { %v782_v57 = vmul.f32 0.35355338, %v769_v50  ;;  %v783_v1 = vmul.f32 0.35355338, %v775_v55  ;;  %v956_v17 = vrot.slane %v955_v19, 2  ;;  %v1162_v26 = vrot.slane %v1129_v0, 4 }
 0x1b9   : > { %v1060_v39 = vadd.f32 %v1059_v27, %v1058_v6  ;;  %v1066_v13 = vadd.f32 %v1065_v40, %v1064_v46  ;;  %v962_v9 = vrot.slane %v961_v59, 2  ;;  %1783 = vrot.lane.b32.xlu0 %v3525_v45, %s2948_s17  ;;  %v803_v61 = vpop.permute.xlu1 %802  ;;  %v3841_v44 = vpop.permute.xlu2 %1629  ;;  %v1157_v50 = vadd.f32 %v1156_v63, %v1128_v58 }
 0x1ba   : > { %v3834_v8 = vadd.f32 %v3324_v60, %v782_v57  ;;  %v3837_v7 = vadd.f32 %v3351_v51, %v783_v1  ;;  %1825 = vrot.lane.b32.xlu1 %v3597_v25, %s2949_s18  ;;  %v957_v46 = vadd.f32 %v956_v17, %v955_v19  ;;  %v3843_v38 = vpop.permute.xlu0 %608  ;;  %v1163_v60 = vadd.f32 %v1162_v26, %v1129_v0 }
 0x1bb   : > { %v1083_v40 = vmul.f32 0.35355338, %v1060_v39  ;;  %v1084_v6 = vmul.f32 0.35355338, %v1066_v13  ;;  %v963_v30 = vadd.f32 %v962_v9, %v961_v59  ;;  %v1219_v51 = vsel %vm1216_vm7, %v3777_v41, %v1213_v24 }
 0x1bc   : > { %v1223_v1 = vsel %vm1216_vm7, %v1213_v24, %v3777_v41  ;;  %v958_v19 = vrot.slane %v957_v46, 1  ;;  %v1158_v18 = vrot.slane %v1157_v50, 2  ;;  %v1164_v53 = vrot.slane %v1163_v60, 2 }
 0x1bd   : > { %v3852_v57 = vadd.f32 %v3419_v14, %v1083_v40  ;;  %v3855_v55 = vadd.f32 %v3440_v15, %v1084_v6  ;;  %v964_v59 = vrot.slane %v963_v30, 1  ;;  %v1229_v27 = vmul.f32 %v1223_v1, %v3122_v28 }
 0x1be   : > { %v1230_v58 = vmul.f32 %v1219_v51, %v3124_v29  ;;  %v959_v0 = vadd.f32 %v958_v19, %v957_v46  ;;  %v816_v41 = vsel %vm812_vm4, %v803_v61, %v3729_v37  ;;  %v820_v24 = vsel %vm812_vm4, %v3729_v37, %v803_v61  ;;  %v5179_v51 = vld [vmem:[#allocation19_spill] sm:$0xff] }
 0x1bf   : > { %5176 = vst [vmem:[#allocation57_spill] sm:$0xff] %v3852_v57  ;;  %v965_v39 = vadd.f32 %v964_v59, %v963_v30  ;;  %v1159_v13 = vadd.f32 %v1158_v18, %v1157_v50  ;;  %v1165_v17 = vadd.f32 %v1164_v53, %v1163_v60  ;;  %v1257_v9 = vrot.slane %v1229_v27, 4  ;;  %1773 = vrot.lane.b32.xlu2 %v3378_v5, %s2948_s17 }
 0x1c0   : > { %5177 = vst [vmem:[#allocation58_spill] sm:$0xff] %v3855_v55  ;;  %v1263_v63 = vrot.slane %v1230_v58, 4  ;;  %v982_v28 = vmul.f32 0.35355338, %v959_v0  ;;  %v827_v29 = vmul.f32 %v820_v24, %v3131_v31  ;;  %v828_v40 = vmul.f32 %v816_v41, %v3133_v32 }
 0x1c1   : > { %v983_v26 = vmul.f32 0.35355338, %v965_v39  ;;  %1875 = vrot.lane.b32.xlu0 %v3703_v23, %s2951_s20  ;;  %v1160_v6 = vrot.slane %v1159_v13, 1  ;;  %v1166_v46 = vrot.slane %v1165_v17, 1  ;;  %v1258_v30 = vadd.f32 %v1257_v9, %v1229_v27  ;;  %v912_v61 = vpop.permute.xlu1 %911  ;;  %v3873_v50 = vpop.permute.xlu2 %1685 }
 0x1c2   : > { %v1264_v37 = vadd.f32 %v1263_v63, %v1230_v58  ;;  %1883 = vrot.lane.b32.xlu1 %v3669_v52, %s2951_s20  ;;  %v3876_v60 = vadd.f32 %v3408_v12, %v982_v28  ;;  %v865_v19 = vrot.slane %v827_v29, 4  ;;  %v871_v59 = vrot.slane %v828_v40, 4  ;;  %v904_v18 = vpop.permute.xlu0 %903 }
 0x1c3   : > { %v3879_v1 = vadd.f32 %v5179_v51, %v983_v26  ;;  %v1161_v53 = vadd.f32 %v1160_v6, %v1159_v13  ;;  %v1167_v0 = vadd.f32 %v1166_v46, %v1165_v17  ;;  %v1259_v39 = vrot.slane %v1258_v30, 2 }
 0x1c4   : > { %5178 = vst [vmem:[#allocation59_spill] sm:$0xff] %v3876_v60  ;;  %v1265_v27 = vrot.slane %v1264_v37, 2  ;;  %v5181_v58 = vmax.f32 %v3789_v35, %v3804_v62  ;;  %v5182_v24 = vmax.f32 %v3786_v49, %v3807_v42  ;;  %v866_v63 = vadd.f32 %v865_v19, %v827_v29 }
 0x1c5   : > { %5180 = vst [vmem:[#allocation19_spill] sm:$0xff] %v3879_v1  ;;  %v872_v28 = vadd.f32 %v871_v59, %v828_v40  ;;  %v1184_v26 = vmul.f32 0.35355338, %v1161_v53  ;;  %v1185_v21 = vmul.f32 0.35355338, %v1167_v0  ;;  %v1260_v48 = vadd.f32 %v1259_v39, %v1258_v30  ;;  %v5188_v39 = vld [vmem:[#allocation25_spill] sm:$0xff] }
 0x1c6   : > { %v1329_v41 = vmax.f32 %v5181_v58, %v3876_v60  ;;  %v1330_v9 = vmax.f32 %v5182_v24, %v3879_v1  ;;  %v1266_v56 = vadd.f32 %v1265_v27, %v1264_v37  ;;  %v867_v6 = vrot.slane %v866_v63, 2  ;;  %v5185_v58 = vld [vmem:[#allocation24_spill] sm:$0xff] }
 0x1c7   : > { %v873_v46 = vrot.slane %v872_v28, 2  ;;  %v3892_v35 = vadd.f32 %v5183_v33, %v1184_v26  ;;  %v3895_v62 = vadd.f32 %v5185_v58, %v1185_v21  ;;  %v1261_v49 = vrot.slane %v1260_v48, 1  ;;  %1831 = vrot.lane.b32.xlu2 %v3525_v45, %s2949_s18  ;;  %v5187_v21 = vld [vmem:[#allocation20_spill] sm:$0xff] }
 0x1c8   : > { %v1338_v13 = vmax.f32 %v1330_v9, %v3855_v55  ;;  %v1337_v17 = vmax.f32 %v1329_v41, %v3852_v57  ;;  %v1267_v24 = vrot.slane %v1266_v56, 1  ;;  %v868_v29 = vadd.f32 %v867_v6, %v866_v63 }
 0x1c9   : > { %5184 = vst [vmem:[#allocation23_spill] sm:$0xff] %v3892_v35  ;;  %v874_v40 = vadd.f32 %v873_v46, %v872_v28  ;;  %v614_v30 = vsel %vm610_vm1, %v3815_v16, %v3843_v38  ;;  %v618_v37 = vsel %vm610_vm1, %v3843_v38, %v3815_v16  ;;  %1781 = vrot.lane.b32.xlu0 %v5187_v21, %s2948_s17  ;;  %v1106_v27 = vpop.permute.xlu1 %1105  ;;  %v3913_v41 = vpop.permute.xlu2 %1631 }
 0x1ca   : > { %5186 = vst [vmem:[#allocation24_spill] sm:$0xff] %v3895_v62  ;;  %v1345_v19 = vmax.f32 %v1337_v17, %v3892_v35  ;;  %v1346_v59 = vmax.f32 %v1338_v13, %v3895_v62  ;;  %v1262_v53 = vadd.f32 %v1261_v49, %v1260_v48  ;;  %v1268_v0 = vadd.f32 %v1267_v24, %v1266_v56  ;;  %v1013_v38 = vpop.permute.xlu0 %1012  ;;  %v5189_v24 = vld [vmem:[#allocation28_spill] sm:$0xff]  ;;  %v5191_v35 = vld [vmem:[#allocation29_spill] sm:$0xff] }
 0x1cb   : > { %1823 = vrot.lane.b32.xlu1 %v5188_v39, %s2949_s18  ;;  %v869_v9 = vrot.slane %v868_v29, 1  ;;  %v875_v63 = vrot.slane %v874_v40, 1  ;;  %v625_v28 = vmul.f32 %v618_v37, %v3131_v31  ;;  %v626_v16 = vmul.f32 %v614_v30, %v3133_v32 }
 0x1cc   : > { %v1285_v26 = vmul.f32 0.35355338, %v1262_v53  ;;  %v1286_v6 = vmul.f32 0.35355338, %v1268_v0  ;;  %v917_v13 = vsel %vm913_vm9, %v904_v18, %v912_v61  ;;  %v921_v48 = vsel %vm913_vm9, %v912_v61, %v904_v18 }
 0x1cd   : > { %v870_v56 = vadd.f32 %v869_v9, %v868_v29  ;;  %v876_v17 = vadd.f32 %v875_v63, %v874_v40  ;;  %v663_v46 = vrot.slane %v625_v28, 4  ;;  %v669_v49 = vrot.slane %v626_v16, 4 }
 0x1ce   : > { %v3922_v62 = vadd.f32 %v5189_v24, %v1285_v26  ;;  %v3925_v37 = vadd.f32 %v5191_v35, %v1286_v6  ;;  %v928_v30 = vmul.f32 %v921_v48, %v3131_v31  ;;  %v929_v53 = vmul.f32 %v917_v13, %v3133_v32 }
 0x1cf   : > { %v883_v0 = vmul.f32 0.35355338, %v870_v56  ;;  %v884_v55 = vmul.f32 0.35355338, %v876_v17  ;;  %v664_v57 = vadd.f32 %v663_v46, %v625_v28  ;;  %v670_v42 = vadd.f32 %v669_v49, %v626_v16  ;;  %1923 = vrot.lane.b32.xlu2 %v3703_v23, %s2950_s19 }
 0x1d0   : > { %5190 = vst [vmem:[#allocation20_spill] sm:$0xff] %v3922_v62  ;;  %v3930_v61 = vmax.f32 %v1345_v19, %v3922_v62  ;;  %v3933_v18 = vmax.f32 %v1346_v59, %v3925_v37  ;;  %v966_v29 = vrot.slane %v928_v30, 4  ;;  %v972_v40 = vrot.slane %v929_v53, 4 }
 0x1d1   : > { %5192 = vst [vmem:[#allocation25_spill] sm:$0xff] %v3925_v37  ;;  %v3938_v9 = vadd.f32 %v3307_v47, %v883_v0  ;;  %v3941_v63 = vadd.f32 %v3312_v43, %v884_v55  ;;  %v665_v26 = vrot.slane %v664_v57, 2  ;;  %v671_v28 = vrot.slane %v670_v42, 2  ;;  %1873 = vrot.lane.b32.xlu0 %v3597_v25, %s2951_s20  ;;  %v3953_v47 = vpop.permute.xlu1 %1214  ;;  %v3955_v43 = vpop.permute.xlu2 %1687 }
 0x1d2   : > { %v967_v19 = vadd.f32 %v966_v29, %v928_v30  ;;  %v973_v16 = vadd.f32 %v972_v40, %v929_v53  ;;  %v1119_v59 = vsel %vm1115_vm15, %v1106_v27, %v3811_v2  ;;  %v1123_v6 = vsel %vm1115_vm15, %v3811_v2, %v1106_v27  ;;  %v1207_v17 = vpop.permute.xlu0 %1206 }
 0x1d3   : > { %1881 = vrot.lane.b32.xlu1 %v3599_v36, %s2951_s20  ;;  %v666_v55 = vadd.f32 %v665_v26, %v664_v57  ;;  %v672_v13 = vadd.f32 %v671_v28, %v670_v42  ;;  %v1130_v48 = vmul.f32 %v1123_v6, %v3131_v31  ;;  %v1131_v56 = vmul.f32 %v1119_v59, %v3133_v32 }
 0x1d4   : > { %v968_v46 = vrot.slane %v967_v19, 2  ;;  %v974_v49 = vrot.slane %v973_v16, 2  ;;  %v1018_v2 = vsel %vm1014_vm11, %v3763_v34, %v1013_v38  ;;  %v1022_v27 = vsel %vm1014_vm11, %v1013_v38, %v3763_v34 }
 0x1d5   : > { %v667_v30 = vrot.slane %v666_v55, 1  ;;  %v673_v53 = vrot.slane %v672_v13, 1  ;;  %v1168_v0 = vrot.slane %v1130_v48, 4  ;;  %v1174_v57 = vrot.slane %v1131_v56, 4 }
 0x1d6   : > { %v969_v42 = vadd.f32 %v968_v46, %v967_v19  ;;  %v975_v29 = vadd.f32 %v974_v49, %v973_v16  ;;  %v1029_v40 = vmul.f32 %v1022_v27, %v3131_v31  ;;  %v1030_v26 = vmul.f32 %v1018_v2, %v3133_v32 }
 0x1d7   : > { %v668_v28 = vadd.f32 %v667_v30, %v666_v55  ;;  %v674_v59 = vadd.f32 %v673_v53, %v672_v13  ;;  %v1169_v6 = vadd.f32 %v1168_v0, %v1130_v48  ;;  %v1175_v37 = vadd.f32 %v1174_v57, %v1131_v56  ;;  %1829 = vrot.lane.b32.xlu2 %v5187_v21, %s2949_s18  ;;  %v5194_v0 = vld [vmem:[#allocation18_spill] sm:$0xff] }
 0x1d8   : > { %v970_v62 = vrot.slane %v969_v42, 1  ;;  %v976_v23 = vrot.slane %v975_v29, 1  ;;  %v1067_v1 = vrot.slane %v1029_v40, 4  ;;  %v1073_v60 = vrot.slane %v1030_v26, 4 }
 0x1d9   : > { %v681_v34 = vmul.f32 0.35355338, %v668_v28  ;;  %v682_v38 = vmul.f32 0.35355338, %v674_v59  ;;  %v1170_v3 = vrot.slane %v1169_v6, 2  ;;  %v1176_v19 = vrot.slane %v1175_v37, 2  ;;  %1931 = vrot.lane.b32.xlu0 %v3669_v52, %s2950_s19  ;;  %v3973_v48 = vpop.permute.xlu1 %1677  ;;  %v3975_v56 = vpop.permute.xlu2 %1775 }
 0x1da   : > { %v971_v16 = vadd.f32 %v970_v62, %v969_v42  ;;  %v977_v46 = vadd.f32 %v976_v23, %v975_v29  ;;  %v1068_v55 = vadd.f32 %v1067_v1, %v1029_v40  ;;  %v1074_v13 = vadd.f32 %v1073_v60, %v1030_v26  ;;  %5193 = vst [vmem:[#allocation28_spill] sm:$0xff] %v3975_v56  ;;  %v1638_v53 = vpop.permute.xlu0 %1637  ;;  %v5195_v42 = vld [vmem:[#allocation11_spill] sm:$0xff] }
 0x1db   : > { %1821 = vrot.lane.b32.xlu1 %v3378_v5, %s2949_s18  ;;  %v3978_v49 = vadd.f32 %v3275_v10, %v681_v34  ;;  %v3981_v2 = vadd.f32 %v3280_v11, %v682_v38  ;;  %v1171_v27 = vadd.f32 %v1170_v3, %v1169_v6  ;;  %v1177_v30 = vadd.f32 %v1176_v19, %v1175_v37 }
 0x1dc   : > { %v984_v62 = vmul.f32 0.35355338, %v971_v16  ;;  %v985_v23 = vmul.f32 0.35355338, %v977_v46  ;;  %v1069_v1 = vrot.slane %v1068_v55, 2  ;;  %v1075_v60 = vrot.slane %v1074_v13, 2 }
 0x1dd   : > { %v1307_v57 = vmax.f32 %v5194_v0, %v3978_v49  ;;  %v1308_v29 = vmax.f32 %v5195_v42, %v3981_v2  ;;  %v1172_v40 = vrot.slane %v1171_v27, 1  ;;  %v1178_v26 = vrot.slane %v1177_v30, 1 }
 0x1de   : > { %v3988_v10 = vadd.f32 %v3408_v12, %v984_v62  ;;  %v3991_v11 = vadd.f32 %v5179_v51, %v985_v23  ;;  %v1070_v3 = vadd.f32 %v1069_v1, %v1068_v55  ;;  %v1076_v37 = vadd.f32 %v1075_v60, %v1074_v13 }
 0x1df   : > { %v1315_v28 = vmax.f32 %v1307_v57, %v3834_v8  ;;  %v1316_v59 = vmax.f32 %v1308_v29, %v3837_v7  ;;  %v1173_v6 = vadd.f32 %v1172_v40, %v1171_v27  ;;  %v1179_v34 = vadd.f32 %v1178_v26, %v1177_v30  ;;  %1921 = vrot.lane.b32.xlu2 %v3597_v25, %s2950_s19 }
 0x1e0   : > { %v1071_v38 = vrot.slane %v1070_v3, 1  ;;  %v1077_v19 = vrot.slane %v1076_v37, 1  ;;  %v1220_v16 = vsel %vm1216_vm7, %v1207_v17, %v3953_v47  ;;  %v1224_v12 = vsel %vm1216_vm7, %v3953_v47, %v1207_v17 }
 0x1e1   : > { %v1324_v51 = vmax.f32 %v1316_v59, %v3941_v63  ;;  %v1323_v46 = vmax.f32 %v1315_v28, %v3938_v9  ;;  %v1186_v55 = vmul.f32 0.35355338, %v1173_v6  ;;  %v1187_v13 = vmul.f32 0.35355338, %v1179_v34  ;;  %1871 = vrot.lane.b32.xlu0 %v5188_v39, %s2951_s20  ;;  %v1734_v47 = vpop.permute.xlu1 %1733  ;;  %v5198_v28 = vld [vmem:[#allocation36_spill] sm:$0xff]  ;;  %v5200_v34 = vld [vmem:[#allocation6_spill] sm:$0xff] }
 0x1e2   : > { %v1072_v27 = vadd.f32 %v1071_v38, %v1070_v3  ;;  %v1078_v30 = vadd.f32 %v1077_v19, %v1076_v37  ;;  %v1231_v62 = vmul.f32 %v1224_v12, %v3131_v31  ;;  %v1232_v23 = vmul.f32 %v1220_v16, %v3133_v32  ;;  %v1726_v29 = vpop.permute.xlu0 %1725  ;;  %v4019_v32 = vpop.permute.xlu2 %1641  ;;  %v5197_v37 = vld [vmem:[#allocation7_spill] sm:$0xff]  ;;  %v5201_v38 = vld [vmem:[#allocation37_spill] sm:$0xff] }
 0x1e3   : > { %1879 = vrot.lane.b32.xlu1 %v3525_v45, %s2951_s20  ;;  %v1331_v17 = vmax.f32 %v1323_v46, %v3988_v10  ;;  %v1332_v1 = vmax.f32 %v1324_v51, %v3991_v11  ;;  %v4014_v60 = vadd.f32 %v5183_v33, %v1186_v55  ;;  %v4017_v57 = vadd.f32 %v5185_v58, %v1187_v13  ;;  %v5203_v33 = vld [vmem:[#allocation12_spill] sm:$0xff]  ;;  %v5204_v58 = vld [vmem:[#allocation13_spill] sm:$0xff] }
 0x1e4   : > { %v1085_v40 = vmul.f32 0.35355338, %v1072_v27  ;;  %v1086_v26 = vmul.f32 0.35355338, %v1078_v30  ;;  %v1269_v31 = vrot.slane %v1231_v62, 4  ;;  %v1275_v3 = vrot.slane %v1232_v23, 4 }
 0x1e5   : > { %5196 = vst [vmem:[#allocation29_spill] sm:$0xff] %v4017_v57  ;;  %v5199_v59 = vsub.f32 %v5197_v37, %v5198_v28  ;;  %v5202_v19 = vsub.f32 %v5200_v34, %v5201_v38  ;;  %v1381_v12 = vsub.f32 %v5203_v33, %v5198_v28  ;;  %v1382_v51 = vsub.f32 %v5204_v58, %v5201_v38 }
 0x1e6   : > { %v4032_v46 = vadd.f32 %v3419_v14, %v1085_v40  ;;  %v4035_v55 = vadd.f32 %v3440_v15, %v1086_v26  ;;  %v1270_v13 = vadd.f32 %v1269_v31, %v1231_v62  ;;  %v1276_v27 = vadd.f32 %v1275_v3, %v1232_v23  ;;  %v5205_v62 = vld [vmem:[#allocation14_spill] sm:$0xff]  ;;  %v5206_v40 = vld [vmem:[#allocation15_spill] sm:$0xff] }
 0x1e7   : > { %v1365_v6 = vmul.f32 1.442695, %v5199_v59  ;;  %v1367_v16 = vmul.f32 1.442695, %v5202_v19  ;;  %v1389_v30 = vmul.f32 1.442695, %v1381_v12  ;;  %v4040_v59 = vsel %vm610_vm1, %v3841_v44, %v1638_v53  ;;  %1877 = vrot.lane.b32.xlu2 %v5187_v21, %s2951_s20 }
 0x1e8   : > { %v1391_v37 = vmul.f32 1.442695, %v1382_v51  ;;  %v1339_v34 = vmax.f32 %v1331_v17, %v4032_v46  ;;  %v1340_v19 = vmax.f32 %v1332_v1, %v4035_v55  ;;  %v1271_v33 = vrot.slane %v1270_v13, 2 }
 0x1e9   : > { %2729 = vpow2.f32 %v1365_v6  ;;  %v1277_v14 = vrot.slane %v1276_v27, 2  ;;  %v1649_v15 = vsel %vm610_vm1, %v1638_v53, %v3841_v44  ;;  %v1405_v23 = vsub.f32 %v5205_v62, %v5198_v28  ;;  %1929 = vrot.lane.b32.xlu0 %v3599_v36, %s2950_s19  ;;  %v4059_v6 = vpop.permute.xlu1 %1679 }
 0x1ea   : > { %2731 = vpow2.f32 %v1367_v16  ;;  %v1406_v26 = vsub.f32 %v5206_v40, %v5201_v38  ;;  %v1348_v17 = vmax.f32 %v1340_v19, %v4017_v57  ;;  %v1272_v1 = vadd.f32 %v1271_v33, %v1270_v13  ;;  %v5209_v19 = vld [vmem:[#allocation17_spill] sm:$0xff]  ;;  %v4082_v40 = vpop.permute.xlu2 %1689 }
 0x1eb   : > { %v1278_v31 = vadd.f32 %v1277_v14, %v1276_v27  ;;  %v1347_v3 = vmax.f32 %v1339_v34, %v4014_v60  ;;  %1869 = vrot.lane.b32.xlu1 %v3378_v5, %s2951_s20  ;;  %2733 = vpow2.f32 %v1389_v30  ;;  %v1413_v44 = vmul.f32 1.442695, %v1405_v23  ;;  %v4065_v12 = vpop.permute.xlu0 %1639  ;;  %v5208_v30 = vld [vmem:[#allocation16_spill] sm:$0xff]  ;;  %s2524_s20 = sshll.u32 %s4957_s13, 4  ;;  %s2525_s20 = int_to_ptr.vmem [resolvable:$true] %s2524_s20 }
 0x1ec   : > { %v1415_v53 = vmul.f32 1.442695, %v1406_v26  ;;  %v1693_v16 = vsel %vm711_vm5, %v3973_v48, %v3873_v50  ;;  %v1273_v58 = vrot.slane %v1272_v1, 1  ;;  %2735 = vpow2.f32 %v1391_v37 }
 0x1ed   : > { %v1279_v51 = vrot.slane %v1278_v31, 1  ;;  %v1697_v13 = vsel %vm711_vm5, %v3873_v50, %v3973_v48  ;;  %2737 = vpow2.f32 %v1413_v44  ;;  %v1429_v34 = vsub.f32 %v5208_v30, %v5198_v28  ;;  %v5211_v30 = vld [vmem:[#allocation9_spill] sm:$0xff] }
 0x1ee   : > { %v1430_v33 = vsub.f32 %v5209_v19, %v5201_v38  ;;  %v4079_v14 = vsel %vm812_vm4, %v1726_v29, %v1734_v47  ;;  %v1274_v62 = vadd.f32 %v1273_v58, %v1272_v1  ;;  %2739 = vpow2.f32 %v1415_v53  ;;  %v5213_v58 = vld [vmem:[#allocation8_spill] sm:$0xff] }
 0x1ef   : > { %v4071_v27 = vpop.eup %2729  ;;  %v1280_v37 = vadd.f32 %v1279_v51, %v1278_v31  ;;  %v1437_v48 = vmul.f32 1.442695, %v1429_v34  ;;  %v1745_v44 = vsel %vm812_vm4, %v1734_v47, %v1726_v29  ;;  %v1359_v19 = vsub.f32 %v5211_v30, %v3736_v20  ;;  %1917 = vrot.lane.b32.xlu2 %v3378_v5, %s2950_s19  ;;  %v5214_v47 = vld [vmem:[#allocation38_spill] sm:$0xff] }
 0x1f0   : > { %5207 = vst [vmem:[#allocation18_spill] sm:$0xff] %v4071_v27  ;;  %v1613_v23 = vperm.slane %v4071_v27, 0  ;;  %v4084_v50 = vpop.eup %2731  ;;  %v1439_v26 = vmul.f32 1.442695, %v1430_v33  ;;  %v1287_v38 = vmul.f32 0.35355338, %v1274_v62  ;;  %v1360_v51 = vsub.f32 %v5213_v58, %v3739_v54 }
 0x1f1   : > { %5210 = vst [vmem:[#allocation11_spill] sm:$0xff] %v4084_v50  ;;  %v1288_v28 = vmul.f32 0.35355338, %v1280_v37  ;;  %v1614_v1 = vperm.slane %v4084_v50, 0  ;;  %v4094_v53 = vpop.eup %2733  ;;  %2741 = vpow2.f32 %v1437_v48  ;;  %v1369_v34 = vmul.f32 1.442695, %v1359_v19  ;;  %1919 = vrot.lane.b32.xlu0 %v5188_v39, %s2950_s19  ;;  %v1736_v48 = vpop.permute.xlu1 %1735 }
 0x1f2   : > { %v1621_v31 = vmul.f32 %v1613_v23, %v3378_v5  ;;  %5212 = vst [vmem:[#allocation7_spill] sm:$0xff] %v4094_v53  ;;  %v1383_v29 = vsub.f32 %v5214_v47, %v3736_v20  ;;  %v4102_v33 = vpop.eup %2735  ;;  %v4105_v62 = vadd.f32 %v5189_v24, %v1287_v38  ;;  %v1653_v23 = vperm.slane %v4094_v53, 0  ;;  %v5218_v24 = vld [vmem:[#allocation39_spill] sm:$0xff] }
 0x1f3   : > { %5215 = vst [vmem:[#allocation6_spill] sm:$0xff] %v4102_v33  ;;  %v4108_v5 = vadd.f32 %v5191_v35, %v1288_v28  ;;  %v1622_v37 = vmul.f32 %v1614_v1, %v5187_v21  ;;  %1927 = vrot.lane.b32.xlu1 %v3525_v45, %s2950_s19  ;;  %v4114_v30 = vpop.eup %2737  ;;  %v1654_v19 = vperm.slane %v4102_v33, 0  ;;  %2743 = vpow2.f32 %v1439_v26  ;;  %v1728_v47 = vpop.permute.xlu0 %1727 }
 0x1f4   : > { %5216 = vst [vmem:[#allocation12_spill] sm:$0xff] %v4105_v62  ;;  %v1371_v58 = vmul.f32 1.442695, %v1360_v51  ;;  %v1384_v38 = vsub.f32 %v5218_v24, %v3739_v54  ;;  %v4119_v35 = vpop.eup %2739  ;;  %v4122_v28 = vmax.f32 %v1347_v3, %v4105_v62  ;;  %v1661_v50 = vmul.f32 %v1653_v23, %v1649_v15 }
 0x1f5   : > { %5217 = vst [vmem:[#allocation13_spill] sm:$0xff] %v4114_v30  ;;  %v4125_v1 = vmax.f32 %v1348_v17, %v4108_v5  ;;  %v1701_v53 = vperm.slane %v4114_v30, 0  ;;  %v1662_v27 = vmul.f32 %v1654_v19, %v4040_v59  ;;  %v1702_v26 = vperm.slane %v4119_v35, 0 }
 0x1f6   : > { %5219 = vst [vmem:[#allocation14_spill] sm:$0xff] %v4119_v35  ;;  %2745 = vpow2.f32 %v1369_v34  ;;  %v1393_v51 = vmul.f32 1.442695, %v1383_v29  ;;  %v1669_v33 = vadd.f32 %v1661_v50, %v1621_v31  ;;  %v1395_v56 = vmul.f32 1.442695, %v1384_v38  ;;  %v4141_v50 = vpop.permute.xlu2 %1777  ;;  %v5223_v34 = vld [vmem:[#allocation43_spill] sm:$0xff] }
 0x1f7   : > { %v1709_v24 = vmul.f32 %v1701_v53, %v1697_v13  ;;  %2747 = vpow2.f32 %v1371_v58  ;;  %v4130_v57 = vpop.eup %2741  ;;  %v1670_v3 = vadd.f32 %v1662_v27, %v1622_v37  ;;  %v1710_v62 = vmul.f32 %v1702_v26, %v1693_v16  ;;  %v5222_v27 = vld [vmem:[#allocation42_spill] sm:$0xff]  ;;  %v5226_v26 = vld [vmem:[#allocation35_spill] sm:$0xff] }
 0x1f8   : > { %5220 = vst [vmem:[#allocation15_spill] sm:$0xff] %v4130_v57  ;;  %2749 = vpow2.f32 %v1393_v51  ;;  %v1646_v15 = vsel %vm610_vm1, %v3913_v41, %v4065_v12  ;;  %v1749_v59 = vperm.slane %v4130_v57, 0  ;;  %v1650_v13 = vsel %vm610_vm1, %v4065_v12, %v3913_v41  ;;  %v5239_v57 = vld [vmem:[#allocation51_spill] sm:$0xff] }
 0x1f9   : > { %v1717_v17 = vadd.f32 %v1709_v24, %v1669_v33  ;;  %2751 = vpow2.f32 %v1395_v56  ;;  %v4143_v31 = vpop.eup %2743  ;;  %v1718_v16 = vadd.f32 %v1710_v62, %v1670_v3  ;;  %v1407_v53 = vsub.f32 %v5222_v27, %v3736_v20  ;;  %1925 = vrot.lane.b32.xlu0 %v5187_v21, %s2950_s19  ;;  %v5224_v62 = vld [vmem:[#allocation34_spill] sm:$0xff]  ;;  %v1634_v23 = vpop.permute.xlu1 %1633  ;;  %s2523_s19 = scalar_lea.hbm %s5018_s8, %s2674_s25 }
 0x1fa   : > { %5221 = vst [vmem:[#allocation16_spill] sm:$0xff] %v4143_v31  ;;  %v1408_v29 = vsub.f32 %v5223_v34, %v3739_v54  ;;  %v4153_v56 = vsel %vm711_vm5, %v4059_v6, %v3955_v43  ;;  %v1750_v41 = vperm.slane %v4143_v31, 0  ;;  %v1757_v12 = vmul.f32 %v1749_v59, %v1745_v44  ;;  %s2526_s10 = sshll.u32 %s2523_s19, 4  ;;  %s2527_s10 = int_to_ptr.hbm [resolvable:$true] %s2526_s10 }
 0x1fb   : > { %v1698_v33 = vsel %vm711_vm5, %v3955_v43, %v4059_v6  ;;  %v1431_v37 = vsub.f32 %v5224_v62, %v3736_v20  ;;  %v1417_v58 = vmul.f32 1.442695, %v1407_v53  ;;  %v1432_v51 = vsub.f32 %v5226_v26, %v3739_v54  ;;  %v4172_v44 = vpop.permute.xlu0 %1729  ;;  %s2895_s12 = sshra.s32 %s2527_s10, 4  ;;  %s2896_s12 = int_to_ptr.hbm [resolvable:$true] %s2895_s12 }
 0x1fc   : > { %v4164_v19 = vpop.eup %2745  ;;  %v1419_v38 = vmul.f32 1.442695, %v1408_v29  ;;  %v4170_v21 = vsel %vm812_vm4, %v1728_v47, %v1736_v48  ;;  %v1758_v43 = vmul.f32 %v1750_v41, %v4079_v14  ;;  %v4177_v6 = vadd.f32 %v1757_v12, %v1717_v17  ;;  %s2897_s21 = scalar_lea.hbm %s2896_s12, 64  ;;  %p2902_p2 = scmp.lt.s32.totalorder %s2896_s12, %s5018_s8 }
 0x1fd   : > { %5225 = vst [vmem:[#allocation17_spill] sm:$0xff] %v4164_v19  ;;  %v4174_v24 = vpop.eup %2747  ;;  %v1615_v3 = vperm.slane %v4164_v19, 0  ;;  %v1441_v59 = vmul.f32 1.442695, %v1431_v37  ;;  %2753 = vpow2.f32 %v1417_v58  ;;  %v1443_v34 = vmul.f32 1.442695, %v1432_v51  ;;  %p2898_p13 = scmp.ne.s32.totalorder %s2896_s12, %s2897_s21 }
 0x1fe   : > { %5227 = vst [vmem:[#allocation9_spill] sm:$0xff] %v4174_v24  ;;  %v4180_v27 = vpop.eup %2749  ;;  %v1616_v53 = vperm.slane %v4174_v24, 0  ;;  %v1746_v29 = vsel %vm812_vm4, %v1736_v48, %v1728_v47  ;;  %v4187_v26 = vadd.f32 %v1758_v43, %v1718_v16  ;;  %2755 = vpow2.f32 %v1419_v38  ;;  %v5230_v48 = vld [vmem:[#allocation10_spill] sm:$0xff]  ;;  %v5231_v16 = vld [vmem:[#allocation53_spill] sm:$0xff] }
 0x1ff   : > { %5228 = vst [vmem:[#allocation8_spill] sm:$0xff] %v4180_v27  ;;  %v4185_v62 = vpop.eup %2751  ;;  %v1655_v14 = vperm.slane %v4180_v27, 0  ;;  %v1623_v17 = vmul.f32 %v1615_v3, %v5188_v39  ;;  %2757 = vpow2.f32 %v1441_v59  ;;  %v1361_v37 = vsub.f32 %v3264_v4, %v3930_v61  ;;  %v5232_v39 = vld [vmem:[#allocation54_spill] sm:$0xff]  ;;  %p2899_p0 = pnand %p2898_p13, %p3040_p6 }
 0x200   : > { %5229 = vst [vmem:[#allocation38_spill] sm:$0xff] %v4185_v62  ;;  %v1624_v41 = vmul.f32 %v1616_v53, %v3525_v45  ;;  %v1656_v12 = vperm.slane %v4185_v62, 0  ;;  %2759 = vpow2.f32 %v1443_v34  ;;  %v1362_v47 = vsub.f32 %v5230_v48, %v3933_v18  ;;  %v4209_v53 = vpop.permute.xlu2 %1635 }
 0x201   : > { %v1663_v58 = vmul.f32 %v1655_v14, %v1650_v13  ;;  %v1385_v51 = vsub.f32 %v5231_v16, %v3930_v61  ;;  %v1373_v31 = vmul.f32 1.442695, %v1361_v37  ;;  %v1386_v38 = vsub.f32 %v5232_v39, %v3933_v18  ;;  %v1682_v34 = vpop.permute.xlu1 %1681  ;;  %v5234_v37 = vld [vmem:[#allocation59_spill] sm:$0xff]  ;;  %p2900_p1 = pneg %p2899_p0 }
 0x202   : > { %v1664_v43 = vmul.f32 %v1656_v12, %v1646_v15  ;;  %v4204_v45 = vsel %vm610_vm1, %v1634_v23, %v4019_v32  ;;  %v1375_v4 = vmul.f32 1.442695, %v1362_v47  ;;  %v1651_v59 = vsel %vm610_vm1, %v4019_v32, %v1634_v23 }
 0x203   : > { %v1671_v3 = vadd.f32 %v1663_v58, %v1623_v17  ;;  %v1397_v13 = vmul.f32 1.442695, %v1385_v51  ;;  %v4211_v15 = vpop.eup %2753  ;;  %2761 = vpow2.f32 %v1373_v31  ;;  %v1399_v12 = vmul.f32 1.442695, %v1386_v38  ;;  %v1786_v16 = vpop.permute.xlu0 %1785  ;;  %v5236_v58 = vld [vmem:[#allocation19_spill] sm:$0xff] }
 0x204   : > { %5233 = vst [vmem:[#allocation39_spill] sm:$0xff] %v4211_v15  ;;  %v1672_v14 = vadd.f32 %v1664_v43, %v1624_v41  ;;  %v1457_v48 = vsub.f32 %v5234_v37, %v3930_v61  ;;  %v4215_v39 = vpop.eup %2755  ;;  %v1703_v17 = vperm.slane %v4211_v15, 0  ;;  %2763 = vpow2.f32 %v1375_v4 }
 0x205   : > { %5235 = vst [vmem:[#allocation42_spill] sm:$0xff] %v4215_v39  ;;  %v1458_v32 = vsub.f32 %v5236_v58, %v3933_v18  ;;  %v1791_v23 = vsel %vm913_vm9, %v4141_v50, %v1786_v16  ;;  %v4223_v47 = vpop.eup %2757  ;;  %v1704_v31 = vperm.slane %v4215_v39, 0  ;;  %2765 = vpow2.f32 %v1397_v13 }
 0x206   : > { %5237 = vst [vmem:[#allocation43_spill] sm:$0xff] %v4223_v47  ;;  %v1469_v41 = vmul.f32 1.442695, %v1457_v48  ;;  %v1795_v51 = vsel %vm913_vm9, %v1786_v16, %v4141_v50  ;;  %v4229_v43 = vpop.eup %2759  ;;  %v1711_v38 = vmul.f32 %v1703_v17, %v1698_v33  ;;  %v1751_v4 = vperm.slane %v4223_v47, 0  ;;  %v5240_v50 = vld [vmem:[#allocation52_spill] sm:$0xff] }
 0x207   : > { %5238 = vst [vmem:[#allocation34_spill] sm:$0xff] %v4229_v43  ;;  %2767 = vpow2.f32 %v1399_v12  ;;  %v1471_v37 = vmul.f32 1.442695, %v1458_v32  ;;  %v1712_v58 = vmul.f32 %v1704_v31, %v4153_v56  ;;  %v1752_v35 = vperm.slane %v4229_v43, 0  ;;  %v5246_v47 = vld [vmem:[#allocation48_spill] sm:$0xff] }
 0x208   : > { %2769 = vpow2.f32 %v1469_v41  ;;  %v1409_v13 = vsub.f32 %v5239_v57, %v3930_v61  ;;  %v1719_v48 = vadd.f32 %v1711_v38, %v1671_v3  ;;  %v1759_v30 = vmul.f32 %v1751_v4, %v1746_v29 }
 0x209   : > { %2771 = vpow2.f32 %v1471_v37  ;;  %v1410_v16 = vsub.f32 %v5240_v50, %v3933_v18  ;;  %v4238_v39 = vpop.eup %2761  ;;  %v1720_v33 = vadd.f32 %v1712_v58, %v1672_v14  ;;  %v1760_v12 = vmul.f32 %v1752_v35, %v4170_v21  ;;  %v4263_v58 = vpop.permute.xlu2 %1779 }
 0x20a   : > { %v1421_v17 = vmul.f32 1.442695, %v1409_v13  ;;  %v1695_v56 = vsel %vm711_vm5, %v1682_v34, %v4082_v40  ;;  %v4244_v32 = vpop.eup %2763  ;;  %v4246_v31 = vadd.f32 %v1759_v30, %v1719_v48  ;;  %v1617_v57 = vperm.slane %v4238_v39, 0 }
 0x20b   : > { %v1423_v29 = vmul.f32 1.442695, %v1410_v16  ;;  %v1699_v3 = vsel %vm711_vm5, %v4082_v40, %v1682_v34  ;;  %v4252_v41 = vpop.eup %2765  ;;  %v4254_v14 = vadd.f32 %v1760_v12, %v1720_v33  ;;  %v1618_v35 = vperm.slane %v4244_v32, 0  ;;  %v1644_v38 = vpop.permute.xlu0 %1643 }
 0x20c   : > { %2773 = vpow2.f32 %v1421_v17  ;;  %v1363_v21 = vsub.f32 %v5194_v0, %v4122_v28  ;;  %v1657_v4 = vperm.slane %v4252_v41, 0  ;;  %v1625_v37 = vmul.f32 %v1617_v57, %v3597_v25  ;;  %v1738_v34 = vpop.permute.xlu1 %1737 }
 0x20d   : > { %v4259_v30 = vpop.eup %2767  ;;  %2775 = vpow2.f32 %v1423_v29  ;;  %v1364_v40 = vsub.f32 %v5195_v42, %v4125_v1  ;;  %v1626_v48 = vmul.f32 %v1618_v35, %v3599_v36  ;;  %v1387_v16 = vsub.f32 %v3978_v49, %v4122_v28 }
 0x20e   : > { %v4267_v13 = vpop.eup %2769  ;;  %v1658_v0 = vperm.slane %v4259_v30, 0  ;;  %v1377_v50 = vmul.f32 1.442695, %v1363_v21  ;;  %v1665_v25 = vmul.f32 %v1657_v4, %v1651_v59  ;;  %v1388_v42 = vsub.f32 %v3981_v2, %v4125_v1 }
 0x20f   : > { %5241 = vst [vmem:[#allocation35_spill] sm:$0xff] %v4267_v13  ;;  %v4273_v33 = vpop.eup %2771  ;;  %v1801_v12 = vperm.slane %v4267_v13, 0  ;;  %v1379_v17 = vmul.f32 1.442695, %v1364_v40  ;;  %v1401_v36 = vmul.f32 1.442695, %v1387_v16  ;;  %v1747_v16 = vsel %vm812_vm4, %v1738_v34, %v4172_v44 }
 0x210   : > { %5242 = vst [vmem:[#allocation10_spill] sm:$0xff] %v4273_v33  ;;  %v1666_v57 = vmul.f32 %v1658_v0, %v4204_v45  ;;  %v1802_v29 = vperm.slane %v4273_v33, 0  ;;  %2777 = vpow2.f32 %v1377_v50  ;;  %v1673_v35 = vadd.f32 %v1665_v25, %v1625_v37  ;;  %v5245_v50 = vld [vmem:[#allocation56_spill] sm:$0xff]  ;;  %v5263_v33 = vld [vmem:[#allocation23_spill] sm:$0xff] }
 0x211   : > { %v4280_v21 = vmul.f32 %v1801_v12, %v1795_v51  ;;  %2779 = vpow2.f32 %v1379_v17  ;;  %v1403_v49 = vmul.f32 1.442695, %v1388_v42  ;;  %v1648_v45 = vsel %vm610_vm1, %v4209_v53, %v1644_v38  ;;  %v5244_v51 = vld [vmem:[#allocation55_spill] sm:$0xff] }
 0x212   : > { %v4282_v43 = vpop.eup %2773  ;;  %v1674_v59 = vadd.f32 %v1666_v57, %v1626_v48  ;;  %v4284_v4 = vmul.f32 %v1802_v29, %v1791_v23  ;;  %2781 = vpow2.f32 %v1401_v36  ;;  %v1433_v37 = vsub.f32 %v5244_v51, %v3930_v61 }
 0x213   : > { %v4286_v40 = vpop.eup %2775  ;;  %v1705_v2 = vperm.slane %v4282_v43, 0  ;;  %2783 = vpow2.f32 %v1403_v49  ;;  %v1434_v48 = vsub.f32 %v5245_v50, %v3933_v18  ;;  %v4300_v23 = vsel %vm812_vm4, %v4172_v44, %v1738_v34  ;;  %v1684_v25 = vpop.permute.xlu0 %1683 }
 0x214   : > { %5243 = vst [vmem:[#allocation53_spill] sm:$0xff] %v4286_v40  ;;  %v1706_v0 = vperm.slane %v4286_v40, 0  ;;  %v1445_v17 = vmul.f32 1.442695, %v1433_v37  ;;  %v1692_v42 = vpop.permute.xlu1 %1691  ;;  %v1411_v57 = vsub.f32 %v3834_v8, %v4122_v28  ;;  %v1412_v29 = vsub.f32 %v3837_v7, %v4125_v1  ;;  %v4319_v8 = vpop.permute.xlu2 %1835 }
 0x215   : > { %v1713_v12 = vmul.f32 %v1705_v2, %v1699_v3  ;;  %v1652_v51 = vsel %vm610_vm1, %v1644_v38, %v4209_v53  ;;  %v1447_v50 = vmul.f32 1.442695, %v1434_v48  ;;  %v1696_v44 = vsel %vm711_vm5, %v1684_v25, %v1692_v42 }
 0x216   : > { %v4309_v36 = vpop.eup %2777  ;;  %v1714_v49 = vmul.f32 %v1706_v0, %v1695_v56  ;;  %2785 = vpow2.f32 %v1445_v17  ;;  %v1425_v7 = vmul.f32 1.442695, %v1411_v57  ;;  %v1427_v53 = vmul.f32 1.442695, %v1412_v29 }
 0x217   : > { %v4316_v3 = vpop.eup %2779  ;;  %v1721_v34 = vadd.f32 %v1713_v12, %v1673_v35  ;;  %v1619_v2 = vperm.slane %v4309_v36, 0  ;;  %2787 = vpow2.f32 %v1447_v50  ;;  %v1435_v35 = vsub.f32 %v3938_v9, %v4122_v28 }
 0x218   : > { %v4321_v37 = vpop.eup %2781  ;;  %v1722_v56 = vadd.f32 %v1714_v49, %v1674_v59  ;;  %v1620_v0 = vperm.slane %v4316_v3, 0  ;;  %2789 = vpow2.f32 %v1425_v7  ;;  %v1436_v59 = vsub.f32 %v3941_v63, %v4125_v1 }
 0x219   : > { %v4324_v38 = vpop.eup %2783  ;;  %v1659_v48 = vperm.slane %v4321_v37, 0  ;;  %v1627_v15 = vmul.f32 %v1619_v2, %v5246_v47  ;;  %2791 = vpow2.f32 %v1427_v53  ;;  %v1449_v29 = vmul.f32 1.442695, %v1435_v35 }
 0x21a   : > { %v1628_v12 = vmul.f32 %v1620_v0, %v3669_v52  ;;  %v1660_v17 = vperm.slane %v4324_v38, 0  ;;  %v1483_v49 = vsub.f32 %v4032_v46, %v4122_v28  ;;  %v1484_v47 = vsub.f32 %v4035_v55, %v4125_v1 }
 0x21b   : > { %v1667_v57 = vmul.f32 %v1659_v48, %v1652_v51  ;;  %v1451_v2 = vmul.f32 1.442695, %v1436_v59  ;;  %v1732_v7 = vpop.permute.xlu0 %1731  ;;  %v1459_v52 = vsub.f32 %v3988_v10, %v4122_v28  ;;  %v1460_v9 = vsub.f32 %v3991_v11, %v4125_v1 }
 0x21c   : > { %v1668_v50 = vmul.f32 %v1660_v17, %v1648_v45  ;;  %v4342_v0 = vpop.eup %2785  ;;  %v1700_v51 = vsel %vm711_vm5, %v1692_v42, %v1684_v25  ;;  %v1740_v53 = vpop.permute.xlu1 %1739  ;;  %2793 = vpow2.f32 %v1449_v29  ;;  %v1497_v46 = vmul.f32 1.442695, %v1483_v49 }
 0x21d   : > { %5247 = vst [vmem:[#allocation54_spill] sm:$0xff] %v4342_v0  ;;  %v1675_v63 = vadd.f32 %v1667_v57, %v1627_v15  ;;  %v4346_v48 = vpop.eup %2787  ;;  %v1753_v45 = vperm.slane %v4342_v0, 0  ;;  %2795 = vpow2.f32 %v1451_v2  ;;  %v1499_v35 = vmul.f32 1.442695, %v1484_v47  ;;  %v4361_v47 = vpop.permute.xlu2 %1833 }
 0x21e   : > { %5248 = vst [vmem:[#allocation59_spill] sm:$0xff] %v4346_v48  ;;  %v1676_v55 = vadd.f32 %v1668_v50, %v1628_v12  ;;  %v4349_v10 = vpop.eup %2789  ;;  %v1754_v11 = vperm.slane %v4346_v48, 0  ;;  %v1744_v15 = vsel %vm812_vm4, %v1732_v7, %v1740_v53  ;;  %2797 = vpow2.f32 %v1497_v46  ;;  %v5249_v50 = vld [vmem:[#allocation57_spill] sm:$0xff] }
 0x21f   : > { %v1473_v17 = vmul.f32 1.442695, %v1459_v52  ;;  %v4354_v25 = vpop.eup %2791  ;;  %v1761_v42 = vmul.f32 %v1753_v45, %v1747_v16  ;;  %v1707_v59 = vperm.slane %v4349_v10, 0  ;;  %v1748_v12 = vsel %vm812_vm4, %v1740_v53, %v1732_v7  ;;  %v5250_v16 = vld [vmem:[#allocation58_spill] sm:$0xff] }
 0x220   : > { %v1475_v57 = vmul.f32 1.442695, %v1460_v9  ;;  %v1762_v29 = vmul.f32 %v1754_v11, %v4300_v23  ;;  %v1708_v49 = vperm.slane %v4354_v25, 0  ;;  %v1481_v2 = vsub.f32 %v5249_v50, %v3930_v61  ;;  %v5251_v23 = vld [vmem:[#allocation46_spill] sm:$0xff] }
 0x221   : > { %2799 = vpow2.f32 %v1473_v17  ;;  %v1769_v52 = vadd.f32 %v1761_v42, %v1721_v34  ;;  %v1715_v46 = vmul.f32 %v1707_v59, %v1700_v51  ;;  %v1482_v45 = vsub.f32 %v5250_v16, %v3933_v18 }
 0x222   : > { %2801 = vpow2.f32 %v1475_v57  ;;  %v4367_v62 = vpop.eup %2793  ;;  %v1770_v7 = vadd.f32 %v1762_v29, %v1722_v56  ;;  %v1716_v9 = vmul.f32 %v1708_v49, %v1696_v44  ;;  %v1493_v53 = vmul.f32 1.442695, %v1481_v2 }
 0x223   : > { %v1455_v11 = vsub.f32 %v5251_v23, %v3736_v20  ;;  %v4371_v24 = vpop.eup %2795  ;;  %v1723_v17 = vadd.f32 %v1715_v46, %v1675_v63  ;;  %v1755_v27 = vperm.slane %v4367_v62, 0  ;;  %v1788_v50 = vpop.permute.xlu0 %1787  ;;  %v1495_v34 = vmul.f32 1.442695, %v1482_v45 }
 0x224   : > { %v1817_v51 = vadd.f32 %v4280_v21, %v1769_v52  ;;  %v4375_v42 = vpop.eup %2797  ;;  %v1724_v59 = vadd.f32 %v1716_v9, %v1676_v55  ;;  %v1756_v57 = vperm.slane %v4371_v24, 0  ;;  %v1828_v56 = vpop.permute.xlu1 %1827  ;;  %2803 = vpow2.f32 %v1499_v35  ;;  %v5253_v9 = vld [vmem:[#allocation29_spill] sm:$0xff] }
 0x225   : > { %v1763_v44 = vmul.f32 %v1755_v27, %v1748_v12  ;;  %v1792_v29 = vsel %vm913_vm9, %v4263_v58, %v1788_v50  ;;  %v1796_v2 = vsel %vm913_vm9, %v1788_v50, %v4263_v58  ;;  %2805 = vpow2.f32 %v1493_v53  ;;  %v5252_v58 = vld [vmem:[#allocation47_spill] sm:$0xff]  ;;  %v4403_v23 = vpop.permute.xlu2 %1773  ;;  %v5261_v27 = vld [vmem:[#allocation37_spill] sm:$0xff] }
 0x226   : > { %v1764_v63 = vmul.f32 %v1756_v57, %v1744_v15  ;;  %v1818_v21 = vadd.f32 %v4284_v4, %v1770_v7  ;;  %2807 = vpow2.f32 %v1495_v34  ;;  %v4394_v15 = vsel %vm1014_vm11, %v1828_v56, %v4319_v8  ;;  %v5254_v34 = vld [vmem:[#allocation49_spill] sm:$0xff]  ;;  %v5255_v57 = vld [vmem:[#allocation50_spill] sm:$0xff] }
 0x227   : > { %v4381_v49 = vpop.eup %2799  ;;  %v1771_v52 = vadd.f32 %v1763_v44, %v1723_v17  ;;  %v1456_v16 = vsub.f32 %v5252_v58, %v3739_v54  ;;  %v1465_v45 = vmul.f32 1.442695, %v1455_v11  ;;  %v1507_v7 = vsub.f32 %v4014_v60, %v4122_v28 }
 0x228   : > { %v4387_v55 = vpop.eup %2801  ;;  %v1803_v35 = vperm.slane %v4381_v49, 0  ;;  %v1772_v12 = vadd.f32 %v1764_v63, %v1724_v59  ;;  %v1508_v53 = vsub.f32 %v5253_v9, %v4125_v1  ;;  %v1479_v59 = vsub.f32 %v5254_v34, %v3736_v20  ;;  %v5257_v9 = vld [vmem:[#allocation28_spill] sm:$0xff] }
 0x229   : > { %v1804_v46 = vperm.slane %v4387_v55, 0  ;;  %v1467_v50 = vmul.f32 1.442695, %v1456_v16  ;;  %v1480_v44 = vsub.f32 %v5255_v57, %v3739_v54  ;;  %2809 = vpow2.f32 %v1465_v45 }
 0x22a   : > { %v1811_v4 = vmul.f32 %v1803_v35, %v1796_v2  ;;  %v4409_v63 = vpop.eup %2803  ;;  %v1521_v60 = vmul.f32 1.442695, %v1507_v7  ;;  %v1523_v35 = vmul.f32 1.442695, %v1508_v53  ;;  %v1505_v13 = vsub.f32 %v5263_v33, %v3930_v61 }
 0x22b   : > { %v1812_v17 = vmul.f32 %v1804_v46, %v1792_v29  ;;  %v1784_v11 = vpop.permute.xlu0 %1783  ;;  %v4413_v58 = vpop.eup %2805  ;;  %v1844_v29 = vsel %vm1014_vm11, %v4319_v8, %v1828_v56  ;;  %2811 = vpow2.f32 %v1467_v50  ;;  %v1491_v7 = vmul.f32 1.442695, %v1480_v44  ;;  %v5260_v50 = vld [vmem:[#allocation21_spill] sm:$0xff] }
 0x22c   : > { %v4411_v2 = vadd.f32 %v1811_v4, %v1771_v52  ;;  %5256 = vst [vmem:[#allocation19_spill] sm:$0xff] %v4413_v58  ;;  %v1826_v16 = vpop.permute.xlu1 %1825  ;;  %v1794_v34 = vsel %vm913_vm9, %v1784_v11, %v5257_v9  ;;  %v4423_v52 = vpop.eup %2807  ;;  %v1849_v4 = vperm.slane %v4413_v58, 0  ;;  %2813 = vpow2.f32 %v1521_v60  ;;  %v5262_v58 = vld [vmem:[#allocation22_spill] sm:$0xff] }
 0x22d   : > { %v4418_v46 = vadd.f32 %v1812_v17, %v1772_v12  ;;  %5258 = vst [vmem:[#allocation51_spill] sm:$0xff] %v4423_v52  ;;  %v1839_v45 = vsel %vm1014_vm11, %v1826_v16, %v4361_v47  ;;  %v1843_v8 = vsel %vm1014_vm11, %v4361_v47, %v1826_v16  ;;  %v1850_v56 = vperm.slane %v4423_v52, 0  ;;  %v5259_v17 = vld [vmem:[#allocation36_spill] sm:$0xff]  ;;  %v5265_v16 = vld [vmem:[#allocation26_spill] sm:$0xff] }
 0x22e   : > { %2815 = vpow2.f32 %v1523_v35  ;;  %v1489_v12 = vmul.f32 1.442695, %v1479_v59  ;;  %v1857_v53 = vmul.f32 %v1849_v4, %v1843_v8  ;;  %v1453_v57 = vsub.f32 %v5260_v50, %v5259_v17  ;;  %v5264_v47 = vld [vmem:[#allocation24_spill] sm:$0xff] }
 0x22f   : > { %v1454_v19 = vsub.f32 %v5262_v58, %v5261_v27  ;;  %v1858_v48 = vmul.f32 %v1850_v56, %v1839_v45  ;;  %v1506_v60 = vsub.f32 %v5264_v47, %v3933_v18  ;;  %v1477_v35 = vsub.f32 %v5265_v16, %v5259_v17  ;;  %v4443_v59 = vpop.eup %2809  ;;  %v5269_v52 = vld [vmem:[#allocation12_spill] sm:$0xff] }
 0x230   : > { %2817 = vpow2.f32 %v1489_v12  ;;  %5266 = vst [vmem:[#allocation52_spill] sm:$0xff] %v4443_v59  ;;  %v4445_v44 = vadd.f32 %v1857_v53, %v1817_v51  ;;  %v1461_v4 = vmul.f32 1.442695, %v1453_v57  ;;  %v1852_v58 = vperm.slane %v4409_v63, 0 }
 0x231   : > { %2819 = vpow2.f32 %v1491_v7  ;;  %v1463_v8 = vmul.f32 1.442695, %v1454_v19  ;;  %v4447_v50 = vpop.eup %2811  ;;  %v4450_v33 = vadd.f32 %v1858_v48, %v1818_v21  ;;  %v1799_v45 = vperm.slane %v4443_v59, 0  ;;  %v5268_v19 = vld [vmem:[#allocation27_spill] sm:$0xff]  ;;  %v1832_v48 = vpop.permute.xlu2 %1831 }
 0x232   : > { %5267 = vst [vmem:[#allocation55_spill] sm:$0xff] %v4447_v50  ;;  %v1790_v56 = vsel %vm913_vm9, %v5257_v9, %v1784_v11  ;;  %v4456_v12 = vpop.eup %2813  ;;  %v1800_v51 = vperm.slane %v4447_v50, 0  ;;  %2821 = vpow2.f32 %v1461_v4  ;;  %v1517_v7 = vmul.f32 1.442695, %v1505_v13 }
 0x233   : > { %v1876_v53 = vpop.permute.xlu0 %1875  ;;  %v1478_v57 = vsub.f32 %v5268_v19, %v5261_v27  ;;  %v1807_v21 = vmul.f32 %v1799_v45, %v1794_v34  ;;  %2823 = vpow2.f32 %v1463_v8  ;;  %v1519_v59 = vmul.f32 1.442695, %v1506_v60 }
 0x234   : > { %v4461_v47 = vpop.eup %2815  ;;  %v1884_v16 = vpop.permute.xlu1 %1883  ;;  %v1531_v11 = vsub.f32 %v5269_v52, %v4122_v28  ;;  %v5270_v9 = vperm.slane %v4375_v42, 0  ;;  %v1808_v50 = vmul.f32 %v1800_v51, %v1790_v56  ;;  %v1860_v19 = vmul.f32 %v1852_v58, %v4394_v15  ;;  %v5272_v58 = vld [vmem:[#allocation40_spill] sm:$0xff] }
 0x235   : > { %v1892_v13 = vsel %vm1115_vm15, %v1884_v16, %v1876_v53  ;;  %v1815_v40 = vadd.f32 %v1807_v21, %v4246_v31  ;;  %v1899_v34 = vperm.slane %v4456_v12, 0  ;;  %v1485_v8 = vmul.f32 1.442695, %v1477_v35 }
 0x236   : > { %v1859_v0 = vmul.f32 %v5270_v9, %v1844_v29  ;;  %v4469_v4 = vpop.eup %2817  ;;  %v1816_v28 = vadd.f32 %v1808_v50, %v4254_v14  ;;  %v1900_v52 = vperm.slane %v4461_v47, 0  ;;  %2825 = vpow2.f32 %v1517_v7  ;;  %v5273_v14 = vld [vmem:[#allocation41_spill] sm:$0xff] }
 0x237   : > { %v4474_v60 = vpop.eup %2819  ;;  %v1487_v29 = vmul.f32 1.442695, %v1478_v57  ;;  %v1888_v45 = vsel %vm1115_vm15, %v1876_v53, %v1884_v16  ;;  %v1907_v56 = vmul.f32 %v1899_v34, %v1892_v13  ;;  %2827 = vpow2.f32 %v1519_v59 }
 0x238   : > { %v1532_v15 = vsub.f32 %v4108_v5, %v4125_v1  ;;  %v4482_v31 = vpop.eup %2821  ;;  %v1847_v35 = vperm.slane %v4469_v4, 0  ;;  %v1503_v51 = vsub.f32 %v5272_v58, %v3736_v20  ;;  %v1504_v50 = vsub.f32 %v5273_v14, %v3739_v54 }
 0x239   : > { %5271 = vst [vmem:[#allocation56_spill] sm:$0xff] %v4482_v31  ;;  %v1555_v7 = vadd.f32 %v4321_v37, %v4309_v36  ;;  %v4491_v57 = vpop.eup %2823  ;;  %v1848_v59 = vperm.slane %v4474_v60, 0  ;;  %2829 = vpow2.f32 %v1485_v8  ;;  %v1545_v53 = vmul.f32 1.442695, %v1531_v11  ;;  %v4514_v14 = vpop.permute.xlu2 %1923 }
 0x23a   : > { %5274 = vst [vmem:[#allocation48_spill] sm:$0xff] %v4491_v57  ;;  %v1867_v5 = vadd.f32 %v1859_v0, %v4411_v2  ;;  %v1797_v1 = vperm.slane %v4482_v31, 0  ;;  %v1798_v21 = vperm.slane %v4491_v57, 0  ;;  %2831 = vpow2.f32 %v1487_v29 }
 0x23b   : > { %v1782_v16 = vpop.permute.xlu0 %1781  ;;  %v1563_v9 = vadd.f32 %v4349_v10, %v1555_v7  ;;  %v1547_v11 = vmul.f32 1.442695, %v1532_v15  ;;  %v1908_v7 = vmul.f32 %v1900_v52, %v1888_v45  ;;  %2833 = vpow2.f32 %v1545_v53 }
 0x23c   : > { %v1789_v36 = vsel %vm913_vm9, %v4403_v23, %v1782_v16  ;;  %v1793_v37 = vsel %vm913_vm9, %v1782_v16, %v4403_v23  ;;  %v4504_v34 = vadd.f32 %v1907_v56, %v1867_v5  ;;  %v4506_v0 = vpop.eup %2825  ;;  %v1513_v5 = vmul.f32 1.442695, %v1503_v51 }
 0x23d   : > { %v1824_v13 = vpop.permute.xlu1 %1823  ;;  %v1805_v8 = vmul.f32 %v1797_v1, %v1793_v37  ;;  %v1806_v29 = vmul.f32 %v1798_v21, %v1789_v36  ;;  %v4512_v58 = vpop.eup %2827  ;;  %v1515_v16 = vmul.f32 1.442695, %v1504_v50  ;;  %v1897_v21 = vperm.slane %v4506_v0, 0  ;;  %v5276_v50 = vld [vmem:[#allocation31_spill] sm:$0xff] }
 0x23e   : > { %v1838_v2 = vsel %vm1014_vm11, %v1824_v13, %v1832_v48  ;;  %v1842_v10 = vsel %vm1014_vm11, %v1832_v48, %v1824_v13  ;;  %2835 = vpow2.f32 %v1547_v11  ;;  %v1898_v45 = vperm.slane %v4512_v58, 0 }
 0x23f   : > { %v1855_v57 = vmul.f32 %v1847_v35, %v1842_v10  ;;  %v1856_v23 = vmul.f32 %v1848_v59, %v1838_v2  ;;  %v4517_v56 = vadd.f32 %v1805_v8, %v4177_v6  ;;  %v4520_v15 = vadd.f32 %v1806_v29, %v4187_v26  ;;  %v4522_v31 = vpop.eup %2829  ;;  %v5277_v59 = vld [vmem:[#allocation20_spill] sm:$0xff] }
 0x240   : > { %v4529_v52 = vpop.eup %2831  ;;  %v1571_v6 = vadd.f32 %v4367_v62, %v1563_v9  ;;  %v1556_v26 = vadd.f32 %v4324_v38, %v4316_v3  ;;  %v1868_v35 = vadd.f32 %v1860_v19, %v4418_v46  ;;  %v1529_v53 = vsub.f32 %v5277_v59, %v3930_v61  ;;  %v5278_v61 = vld [vmem:[#allocation25_spill] sm:$0xff] }
 0x241   : > { %v4524_v48 = vadd.f32 %v1855_v57, %v1815_v40  ;;  %v4526_v1 = vadd.f32 %v1856_v23, %v1816_v28  ;;  %v1988_v40 = vld [vmem:[%s5013_s3 + $0x18] sm:$0xff]  ;;  %v5275_v28 = vld [vmem:[#allocation30_spill] sm:$0xff]  ;;  %v1502_v57 = vsub.f32 %v5276_v50, %v5261_v27  ;;  %v1845_v62 = vperm.slane %v4522_v31, 0  ;;  %v2834_v9 = vpop.eup %2833 }
 0x242   : > { %v1501_v51 = vsub.f32 %v5275_v28, %v5259_v17  ;;  %v1579_v3 = vadd.f32 %v4381_v49, %v1571_v6  ;;  %v1564_v38 = vadd.f32 %v4354_v25, %v1556_v26  ;;  %v4548_v46 = vadd.f32 %v1908_v7, %v1868_v35  ;;  %v1830_v35 = vpop.permute.xlu2 %1829  ;;  %v5280_v28 = vld [vmem:[#allocation45_spill] sm:$0xff] }
 0x243   : > { %v1874_v13 = vpop.permute.xlu0 %1873  ;;  %v2953_v19 = vmov 0   ;;  %2837 = vpow2.f32 %v1513_v5  ;;  %v1511_v11 = vmul.f32 1.442695, %v1502_v57  ;;  %v1530_v2 = vsub.f32 %v5278_v61, %v3933_v18 }
 0x244   : > { %2726 = vset.pattern.permute.xlu1 %v2953_v19  ;;  %2728 = vset.pattern.permute.xlu0 %v2953_v19  ;;  %v1509_v37 = vmul.f32 1.442695, %v1501_v51  ;;  %v1587_v10 = vadd.f32 %v4375_v42, %v1579_v3  ;;  %v1572_v8 = vadd.f32 %v4371_v24, %v1564_v38  ;;  %v2836_v29 = vpop.eup %2835  ;;  %2839 = vpow2.f32 %v1515_v16 }
 0x245   : > { %v1882_v36 = vpop.permute.xlu1 %1881  ;;  %2006 = vperm.xlu1 %2726, %v1988_v40   ;;  %2727 = vset.pattern.permute.xlu2 %v2953_v19  ;;  %v1541_v5 = vmul.f32 1.442695, %v1529_v53  ;;  %v1846_v6 = vperm.slane %v4529_v52, 0  ;;  %v1947_v24 = vperm.slane %v2834_v9, 0  ;;  %v1528_v51 = vsub.f32 %v5280_v28, %v3739_v54 }
 0x246   : > { %v1887_v49 = vsel %vm1115_vm15, %v1874_v13, %v1882_v36  ;;  %v1891_v25 = vsel %vm1115_vm15, %v1882_v36, %v1874_v13  ;;  %v1595_v18 = vadd.f32 %v4456_v12, %v1587_v10  ;;  %v1580_v26 = vadd.f32 %v4387_v55, %v1572_v8  ;;  %v5279_v12 = vld [vmem:[#allocation44_spill] sm:$0xff] }
 0x247   : > { %v1905_v7 = vmul.f32 %v1897_v21, %v1891_v25  ;;  %v1906_v23 = vmul.f32 %v1898_v45, %v1887_v49  ;;  %2841 = vpow2.f32 %v1509_v37  ;;  %v1985_v45 = vld [vmem:[%s5013_s3] sm:$0xff]  ;;  %v1527_v55 = vsub.f32 %v5279_v12, %v3736_v20 }
 0x248   : > { %2843 = vpow2.f32 %v1511_v11  ;;  %v1603_v21 = vadd.f32 %v2834_v9, %v1595_v18  ;;  %v1588_v16 = vadd.f32 %v4409_v63, %v1580_v26  ;;  %v1554_v50 = vadd.f32 %v4259_v30, %v4244_v32  ;;  %v5281_v63 = vld [vmem:[#allocation32_spill] sm:$0xff]  ;;  %v5284_v18 = vld [vmem:[#allocation59_spill] sm:$0xff]  ;;  %v5285_v26 = vld [vmem:[#allocation33_spill] sm:$0xff] }
 0x249   : > { %v4562_v40 = vadd.f32 %v1905_v7, %v4445_v44  ;;  %v4565_v42 = vadd.f32 %v1906_v23, %v4450_v33  ;;  %v4575_v44 = vpop.eup %2837  ;;  %2845 = vpow2.f32 %v1541_v5  ;;  %v1553_v33 = vadd.f32 %v4252_v41, %v4238_v39  ;;  %v5282_v41 = vld [vmem:[#allocation53_spill] sm:$0xff] }
 0x24a   : > { %v1525_v57 = vsub.f32 %v5281_v63, %v5259_v17  ;;  %v1948_v59 = vperm.slane %v2836_v29, 0  ;;  %2847 = vrcp.f32 %v1603_v21  ;;  %v1596_v20 = vadd.f32 %v4461_v47, %v1588_v16  ;;  %v4584_v3 = vpop.eup %2839  ;;  %v5302_v63 = vld [vmem:[#allocation11_spill] sm:$0xff] }
 0x24b   : > { %v1932_v53 = vpop.permute.xlu0 %1931  ;;  %v1543_v13 = vmul.f32 1.442695, %v1530_v2  ;;  %v1561_v32 = vadd.f32 %v4282_v43, %v1553_v33  ;;  %v1562_v30 = vadd.f32 %v5282_v41, %v1554_v50  ;;  %v1895_v49 = vperm.slane %v4575_v44, 0  ;;  %v5287_v33 = vld [vmem:[#allocation10_spill] sm:$0xff]  ;;  %v5292_v41 = vld [vmem:[#allocation19_spill] sm:$0xff] }
 0x24c   : > { %v1936_v38 = vsel %vm1216_vm7, %v4514_v14, %v1932_v53  ;;  %v1940_v39 = vsel %vm1216_vm7, %v1932_v53, %v4514_v14  ;;  %v1604_v14 = vadd.f32 %v2836_v29, %v1596_v20  ;;  %v1896_v43 = vperm.slane %v4584_v3, 0  ;;  %v1986_v29 = vld [vmem:[%s5013_s3 + $0x8] sm:$0xff]  ;;  %v5289_v53 = vld [vmem:[#allocation8_spill] sm:$0xff] }
 0x24d   : > { %v1822_v54 = vpop.permute.xlu1 %1821  ;;  %1991 = vperm.xlu1 %2726, %v1985_v45   ;;  %v4594_v19 = vpop.eup %2841  ;;  %v1955_v36 = vmul.f32 %v1947_v24, %v1940_v39  ;;  %v1956_v37 = vmul.f32 %v1948_v59, %v1936_v38  ;;  %1996 = vperm.xlu0 %2728, %v1986_v29   ;;  %v1539_v16 = vmul.f32 1.442695, %v1528_v51  ;;  %v5286_v45 = vld [vmem:[#allocation35_spill] sm:$0xff]  ;;  %v5288_v59 = vld [vmem:[#allocation17_spill] sm:$0xff]  ;;  %v5293_v51 = vld [vmem:[#allocation18_spill] sm:$0xff] }
 0x24e   : > { %v1837_v47 = vsel %vm1014_vm11, %v1822_v54, %v1830_v35  ;;  %v1841_v9 = vsel %vm1014_vm11, %v1830_v35, %v1822_v54  ;;  %v4600_v11 = vpop.eup %2843  ;;  %2849 = vrcp.f32 %v1604_v14  ;;  %v1922_v35 = vpop.permute.xlu2 %1921  ;;  %v1893_v21 = vperm.slane %v4594_v19, 0  ;;  %v5291_v54 = vld [vmem:[#allocation38_spill] sm:$0xff]  ;;  %v5296_v29 = vld [vmem:[#allocation39_spill] sm:$0xff] }
 0x24f   : > { %v1853_v61 = vmul.f32 %v1845_v62, %v1841_v9  ;;  %v1854_v2 = vmul.f32 %v1846_v6, %v1837_v47  ;;  %v1963_v25 = vadd.f32 %v1955_v36, %v4504_v34  ;;  %v1964_v10 = vadd.f32 %v1956_v37, %v4548_v46  ;;  %v4606_v8 = vpop.eup %2845  ;;  %v5283_v62 = vld [vmem:[#allocation54_spill] sm:$0xff]  ;;  %v5294_v47 = vld [vmem:[#allocation7_spill] sm:$0xff] }
 0x250   : > { %v1569_v5 = vadd.f32 %v5283_v62, %v1561_v32  ;;  %v2848_v6 = vpop.eup %2847  ;;  %2851 = vpow2.f32 %v1543_v13  ;;  %v1537_v34 = vmul.f32 1.442695, %v1527_v55  ;;  %v1570_v46 = vadd.f32 %v5284_v18, %v1562_v30  ;;  %v5290_v13 = vld [vmem:[#allocation9_spill] sm:$0xff] }
 0x251   : > { %v4609_v7 = vadd.f32 %v1853_v61, %v4517_v56  ;;  %v4612_v23 = vadd.f32 %v1854_v2, %v4520_v15  ;;  %v2117_v56 = vld [vmem:[%s5015_s5 + $0x70] sm:$0xff]  ;;  %v1526_v15 = vsub.f32 %v5285_v26, %v5261_v27  ;;  %v1971_v24 = vperm.slane %v2848_v6, 0  ;;  %v5295_v61 = vld [vmem:[#allocation51_spill] sm:$0xff]  ;;  %v5297_v26 = vld [vmem:[#allocation42_spill] sm:$0xff] }
 0x252   : > { %v1577_v12 = vadd.f32 %v5286_v45, %v1569_v5  ;;  %v1894_v55 = vperm.slane %v4600_v11, 0  ;;  %v1578_v50 = vadd.f32 %v5287_v33, %v1570_v46  ;;  %v1551_v20 = vadd.f32 %v5289_v53, %v5288_v59  ;;  %v5298_v45 = vld [vmem:[#allocation13_spill] sm:$0xff]  ;;  %v5301_v53 = vld [vmem:[#allocation15_spill] sm:$0xff] }
 0x253   : > { %v1872_v28 = vpop.permute.xlu0 %1871  ;;  %v1552_v38 = vadd.f32 %v5291_v54, %v5290_v13  ;;  %v1979_v39 = vmul.f32 %v1971_v24, %v1963_v25  ;;  %v1945_v32 = vperm.slane %v4606_v8, 0  ;;  %v1549_v9 = vadd.f32 %v5294_v47, %v5293_v51  ;;  %v5305_v47 = vld [vmem:[#allocation55_spill] sm:$0xff] }
 0x254   : > { %v1585_v30 = vadd.f32 %v5292_v41, %v1577_v12  ;;  %2853 = vpow2.f32 %v1537_v34  ;;  %v1586_v2 = vadd.f32 %v5295_v61, %v1578_v50  ;;  %v2850_v14 = vpop.eup %2849  ;;  %v1559_v6 = vadd.f32 %v5296_v29, %v1551_v20  ;;  %v5299_v50 = vld [vmem:[#allocation43_spill] sm:$0xff] }
 0x255   : > { %v1880_v27 = vpop.permute.xlu1 %1879  ;;  %2191 = vperm.xlu1 %2726, %v2117_v56   ;;  %2033 = vmatpush.msra.mxu2 %v1979_v39  ;;  %v1972_v46 = vperm.slane %v2850_v14, 0  ;;  %v1560_v24 = vadd.f32 %v5297_v26, %v1552_v38  ;;  %v1557_v12 = vadd.f32 %v5298_v45, %v1549_v9  ;;  %2855 = vpow2.f32 %v1539_v16  ;;  %v5304_v38 = vld [vmem:[#allocation52_spill] sm:$0xff] }
 0x256   : > { %v1886_v36 = vsel %vm1115_vm15, %v1872_v28, %v1880_v27  ;;  %v1890_v37 = vsel %vm1115_vm15, %v1880_v27, %v1872_v28  ;;  %v1593_v5 = vadd.f32 %v4506_v0, %v1585_v30  ;;  %v2852_v18 = vpop.eup %2851  ;;  %v1594_v56 = vadd.f32 %v4512_v58, %v1586_v2  ;;  %v2115_v58 = vld [vmem:[%s5015_s5 + $0x60] sm:$0xff]  ;;  %v1878_v39 = vpop.permute.xlu2 %1877  ;;  %v5308_v45 = vld [vmem:[#allocation16_spill] sm:$0xff] }
 0x257   : > { %v1903_v62 = vmul.f32 %v1895_v49, %v1890_v37  ;;  %v1904_v25 = vmul.f32 %v1896_v43, %v1886_v36  ;;  %v1533_v0 = vmul.f32 1.442695, %v1525_v57  ;;  %v1980_v43 = vmul.f32 %v1972_v46, %v1964_v10  ;;  %2181 = vperm.xlu0 %2728, %v2115_v58   ;;  %v5303_v57 = vld [vmem:[#allocation6_spill] sm:$0xff] }
 0x258   : > { %v1601_v49 = vadd.f32 %v4606_v8, %v1593_v5  ;;  %v1602_v33 = vadd.f32 %v2852_v18, %v1594_v56  ;;  %v1567_v59 = vadd.f32 %v5299_v50, %v1559_v6  ;;  %v1565_v17 = vadd.f32 %v5301_v53, %v1557_v12  ;;  %v5306_v6 = vld [vmem:[#allocation56_spill] sm:$0xff]  ;;  %v5307_v46 = vld [vmem:[#allocation14_spill] sm:$0xff] }
 0x259   : > { %v4647_v34 = vadd.f32 %v1903_v62, %v4524_v48  ;;  %v4650_v28 = vadd.f32 %v1904_v25, %v4526_v1  ;;  %v2114_v48 = vld [vmem:[%s5015_s5 + $0x58] sm:$0xff]  ;;  %v5300_v1 = vld [vmem:[#allocation34_spill] sm:$0xff]  ;;  %v1550_v20 = vadd.f32 %v5303_v57, %v5302_v63  ;;  %2062 = vmatpush.msra.mxu3 %v1980_v43  ;;  %v1946_v10 = vperm.slane %v2852_v18, 0  ;;  %v5309_v50 = vld [vmem:[#allocation48_spill] sm:$0xff] }
 0x25a   : > { %2857 = vrcp.f32 %v1601_v49  ;;  %v1568_v8 = vadd.f32 %v5300_v1, %v1560_v24  ;;  %v2854_v13 = vpop.eup %2853  ;;  %v1535_v54 = vmul.f32 1.442695, %v1526_v15  ;;  %v1575_v27 = vadd.f32 %v5304_v38, %v1567_v59  ;;  %v2118_v38 = vld [vmem:[%s5015_s5 + $0x78] sm:$0xff] }
 0x25b   : > { %v1930_v16 = vpop.permute.xlu0 %1929  ;;  %2859 = vrcp.f32 %v1602_v33  ;;  %v2856_v5 = vpop.eup %2855  ;;  %v1573_v18 = vadd.f32 %v5306_v6, %v1565_v17  ;;  %v1558_v56 = vadd.f32 %v5307_v46, %v1550_v20  ;;  %v2105_v46 = vld [vmem:[%s5015_s5 + $0x10] sm:$0xff] }
 0x25c   : > { %v1935_v30 = vsel %vm1216_vm7, %v1922_v35, %v1930_v16  ;;  %v1939_v51 = vsel %vm1216_vm7, %v1930_v16, %v1922_v35  ;;  %2861 = vpow2.f32 %v1533_v0  ;;  %v1576_v9 = vadd.f32 %v5305_v47, %v1568_v8 }
 0x25d   : > { %v1870_v41 = vpop.permute.xlu1 %1869  ;;  %2176 = vperm.xlu1 %2726, %v2114_v48   ;;  %v1953_v37 = vmul.f32 %v1945_v32, %v1939_v51  ;;  %v1954_v61 = vmul.f32 %v1946_v10, %v1935_v30  ;;  %v1583_v62 = vadd.f32 %v4469_v4, %v1575_v27  ;;  %v1566_v12 = vadd.f32 %v5308_v45, %v1558_v56  ;;  %v2109_v27 = vld [vmem:[%s5015_s5 + $0x30] sm:$0xff]  ;;  %v2107_v45 = vld [vmem:[%s5015_s5 + $0x20] sm:$0xff] }
 0x25e   : > { %v1885_v36 = vsel %vm1115_vm15, %v1870_v41, %v1878_v39  ;;  %v1889_v15 = vsel %vm1115_vm15, %v1878_v39, %v1870_v41  ;;  %v1584_v25 = vadd.f32 %v4474_v60, %v1576_v9  ;;  %2863 = vpow2.f32 %v1535_v54 }
 0x25f   : > { %v1901_v2 = vmul.f32 %v1893_v21, %v1889_v15  ;;  %v1902_v14 = vmul.f32 %v1894_v55, %v1885_v36  ;;  %v1961_v35 = vadd.f32 %v1953_v37, %v4562_v40  ;;  %v1962_v29 = vadd.f32 %v1954_v61, %v4565_v42  ;;  %v1987_v40 = vld [vmem:[%s5013_s3 + $0x10] sm:$0xff]  ;;  %v2112_v42 = vld [vmem:[%s5015_s5 + $0x48] sm:$0xff] }
 0x260   : > { %v2858_v26 = vpop.eup %2857  ;;  %v1591_v4 = vadd.f32 %v4575_v44, %v1583_v62  ;;  %v1592_v60 = vadd.f32 %v4584_v3, %v1584_v25  ;;  %v2111_v44 = vld [vmem:[%s5015_s5 + $0x40] sm:$0xff]  ;;  %2001 = vperm.xlu2 %2727, %v1987_v40   ;;  %2166 = vperm.xlu0 %2728, %v2112_v42   ;;  %v1574_v59 = vadd.f32 %v5309_v50, %v1566_v12  ;;  %v1943_v48 = vperm.slane %v2854_v13, 0  ;;  %v2110_v42 = vld [vmem:[%s5015_s5 + $0x38] sm:$0xff] }
 0x261   : > { %v4684_v24 = vadd.f32 %v1901_v2, %v4609_v7  ;;  %v4687_v21 = vadd.f32 %v1902_v14, %v4612_v23  ;;  %v2860_v55 = vpop.eup %2859  ;;  %v1969_v32 = vperm.slane %v2858_v26, 0  ;;  %v1581_v7 = vadd.f32 %v4522_v31, %v1573_v18  ;;  %v1981_v18 = vld [vmem:[%s5012_s2] sm:$0xff]  ;;  %v1984_v12 = vld [vmem:[%s5012_s2 + $0x18] sm:$0xff] }
 0x262   : > { %v2862_v3 = vpop.eup %2861  ;;  %v1970_v23 = vperm.slane %v2860_v55, 0  ;;  %v1599_v49 = vadd.f32 %v2854_v13, %v1591_v4  ;;  %v1600_v0 = vadd.f32 %v2856_v5, %v1592_v60  ;;  %v1944_v1 = vperm.slane %v2856_v5, 0  ;;  %v2103_v4 = vld [vmem:[%s5015_s5] sm:$0xff]  ;;  %v1982_v60 = vld [vmem:[%s5012_s2 + $0x8] sm:$0xff]  ;;  %v2415_v55 = vld [vmem:[%s5017_s7 + $0x10] sm:$0xff] }
 0x263   : > { %v1920_v58 = vpop.permute.xlu0 %1919  ;;  %v1977_v43 = vmul.f32 %v1969_v32, %v1961_v35  ;;  %v1589_v33 = vadd.f32 %v4594_v19, %v1581_v7  ;;  %v1582_v19 = vadd.f32 %v4529_v52, %v1574_v59  ;;  %v2108_v52 = vld [vmem:[%s5015_s5 + $0x28] sm:$0xff]  ;;  %v1941_v30 = vperm.slane %v2862_v3, 0  ;;  %v2413_v40 = vld [vmem:[%s5017_s7] sm:$0xff]  ;;  %v1983_v32 = vld [vmem:[%s5012_s2 + $0x10] sm:$0xff] }
 0x264   : > { %v1978_v8 = vmul.f32 %v1970_v23, %v1962_v29  ;;  %2865 = vrcp.f32 %v1599_v49  ;;  %v2864_v13 = vpop.eup %2863  ;;  %v2106_v29 = vld [vmem:[%s5015_s5 + $0x18] sm:$0xff] }
 0x265   : > { %v1928_v31 = vpop.permute.xlu1 %1927  ;;  %2161 = vperm.xlu1 %2726, %v2111_v44   ;;  %2034 = vmatpush.msra.mxu2 %v1977_v43  ;;  %2867 = vrcp.f32 %v1600_v0  ;;  %v1597_v63 = vadd.f32 %v2862_v3, %v1589_v33  ;;  %v1590_v54 = vadd.f32 %v4600_v11, %v1582_v19  ;;  %v1942_v11 = vperm.slane %v2864_v13, 0  ;;  %v2416_v7 = vld [vmem:[%s5017_s7 + $0x18] sm:$0xff]  ;;  %v2104_v44 = vld [vmem:[%s5015_s5 + $0x8] sm:$0xff] }
 0x266   : > { %v1934_v53 = vsel %vm1216_vm7, %v1920_v58, %v1928_v31  ;;  %v1938_v17 = vsel %vm1216_vm7, %v1928_v31, %v1920_v58  ;;  %2063 = vmatpush.msra.mxu3 %v1978_v8  ;;  %v2414_v3 = vld [vmem:[%s5017_s7 + $0x8] sm:$0xff] }
 0x267   : > { %v1951_v57 = vmul.f32 %v1943_v48, %v1938_v17  ;;  %v1952_v20 = vmul.f32 %v1944_v1, %v1934_v53  ;;  %2869 = vrcp.f32 %v1597_v63  ;;  %v2873_v17 = vld [vmem:[%s3064_s26 + $0x30] sm:$0xff] }
 0x268   : > { %2196 = vperm.xlu2 %2727, %v2118_v38   ;;  %2151 = vperm.xlu0 %2728, %v2109_v27   ;;  %v2875_v27 = vld [vmem:[%s3064_s26 + $0x38] sm:$0xff] }
 0x269   : > { %v1959_v10 = vadd.f32 %v1951_v57, %v4647_v34  ;;  %v1960_v16 = vadd.f32 %v1952_v20, %v4650_v28  ;;  %v1598_v34 = vadd.f32 %v2864_v13, %v1590_v54  ;;  %v1918_v28 = vpop.permute.xlu2 %1917 }
 0x26a   : > { %v2866_v39 = vpop.eup %2865 }
 0x26b   : > { %v2868_v41 = vpop.eup %2867  ;;  %v1926_v51 = vpop.permute.xlu0 %1925  ;;  %v1967_v47 = vperm.slane %v2866_v39, 0  ;;  %2871 = vrcp.f32 %v1598_v34  ;;  %v2876_v39 = vld [vmem:[%s3064_s26 + $0x10] sm:$0xff] }
 0x26c   : > { %v1933_v9 = vsel %vm1216_vm7, %v1918_v28, %v1926_v51  ;;  %v1937_v36 = vsel %vm1216_vm7, %v1926_v51, %v1918_v28  ;;  %v1968_v15 = vperm.slane %v2868_v41, 0  ;;  %v2877_v28 = vld [vmem:[%s3064_s26 + $0x28] sm:$0xff] }
 0x26d   : > { %2146 = vperm.xlu1 %2726, %v2108_v52   ;;  %v2870_v37 = vpop.eup %2869  ;;  %v1949_v61 = vmul.f32 %v1941_v30, %v1937_v36  ;;  %v1950_v2 = vmul.f32 %v1942_v11, %v1933_v9  ;;  %v1975_v14 = vmul.f32 %v1967_v47, %v1959_v10  ;;  %v2878_v11 = vld [vmem:[%s3064_s26] sm:$0xff]  ;;  %v2879_v9 = vld [vmem:[%s3064_s26 + $0x18] sm:$0xff] }
 0x26e   : > { %v1976_v62 = vmul.f32 %v1968_v15, %v1960_v16  ;;  %v1965_v5 = vperm.slane %v2870_v37, 0  ;;  %v2874_v16 = vld [vmem:[%s3064_s26 + $0x20] sm:$0xff]  ;;  %v2880_v15 = vld [vmem:[%s3064_s26 + $0x8] sm:$0xff]  ;;  %s2901_s26 = scalar_lea.hbm %s5018_s8, 128 }
 0x26f   : > { %2035 = vmatpush.msra.mxu2 %v1975_v14  ;;  %v1957_v25 = vadd.f32 %v1949_v61, %v4684_v24  ;;  %v1958_v35 = vadd.f32 %v1950_v2, %v4687_v21  ;;  %v2113_v21 = vld [vmem:[%s5015_s5 + $0x50] sm:$0xff]  ;;  %v2087_v47 = vld [vmem:[%s5014_s4] sm:$0xff]  ;;  %v2088_v61 = vld [vmem:[%s5014_s4 + $0x8] sm:$0xff]  ;;  %p2903_p3 = scmp.lt.s32.totalorder %s2901_s26, %s2897_s21 }
 0x270   : > { %2064 = vmatpush.msra.mxu3 %v1976_v62  ;;  %2186 = vperm.xlu2 %2727, %v2116_v22   ;;  %v2089_v2 = vld [vmem:[%s5014_s4 + $0x10] sm:$0xff]  ;;  %v2090_v14 = vld [vmem:[%s5014_s4 + $0x18] sm:$0xff]  ;;  %v2091_v62 = vld [vmem:[%s5014_s4 + $0x20] sm:$0xff] }
 0x271   : > { %v1973_v6 = vmul.f32 %v1965_v5, %v1957_v25  ;;  %2136 = vperm.xlu0 %2728, %v2106_v29   ;;  %v2872_v56 = vpop.eup %2871  ;;  %v2092_v25 = vld [vmem:[%s5014_s4 + $0x28] sm:$0xff]  ;;  %v2093_v5 = vld [vmem:[%s5014_s4 + $0x30] sm:$0xff]  ;;  %v2095_v22 = vld [vmem:[%s5014_s4 + $0x40] sm:$0xff]  ;;  %p2904_p4 = por %p2903_p3, %p2902_p2 }
 0x272   : > { %v1966_v26 = vperm.slane %v2872_v56, 0  ;;  %v2096_v29 = vld [vmem:[%s5014_s4 + $0x48] sm:$0xff] }
 0x273   : > { %2036 = vmatpush.msra.mxu2 %v1973_v6  ;;  %v2097_v6 = vld [vmem:[%s5014_s4 + $0x50] sm:$0xff]  ;;  %v2100_v56 = vld [vmem:[%s5014_s4 + $0x68] sm:$0xff]  ;;  %p2905_p5 = pnand %p2904_p4, %p2900_p1 }
 0x274   : > { %2628 = vmatmul.msk.f32.vlgmr.msra.gmra.mxu2 %vm360_vm0, %v1981_v18  ;;  %v1974_v24 = vmul.f32 %v1966_v26, %v1958_v35  ;;  %v2094_v35 = vld [vmem:[%s5014_s4 + $0x38] sm:$0xff]  ;;  %v2101_v26 = vld [vmem:[%s5014_s4 + $0x70] sm:$0xff] }
 0x275   : > { %2131 = vperm.xlu1 %2726, %v2105_v46   ;;  %v2099_v46 = vld [vmem:[%s5014_s4 + $0x60] sm:$0xff] }
 0x276   : > { %2065 = vmatpush.msra.mxu3 %v1974_v24  ;;  %v2102_v24 = vld [vmem:[%s5014_s4 + $0x78] sm:$0xff] }
 0x277   : > { %2632 = vmatmul.msk.f32.vlgmr.msra.gmra.mxu3 %vm360_vm0, %v1981_v18  ;;  %v2098_v18 = vld [vmem:[%s5014_s4 + $0x58] sm:$0xff] }
 0x278   : > { %2171 = vperm.xlu2 %2727, %v2113_v21  }
 0x279   : > { %2121 = vperm.xlu0 %2728, %v2103_v4  }
 0x27c   : > { %2629 = vmatmul.msk.f32.gmra.mxu2 %vm360_vm0, %v1982_v60 }
 0x27d   : > { %2419 = vperm.xlu1 %2726, %v2413_v40  }
 0x27f   : > { %2633 = vmatmul.msk.f32.gmra.mxu3 %vm360_vm0, %v1982_v60 }
 0x280   : > { %2156 = vperm.xlu2 %2727, %v2110_v42  }
 0x281   : > { %2429 = vperm.xlu0 %2728, %v2415_v55  }
 0x284   : > { %2630 = vmatmul.msk.f32.gmra.mxu2 %vm360_vm0, %v1983_v32 }
 0x285   : > { %2434 = vperm.xlu1 %2726, %v2416_v7  }
 0x287   : > { %2634 = vmatmul.msk.f32.gmra.mxu3 %vm360_vm0, %v1983_v32 }
 0x288   : > { %2141 = vperm.xlu2 %2727, %v2107_v45  }
 0x28c   : > { %2631 = vmatmul.msk.f32.gmra.mxu2 %vm360_vm0, %v1984_v12 }
 0x28f   : > { %2635 = vmatmul.msk.f32.gmra.mxu3 %vm360_vm0, %v1984_v12 }
 0x290   : > { %2126 = vperm.xlu2 %2727, %v2104_v44  }
 0x298   : > { %2424 = vperm.xlu2 %2727, %v2414_v3  }
 0x2b7   : > { %v2007_v33 = vpop.permute.xlu1 %2006 }
 0x2ba   : > { %v2002_v59 = vpop.permute.xlu2 %2001 }
 0x2bf   : > { %v1997_v8 = vpop.permute.xlu0 %1996  ;;  %v1992_v57 = vpop.permute.xlu1 %1991 }
 0x2f7   : > { %v2038_v23 = vpop.f32.mrf.mxu2 }
 0x2f8   : > { %v2039_v19 = vadd.f32 %v2038_v23, %v1992_v57 }
 0x2fa   : > { %v2067_v49 = vpop.f32.mrf.mxu3  ;;  %v4803_v51 = vadd.f32 %v2878_v11, %v2039_v19 }
 0x2fb   : > { %v2068_v41 = vadd.f32 %v2067_v49, %v1992_v57 }
 0x2fd   : > { %v4816_v37 = vadd.f32 %v2880_v15, %v2068_v41 }
 0x2ff   : > { %v2041_v0 = vpop.f32.mrf.mxu2 }
 0x300   : > { %v2042_v53 = vadd.f32 %v2041_v0, %v1997_v8 }
 0x302   : > { %v2070_v58 = vpop.f32.mrf.mxu3  ;;  %v4795_v34 = vadd.f32 %v2876_v39, %v2042_v53  ;;  %v2197_v53 = vpop.permute.xlu2 %2196 }
 0x303   : > { %v2071_v38 = vadd.f32 %v2070_v58, %v1997_v8 }
 0x305   : > { %v4810_v36 = vadd.f32 %v2879_v9, %v2071_v38 }
 0x307   : > { %v2044_v43 = vpop.f32.mrf.mxu2 }
 0x308   : > { %v2045_v48 = vadd.f32 %v2044_v43, %v2002_v59 }
 0x30a   : > { %v2073_v50 = vpop.f32.mrf.mxu3  ;;  %v4788_v54 = vadd.f32 %v2874_v16, %v2045_v48 }
 0x30b   : > { %v2074_v13 = vadd.f32 %v2073_v50, %v2002_v59 }
 0x30d   : > { %v4799_v30 = vadd.f32 %v2877_v28, %v2074_v13  ;;  %v2187_v13 = vpop.permute.xlu2 %2186 }
 0x30f   : > { %v2047_v31 = vpop.f32.mrf.mxu2 }
 0x310   : > { %v2048_v1 = vadd.f32 %v2047_v31, %v2007_v33 }
 0x312   : > { %v4784_v63 = vadd.f32 %v2873_v17, %v2048_v1  ;;  %v2076_v20 = vpop.f32.mrf.mxu3 }
 0x313   : > { %v2077_v10 = vadd.f32 %v2076_v20, %v2007_v33  ;;  %v2192_v20 = vpop.permute.xlu1 %2191 }
 0x314   : > { %2259 = vmatpush.msrb.mxu2 %v4784_v63 }
 0x315   : > { %v4791_v52 = vadd.f32 %v2875_v27, %v2077_v10  ;;  %v2182_v10 = vpop.permute.xlu0 %2181  ;;  %v2172_v39 = vpop.permute.xlu2 %2171 }
 0x316   : > { %2260 = vmatpush.msrb.mxu2 %v4788_v54 }
 0x317   : > { %2324 = vmatpush.msrb.mxu3 %v4791_v52 }
 0x318   : > { %2261 = vmatpush.msrb.mxu2 %v4795_v34 }
 0x319   : > { %2325 = vmatpush.msrb.mxu3 %v4799_v30 }
 0x31a   : > { %2262 = vmatpush.msrb.mxu2 %v4803_v51 }
 0x31b   : > { %2636 = vmatmul.msk.f32.vlgmr.msrb.gmra.mxu2 %vm360_vm0, %v2087_v47  ;;  %2326 = vmatpush.msrb.mxu3 %v4810_v36  ;;  %v2177_v27 = vpop.permute.xlu1 %2176 }
 0x31d   : > { %2327 = vmatpush.msrb.mxu3 %v4816_v37  ;;  %v2167_v28 = vpop.permute.xlu0 %2166 }
 0x31e   : > { %2652 = vmatmul.msk.f32.vlgmr.msrb.gmra.mxu3 %vm360_vm0, %v2087_v47 }
 0x323   : > { %2637 = vmatmul.msk.f32.gmra.mxu2 %vm360_vm0, %v2088_v61 }
 0x326   : > { %2653 = vmatmul.msk.f32.gmra.mxu3 %vm360_vm0, %v2088_v61 }
 0x32b   : > { %2638 = vmatmul.msk.f32.gmra.mxu2 %vm360_vm0, %v2089_v2 }
 0x32e   : > { %2654 = vmatmul.msk.f32.gmra.mxu3 %vm360_vm0, %v2089_v2  ;;  %v2162_v2 = vpop.permute.xlu1 %2161 }
 0x333   : > { %2639 = vmatmul.msk.f32.gmra.mxu2 %vm360_vm0, %v2090_v14 }
 0x336   : > { %2655 = vmatmul.msk.f32.gmra.mxu3 %vm360_vm0, %v2090_v14 }
 0x33b   : > { %2640 = vmatmul.msk.f32.gmra.mxu2 %vm360_vm0, %v2091_v62 }
 0x33e   : > { %2656 = vmatmul.msk.f32.gmra.mxu3 %vm360_vm0, %v2091_v62 }
 0x343   : > { %2641 = vmatmul.msk.f32.gmra.mxu2 %vm360_vm0, %v2092_v25 }
 0x346   : > { %2657 = vmatmul.msk.f32.gmra.mxu3 %vm360_vm0, %v2092_v25 }
 0x34b   : > { %2642 = vmatmul.msk.f32.gmra.mxu2 %vm360_vm0, %v2093_v5 }
 0x34e   : > { %2658 = vmatmul.msk.f32.gmra.mxu3 %vm360_vm0, %v2093_v5 }
 0x353   : > { %2643 = vmatmul.msk.f32.gmra.mxu2 %vm360_vm0, %v2094_v35 }
 0x356   : > { %2659 = vmatmul.msk.f32.gmra.mxu3 %vm360_vm0, %v2094_v35 }
 0x35b   : > { %2644 = vmatmul.msk.f32.gmra.mxu2 %vm360_vm0, %v2095_v22 }
 0x35e   : > { %2660 = vmatmul.msk.f32.gmra.mxu3 %vm360_vm0, %v2095_v22  ;;  %v2157_v22 = vpop.permute.xlu2 %2156 }
 0x363   : > { %2645 = vmatmul.msk.f32.gmra.mxu2 %vm360_vm0, %v2096_v29 }
 0x366   : > { %2661 = vmatmul.msk.f32.gmra.mxu3 %vm360_vm0, %v2096_v29 }
 0x36b   : > { %2646 = vmatmul.msk.f32.gmra.mxu2 %vm360_vm0, %v2097_v6 }
 0x36e   : > { %2662 = vmatmul.msk.f32.gmra.mxu3 %vm360_vm0, %v2097_v6 }
 0x373   : > { %2647 = vmatmul.msk.f32.gmra.mxu2 %vm360_vm0, %v2098_v18 }
 0x376   : > { %2663 = vmatmul.msk.f32.gmra.mxu3 %vm360_vm0, %v2098_v18 }
 0x37b   : > { %2648 = vmatmul.msk.f32.gmra.mxu2 %vm360_vm0, %v2099_v46 }
 0x37e   : > { %2664 = vmatmul.msk.f32.gmra.mxu3 %vm360_vm0, %v2099_v46 }
 0x383   : > { %2649 = vmatmul.msk.f32.gmra.mxu2 %vm360_vm0, %v2100_v56 }
 0x386   : > { %2665 = vmatmul.msk.f32.gmra.mxu3 %vm360_vm0, %v2100_v56  ;;  %v2152_v56 = vpop.permute.xlu0 %2151 }
 0x38b   : > { %2650 = vmatmul.msk.f32.gmra.mxu2 %vm360_vm0, %v2101_v26 }
 0x38e   : > { %2666 = vmatmul.msk.f32.gmra.mxu3 %vm360_vm0, %v2101_v26 }
 0x393   : > { %2651 = vmatmul.msk.f32.gmra.mxu2 %vm360_vm0, %v2102_v24 }
 0x396   : > { %2667 = vmatmul.msk.f32.gmra.mxu3 %vm360_vm0, %v2102_v24 }
 0x39e   : > { %v4895_v21 = vpop.f32.mrf.mxu2 }
 0x3a1   : > { %v4897_v4 = vpop.f32.mrf.mxu3 }
 0x3a6   : > { %v4899_v60 = vpop.f32.mrf.mxu2 }
 0x3a9   : > { %v4901_v40 = vpop.f32.mrf.mxu3 }
 0x3ae   : > { %v4903_v42 = vpop.f32.mrf.mxu2 }
 0x3b1   : > { %v4905_v55 = vpop.f32.mrf.mxu3 }
 0x3b6   : > { %v4907_v32 = vpop.f32.mrf.mxu2 }
 0x3b9   : > { %v4909_v7 = vpop.f32.mrf.mxu3 }
 0x3be   : > { %v4911_v45 = vpop.f32.mrf.mxu2 }
 0x3c1   : > { %v4913_v12 = vpop.f32.mrf.mxu3 }
 0x3c6   : > { %v4915_v44 = vpop.f32.mrf.mxu2 }
 0x3c9   : > { %v4917_v3 = vpop.f32.mrf.mxu3 }
 0x3ce   : > { %v4919_v23 = vpop.f32.mrf.mxu2 }
 0x3d1   : > { %v4921_v49 = vpop.f32.mrf.mxu3 }
 0x3d6   : > { %v2285_v0 = vpop.f32.mrf.mxu2 }
 0x3d9   : > { %v4923_v58 = vpop.f32.mrf.mxu3 }
 0x3de   : > { %v2288_v43 = vpop.f32.mrf.mxu2 }
 0x3e1   : > { %v4925_v33 = vpop.f32.mrf.mxu3 }
 0x3e6   : > { %v2291_v50 = vpop.f32.mrf.mxu2 }
 0x3e9   : > { %v2356_v59 = vpop.f32.mrf.mxu3 }
 0x3ee   : > { %v2294_v31 = vpop.f32.mrf.mxu2 }
 0x3ef   : > { %v2295_v26 = vadd.f32 %v2294_v31, %v2172_v39 }
 0x3f1   : > { %v2359_v48 = vpop.f32.mrf.mxu3 }
 0x3f6   : > { %v2297_v1 = vpop.f32.mrf.mxu2 }
 0x3f7   : > { %v2298_v29 = vadd.f32 %v2297_v1, %v2177_v27  ;;  %v2360_v1 = vadd.f32 %v2359_v48, %v2172_v39 }
 0x3f9   : > { %v2362_v8 = vpop.f32.mrf.mxu3 }
 0x3fe   : > { %v2300_v17 = vpop.f32.mrf.mxu2 }
 0x3ff   : > { %v2301_v62 = vadd.f32 %v2300_v17, %v2182_v10  ;;  %v2363_v17 = vadd.f32 %v2362_v8, %v2177_v27  ;;  %v2354_v27 = vadd.f32 %v4925_v33, %v2162_v2 }
 0x401   : > { %v2365_v57 = vpop.f32.mrf.mxu3  ;;  %v2401_v24 = vmax.f32 %v2301_v62, 0.0  ;;  %v2394_v62 = vmax.f32 %v2354_v27, 0.0 }
 0x406   : > { %v2303_v19 = vpop.f32.mrf.mxu2 }
 0x407   : > { %v2304_v15 = vadd.f32 %v2303_v19, %v2187_v13  ;;  %v2292_v19 = vadd.f32 %v2291_v50, %v2167_v28  ;;  %v2283_v50 = vadd.f32 %v4919_v23, %v2152_v56  ;;  %v2348_v23 = vadd.f32 %v4921_v49, %v2152_v56 }
 0x409   : > { %v2368_v16 = vpop.f32.mrf.mxu3  ;;  %v2403_v6 = vmax.f32 %v2304_v15, 0.0  ;;  %v2395_v31 = vmax.f32 %v2292_v19, 0.0  ;;  %v2357_v15 = vadd.f32 %v2356_v59, %v2167_v28  ;;  %v2389_v28 = vmax.f32 %v2283_v50, 0.0 }
 0x40a   : > { %v2369_v18 = vadd.f32 %v2368_v16, %v2187_v13  ;;  %v2147_v13 = vpop.permute.xlu1 %2146  ;;  %v2286_v16 = vadd.f32 %v2285_v0, %v2157_v22  ;;  %v2351_v0 = vadd.f32 %v4923_v58, %v2157_v22  ;;  %v2390_v22 = vmax.f32 %v2348_v23, 0.0 }
 0x40b   : > { %v2280_v48 = vadd.f32 %v4915_v44, %v2147_v13 }
 0x40c   : > { %v2391_v39 = vmax.f32 %v2286_v16, 0.0  ;;  %v2392_v44 = vmax.f32 %v2351_v0, 0.0 }
 0x40e   : > { %v2306_v38 = vpop.f32.mrf.mxu2 }
 0x40f   : > { %v2307_v47 = vadd.f32 %v2306_v38, %v2192_v20  ;;  %v2366_v38 = vadd.f32 %v2365_v57, %v2182_v10  ;;  %v2400_v57 = vmax.f32 %v2363_v17, 0.0  ;;  %v2142_v10 = vpop.permute.xlu2 %2141 }
 0x410   : > { %v2277_v59 = vadd.f32 %v4911_v45, %v2142_v10  ;;  %v2342_v45 = vadd.f32 %v4913_v12, %v2142_v10 }
 0x411   : > { %v2371_v41 = vpop.f32.mrf.mxu3  ;;  %v2405_v25 = vmax.f32 %v2307_v47, 0.0  ;;  %v2404_v47 = vmax.f32 %v2369_v18, 0.0 }
 0x412   : > { %v2372_v5 = vadd.f32 %v2371_v41, %v2192_v20  ;;  %v2397_v20 = vmax.f32 %v2295_v26, 0.0  ;;  %v2402_v41 = vmax.f32 %v2366_v38, 0.0  ;;  %v2132_v58 = vpop.permute.xlu1 %2131  ;;  %v2386_v26 = vmax.f32 %v2342_v45, 0.0 }
 0x416   : > { %v2309_v11 = vpop.f32.mrf.mxu2 }
 0x417   : > { %v2310_v9 = vadd.f32 %v2309_v11, %v2197_v53  ;;  %v2406_v11 = vmax.f32 %v2372_v5, 0.0  ;;  %v2271_v5 = vadd.f32 %v4903_v42, %v2132_v58  ;;  %v2127_v49 = vpop.permute.xlu2 %2126  ;;  %v2336_v42 = vadd.f32 %v4905_v55, %v2132_v58 }
 0x419   : > { %v2407_v61 = vmax.f32 %v2310_v9, 0.0  ;;  %v2374_v14 = vpop.f32.mrf.mxu3  ;;  %v2399_v9 = vmax.f32 %v2298_v29, 0.0  ;;  %v2268_v29 = vadd.f32 %v4899_v60, %v2127_v49  ;;  %v2381_v56 = vmax.f32 %v2271_v5, 0.0 }
 0x41a   : > { %v2375_v35 = vadd.f32 %v2374_v14, %v2197_v53  ;;  %v2289_v53 = vadd.f32 %v2288_v43, %v2162_v2  ;;  %v2137_v43 = vpop.permute.xlu0 %2136  ;;  %v2396_v14 = vmax.f32 %v2357_v15, 0.0  ;;  %v2387_v2 = vmax.f32 %v2280_v48, 0.0  ;;  %v2420_v17 = vpop.permute.xlu1 %2419 }
 0x41b   : > { %2437 = vmatpush.msrb.mxu0 %v2407_v61  ;;  %v2398_v61 = vmax.f32 %v2360_v1, 0.0  ;;  %v2274_v33 = vadd.f32 %v4907_v32, %v2137_v43  ;;  %v2339_v32 = vadd.f32 %v4909_v7, %v2137_v43  ;;  %v2379_v12 = vmax.f32 %v2268_v29, 0.0 }
 0x41c   : > { %v2408_v46 = vmax.f32 %v2375_v35, 0.0  ;;  %v2393_v8 = vmax.f32 %v2289_v53, 0.0  ;;  %v2385_v35 = vmax.f32 %v2277_v59, 0.0 }
 0x41d   : > { %2438 = vmatpush.msrb.mxu0 %v2405_v25  ;;  %v2345_v25 = vadd.f32 %v4917_v3, %v2147_v13  ;;  %v2384_v38 = vmax.f32 %v2339_v32, 0.0 }
 0x41e   : > { %2466 = vmatpush.msrb.mxu1 %v2408_v46 }
 0x41f   : > { %2439 = vmatpush.msrb.mxu0 %v2403_v6  ;;  %v2383_v6 = vmax.f32 %v2274_v33, 0.0  ;;  %v2388_v18 = vmax.f32 %v2345_v25, 0.0  ;;  %v2425_v16 = vpop.permute.xlu2 %2424 }
 0x420   : > { %2467 = vmatpush.msrb.mxu1 %v2406_v11  ;;  %v2382_v11 = vmax.f32 %v2336_v42, 0.0 }
 0x421   : > { %2440 = vmatpush.msrb.mxu0 %v2401_v24  ;;  %v2333_v24 = vadd.f32 %v4901_v40, %v2127_v49  ;;  %v2411_v40 = vld [vmem:[%s5016_s6 + $0x10] sm:$0xff] }
 0x422   : > { %2468 = vmatpush.msrb.mxu1 %v2404_v47  ;;  %v2122_v3 = vpop.permute.xlu0 %2121 }
 0x423   : > { %2441 = vmatpush.msrb.mxu0 %v2399_v9  ;;  %v2265_v46 = vadd.f32 %v4895_v21, %v2122_v3  ;;  %v2330_v7 = vadd.f32 %v4897_v4, %v2122_v3  ;;  %v2409_v21 = vld [vmem:[%s5016_s6] sm:$0xff]  ;;  %v2380_v55 = vmax.f32 %v2333_v24, 0.0  ;;  %v2410_v4 = vld [vmem:[%s5016_s6 + $0x8] sm:$0xff]  ;;  %v2412_v9 = vld [vmem:[%s5016_s6 + $0x18] sm:$0xff] }
 0x424   : > { %2469 = vmatpush.msrb.mxu1 %v2402_v41 }
 0x425   : > { %2442 = vmatpush.msrb.mxu0 %v2397_v20  ;;  %v2377_v60 = vmax.f32 %v2265_v46, 0.0  ;;  %v2378_v19 = vmax.f32 %v2330_v7, 0.0 }
 0x426   : > { %2470 = vmatpush.msrb.mxu1 %v2400_v57 }
 0x427   : > { %2443 = vmatpush.msrb.mxu0 %v2395_v31 }
 0x428   : > { %2471 = vmatpush.msrb.mxu1 %v2398_v61 }
 0x429   : > { %2444 = vmatpush.msrb.mxu0 %v2393_v8 }
 0x42a   : > { %2472 = vmatpush.msrb.mxu1 %v2396_v14  ;;  %v2430_v8 = vpop.permute.xlu0 %2429 }
 0x42b   : > { %2445 = vmatpush.msrb.mxu0 %v2391_v39  ;;  %v2435_v39 = vpop.permute.xlu1 %2434 }
 0x42c   : > { %2473 = vmatpush.msrb.mxu1 %v2394_v62 }
 0x42d   : > { %2446 = vmatpush.msrb.mxu0 %v2389_v28 }
 0x42e   : > { %2474 = vmatpush.msrb.mxu1 %v2392_v44 }
 0x42f   : > { %2447 = vmatpush.msrb.mxu0 %v2387_v2 }
 0x430   : > { %2475 = vmatpush.msrb.mxu1 %v2390_v22 }
 0x431   : > { %2448 = vmatpush.msrb.mxu0 %v2385_v35 }
 0x432   : > { %2476 = vmatpush.msrb.mxu1 %v2388_v18 }
 0x433   : > { %2449 = vmatpush.msrb.mxu0 %v2383_v6 }
 0x434   : > { %2477 = vmatpush.msrb.mxu1 %v2386_v26 }
 0x435   : > { %2450 = vmatpush.msrb.mxu0 %v2381_v56 }
 0x436   : > { %2478 = vmatpush.msrb.mxu1 %v2384_v38 }
 0x437   : > { %2451 = vmatpush.msrb.mxu0 %v2379_v12 }
 0x438   : > { %2479 = vmatpush.msrb.mxu1 %v2382_v11 }
 0x439   : > { %2452 = vmatpush.msrb.mxu0 %v2377_v60 }
 0x43a   : > { %2453 = vmatmul.f32.vlgmr.msrb.gmra.mxu0 %v2409_v21  ;;  %2480 = vmatpush.msrb.mxu1 %v2380_v55 }
 0x43c   : > { %2481 = vmatpush.msrb.mxu1 %v2378_v19 }
 0x43d   : > { %2482 = vmatmul.f32.vlgmr.msrb.gmra.mxu1 %v2409_v21 }
 0x442   : > { %2456 = vmatmul.f32.gmra.mxu0 %v2410_v4 }
 0x445   : > { %2485 = vmatmul.f32.gmra.mxu1 %v2410_v4 }
 0x44a   : > { %2459 = vmatmul.f32.gmra.mxu0 %v2411_v40 }
 0x44d   : > { %2488 = vmatmul.f32.gmra.mxu1 %v2411_v40 }
 0x452   : > { %2462 = vmatmul.f32.gmra.mxu0 %v2412_v9 }
 0x455   : > { %2491 = vmatmul.f32.gmra.mxu1 %v2412_v9 }
 0x4b7   : > { %v2454_v47 = vpop.f32.mrf.mxu0 }
 0x4b8   : > { %v2455_v53 = vadd.f32 %v2454_v47, %v2420_v17 }
 0x4ba   : > { %v2495_v20 = vadd.f32 %v2455_v53, %v4803_v51  ;;  %v2483_v1 = vpop.f32.mrf.mxu1 }
 0x4bb   : > { %v2484_v41 = vadd.f32 %v2483_v1, %v2420_v17 }
 0x4bc   : > { %2503 = vst [vmem:[%s4957_s13] sm:$0xff] %v2495_v20 }
 0x4bd   : > { %v2496_v13 = vadd.f32 %v2484_v41, %v4816_v37 }
 0x4bf   : > { %v2457_v31 = vpop.f32.mrf.mxu0  ;;  %2504 = vst [vmem:[%s4957_s13 + $0x8] sm:$0xff] %v2496_v13 }
 0x4c0   : > { %v2458_v15 = vadd.f32 %v2457_v31, %v2425_v16 }
 0x4c2   : > { %v2497_v57 = vadd.f32 %v2458_v15, %v4795_v34  ;;  %v2486_v51 = vpop.f32.mrf.mxu1 }
 0x4c3   : > { %v2487_v10 = vadd.f32 %v2486_v51, %v2425_v16 }
 0x4c4   : > { %2505 = vst [vmem:[%s4957_s13 + $0x10] sm:$0xff] %v2497_v57 }
 0x4c5   : > { %v2498_v50 = vadd.f32 %v2487_v10, %v4810_v36 }
 0x4c7   : > { %v2460_v27 = vpop.f32.mrf.mxu0  ;;  %2506 = vst [vmem:[%s4957_s13 + $0x18] sm:$0xff] %v2498_v50 }
 0x4c8   : > { %v2461_v61 = vadd.f32 %v2460_v27, %v2430_v8 }
 0x4ca   : > { %v2499_v37 = vadd.f32 %v2461_v61, %v4788_v54  ;;  %v2489_v43 = vpop.f32.mrf.mxu1 }
 0x4cb   : > { %v2490_v48 = vadd.f32 %v2489_v43, %v2430_v8 }
 0x4cc   : > { %2507 = vst [vmem:[%s4957_s13 + $0x20] sm:$0xff] %v2499_v37 }
 0x4cd   : > { %v2500_v34 = vadd.f32 %v2490_v48, %v4799_v30 }
 0x4cf   : > { %v2463_v0 = vpop.f32.mrf.mxu0  ;;  %2508 = vst [vmem:[%s4957_s13 + $0x28] sm:$0xff] %v2500_v34 }
 0x4d0   : > { %v2464_v36 = vadd.f32 %v2463_v0, %v2435_v39 }
 0x4d2   : > { %v2501_v54 = vadd.f32 %v2464_v36, %v4784_v63  ;;  %v2492_v14 = vpop.f32.mrf.mxu1 }
 0x4d3   : > { %v2493_v59 = vadd.f32 %v2492_v14, %v2435_v39 }
 0x4d4   : > { %2509 = vst [vmem:[%s4957_s13 + $0x30] sm:$0xff] %v2501_v54 }
 0x4d5   : > { %v2502_v30 = vadd.f32 %v2493_v59, %v4791_v52 }
 0x4d7   : > { %2510 = vst [vmem:[%s4957_s13 + $0x38] sm:$0xff] %v2502_v30 }
 0x4d8   : > { %2908 = shalt.err (!%p2905_p5)
}
 0x4d9   : > { %s2954_s24 = smov 256   ;;  %s2955_s13 = smov 512  }
 0x4da   : > { %s2956_s18 = smov 16  }
 0x4db   : > { %2675 = dma.vmem_to_hbm [thread:$0]  (%p3040_p6), %s2525_s20, 1024, %s2527_s10, %s2512_s9, %s2954_s24, %s2955_s13, %s2956_s18  }
 0x4dc PF: > { %s2541_s19 = sand.u32 1, %s2931_s27   ;;  %p2678_p7 = pnand %p2597_p9, %p3044_p8 }
 0x4dd   : > { %s2542_s12 = scalar_lea.sflag [#allocation4], %s2541_s19 }
 0x4de   : > { %p2679_p10 = pneg %p2678_p7 }
 0x4e0   : > { %2926 = dma.done.wait (%p2679_p10), %s2542_s12, 1024  }
 0x4e1   : > { %2928 = vsyncadd (%p2679_p10), %s2542_s12, 4294966272  ;;  %p18_p11 = scmp.ge.s32.totalorder %s3025_s11, 4   ;;  %s5310_s27 = smov %s2935_s28 }
 0x4e2   : > { %s5311_s28 = smov %s2939_s29  ;;  %s5312_s29 = smov %s3038_s14 }
 0x4e3   : > { %s5313_s30 = smov %s3025_s11  ;;  %20 = sbr.rel (!%p18_p11) target bundleno = 3 (0x3), region = 115 }
 0x4e8   :  { %2548 = vsyncpa [#allocation4], 1 }
 0x4e9   :  { %2550 = vsyncpa [#allocation4 + $0x1], 1 }

</bundles_post_ra>
